<compile_context>
chip_gen: v7x
topology: tpu7x:2x2x1
jax: 0.10.0
libtpu: 0.0.40
codegen_flags: <defaults>
</compile_context>

<pallas_src>
import numpy as np

import jax
import jax.numpy as jnp
from jax import lax
from jax.experimental import pallas as pl
from jax.experimental.pallas import tpu as pltpu


def _round_up(n, m):
    return ((n + m - 1) // m) * m


# ---------------------------------------------------------------------------
# Fused Pallas kernel: full SimpleNet forward for one batch tile.
# ---------------------------------------------------------------------------

def _simplenet_kernel(x_ref, m1_ref, b1_ref, m2_ref, b2_ref,
                      w3_ref, b3_ref, w4_ref, b4_ref, w5_ref, b5_ref,
                      o_ref):
    f32 = jnp.float32
    bf16 = jnp.bfloat16

    # conv1 + BN1 (folded) + ReLU.  Columns are 4 pool-phase blocks, each
    # zero-padded to a multiple of 128 lanes, so the 2x2/stride-2 max-pool is
    # a max over 4 contiguous lane-aligned slices (pure VPU work).
    y1 = jnp.dot(x_ref[...], m1_ref[...], preferred_element_type=f32) + b1_ref[...]
    y1 = jnp.maximum(y1, 0.0)
    n1 = y1.shape[1] // 4
    p1 = jnp.maximum(jnp.maximum(y1[:, 0 * n1:1 * n1], y1[:, 1 * n1:2 * n1]),
                     jnp.maximum(y1[:, 2 * n1:3 * n1], y1[:, 3 * n1:4 * n1]))

    # conv2 + BN2 (folded) + ReLU + pool (same trick).  Pooled columns are
    # already in PyTorch NCHW flatten order (zero pad columns at the tail).
    y2 = jnp.dot(p1.astype(bf16), m2_ref[...],
                 preferred_element_type=f32) + b2_ref[...]
    y2 = jnp.maximum(y2, 0.0)
    n2 = y2.shape[1] // 4
    p2 = jnp.maximum(jnp.maximum(y2[:, 0 * n2:1 * n2], y2[:, 1 * n2:2 * n2]),
                     jnp.maximum(y2[:, 2 * n2:3 * n2], y2[:, 3 * n2:4 * n2]))

    # fc1 -> relu -> fc2 -> relu -> fc3 (dropout = identity in eval mode).
    h = jnp.dot(p2.astype(bf16), w3_ref[...],
                preferred_element_type=f32) + b3_ref[...]
    h = jnp.maximum(h, 0.0)
    h = jnp.dot(h.astype(bf16), w4_ref[...],
                preferred_element_type=f32) + b4_ref[...]
    h = jnp.maximum(h, 0.0)
    o = jnp.dot(h.astype(bf16), w5_ref[...],
                preferred_element_type=f32) + b5_ref[...]
    o_ref[...] = o.astype(o_ref.dtype)


# ---------------------------------------------------------------------------
# Host-side (one-time) parameter preparation: fold conv+BN+pool into matmul
# weights with 128-lane-aligned, pool-phase-blocked column layouts (bf16).
# ---------------------------------------------------------------------------

def init_params(key, input_size, classes):
    """PyTorch-default-style init for SimpleNet (eval-mode BN stats)."""
    assert (input_size - 8) % 4 == 0
    fc_s = input_size // 4 - 2
    keys = jax.random.split(key, 10)

    def u(k, shape, fan_in):
        bound = 1.0 / jnp.sqrt(jnp.float32(fan_in))
        return jax.random.uniform(k, shape, jnp.float32, -bound, bound)

    p = {}
    p['conv1_w'] = u(keys[0], (6, 1, 5, 5), 1 * 5 * 5)
    p['conv1_b'] = u(keys[1], (6,), 1 * 5 * 5)
    p['conv2_w'] = u(keys[2], (16, 6, 5, 5), 6 * 5 * 5)
    p['conv2_b'] = u(keys[3], (16,), 6 * 5 * 5)
    p['bn1_gamma'] = jnp.ones((6,), jnp.float32)
    p['bn1_beta'] = jnp.zeros((6,), jnp.float32)
    p['bn1_mean'] = jnp.zeros((6,), jnp.float32)
    p['bn1_var'] = jnp.ones((6,), jnp.float32)
    p['bn2_gamma'] = jnp.ones((16,), jnp.float32)
    p['bn2_beta'] = jnp.zeros((16,), jnp.float32)
    p['bn2_mean'] = jnp.zeros((16,), jnp.float32)
    p['bn2_var'] = jnp.ones((16,), jnp.float32)
    fin1 = 16 * fc_s * fc_s
    p['fc1_w'] = u(keys[4], (120, fin1), fin1)
    p['fc1_b'] = u(keys[5], (120,), fin1)
    p['fc2_w'] = u(keys[6], (84, 120), 120)
    p['fc2_b'] = u(keys[7], (84,), 120)
    p['fc3_w'] = u(keys[8], (classes, 84), 84)
    p['fc3_b'] = u(keys[9], (classes,), 84)
    return p


def prepare_params(params, input_size, classes, eps=1e-5):
    assert (input_size - 8) % 4 == 0
    S = input_size
    P = S // 2                  # pooled1 spatial (conv1 is 'same')
    O2 = P - 4                  # conv2 output spatial
    F = O2 // 2                 # pooled2 spatial == fc_s
    C1, C2, KS = 6, 16, 5

    K1 = _round_up(S * S, 128)          # input feature dim (lane-padded)
    W1p = _round_up(P * P * C1, 128)    # per-phase conv1 output width
    W2p = _round_up(F * F * C2, 128)    # per-phase conv2 output width

    w1 = np.asarray(params['conv1_w'], np.float32)
    w2 = np.asarray(params['conv2_w'], np.float32)
    s1 = np.asarray(params['bn1_gamma'], np.float32) / np.sqrt(
        np.asarray(params['bn1_var'], np.float32) + eps)
    sh1 = (np.asarray(params['conv1_b'], np.float32)
           - np.asarray(params['bn1_mean'], np.float32)) * s1 \
        + np.asarray(params['bn1_beta'], np.float32)
    s2 = np.asarray(params['bn2_gamma'], np.float32) / np.sqrt(
        np.asarray(params['bn2_var'], np.float32) + eps)
    sh2 = (np.asarray(params['conv2_b'], np.float32)
           - np.asarray(params['bn2_mean'], np.float32)) * s2 \
        + np.asarray(params['bn2_beta'], np.float32)

    # ---- conv1(+BN scale) as one matmul over the UNPADDED S*S input:
    #      taps landing in the zero halo contribute 0 and are skipped.
    #      Columns: 4 pool phases x [ (r*P+c)*C1 + c_out ], each padded to W1p.
    M1 = np.zeros((K1, 4 * W1p), np.float32)
    shape1 = (P, P, C1)
    r = np.arange(P).reshape(P, 1, 1)
    c = np.arange(P).reshape(1, P, 1)
    co = np.arange(C1).reshape(1, 1, C1)
    for dr in range(2):
        for dc in range(2):
            ph = 2 * dr + dc
            cols = np.broadcast_to(ph * W1p + (r * P + c) * C1 + co, shape1)
            for i in range(KS):
                for j in range(KS):
                    rr = 2 * r + dr + i - 2          # input row (halo coords removed)
                    cc = 2 * c + dc + j - 2          # input col
                    valid = np.broadcast_to(
                        (rr >= 0) & (rr < S) & (cc >= 0) & (cc < S), shape1)
                    rows = np.broadcast_to(rr * S + cc, shape1)
                    vals = np.broadcast_to(
                        (s1 * w1[:, 0, i, j]).reshape(1, 1, C1), shape1)
                    M1[rows[valid], cols[valid]] = vals[valid]
    b1v = np.zeros((1, 4 * W1p), np.float32)
    for ph in range(4):
        b1v[0, ph * W1p: ph * W1p + P * P * C1] = np.tile(sh1, P * P)

    # ---- conv2(+BN scale) as one matmul: (W1p rows) -> 4 phases x (C2,F,F),
    #      column order within a phase == PyTorch NCHW flatten order,
    #      each phase padded to W2p.
    M2 = np.zeros((W1p, 4 * W2p), np.float32)
    shape2 = (F, F, C1, C2)
    r2 = np.arange(F).reshape(F, 1, 1, 1)
    c2 = np.arange(F).reshape(1, F, 1, 1)
    ci = np.arange(C1).reshape(1, 1, C1, 1)
    co2 = np.arange(C2).reshape(1, 1, 1, C2)
    for dr in range(2):
        for dc in range(2):
            ph = 2 * dr + dc
            cols = np.broadcast_to(
                ph * W2p + co2 * (F * F) + r2 * F + c2, shape2)
            for i in range(KS):
                for j in range(KS):
                    rows = np.broadcast_to(
                        ((2 * r2 + dr + i) * P + (2 * c2 + dc + j)) * C1 + ci,
                        shape2)
                    wmat = (w2[:, :, i, j] * s2[:, None]).T        # (C1, C2)
                    vals = np.broadcast_to(wmat.reshape(1, 1, C1, C2), shape2)
                    M2[rows.ravel(), cols.ravel()] = vals.ravel()
    b2v = np.zeros((1, 4 * W2p), np.float32)
    for ph in range(4):
        b2v[0, ph * W2p: ph * W2p + F * F * C2] = np.repeat(sh2, F * F)

    # ---- fc layers: transposed + zero-padded to lane-dense widths ----
    def pad_to(a, rows, cols):
        out = np.zeros((rows, cols), np.float32)
        out[:a.shape[0], :a.shape[1]] = a
        return out

    fc1_w = np.asarray(params['fc1_w'], np.float32)
    fc2_w = np.asarray(params['fc2_w'], np.float32)
    fc3_w = np.asarray(params['fc3_w'], np.float32)
    n_h1, n_h2 = 128, 128
    n_cls = _round_up(classes, 128)
    W3 = pad_to(fc1_w.T, W2p, n_h1)            # padded p2 columns hit zero rows
    B3 = np.zeros((1, n_h1), np.float32)
    B3[0, :fc1_w.shape[0]] = np.asarray(params['fc1_b'], np.float32)
    W4 = pad_to(fc2_w.T, n_h1, n_h2)
    B4 = np.zeros((1, n_h2), np.float32)
    B4[0, :fc2_w.shape[0]] = np.asarray(params['fc2_b'], np.float32)
    W5 = pad_to(fc3_w.T, n_h2, n_cls)
    B5 = np.zeros((1, n_cls), np.float32)
    B5[0, :classes] = np.asarray(params['fc3_b'], np.float32)

    bf16 = jnp.bfloat16
    return {
        'm1': jnp.asarray(M1, bf16), 'b1': jnp.asarray(b1v),
        'm2': jnp.asarray(M2, bf16), 'b2': jnp.asarray(b2v),
        'w3': jnp.asarray(W3, bf16), 'b3': jnp.asarray(B3),
        'w4': jnp.asarray(W4, bf16), 'b4': jnp.asarray(B4),
        'w5': jnp.asarray(W5, bf16), 'b5': jnp.asarray(B5),
        'classes': classes,
    }


# ---------------------------------------------------------------------------
# Forward: one pallas_call over batch tiles.
# ---------------------------------------------------------------------------

def simplenet_forward(prepared, x_nchw, *, max_block_b=256,
                      single_buffer_weights=True):
    B, _, S, _ = x_nchw.shape
    K1 = prepared['m1'].shape[0]

    # Flatten each image to one lane-major row (no halo pad), lane-pad, bf16.
    x = x_nchw[:, 0].reshape(B, S * S)
    if K1 > S * S:
        x = jnp.pad(x, ((0, 0), (0, K1 - S * S)))
    x = x.astype(jnp.bfloat16)

    # Batch tile: 256 fills the v6e/v7x MXU; shrink for small batches and
    # prefer >=2 grid steps so v7x's two TensorCores both get work.
    block_b = min(max_block_b, _round_up(B, 8))
    if block_b > 8 and _round_up(B, block_b) // block_b < 2:
        block_b = max(8, _round_up(pl.cdiv(B, 2), 8))
    Bp = _round_up(B, block_b)
    if Bp != B:
        x = jnp.pad(x, ((0, Bp - B), (0, 0)))

    weights = (prepared['m1'], prepared['b1'], prepared['m2'], prepared['b2'],
               prepared['w3'], prepared['b3'], prepared['w4'], prepared['b4'],
               prepared['w5'], prepared['b5'])
    n_out = prepared['w5'].shape[1]

    # Explicit VMEM budget: single-buffered weights + double-buffered x/out
    # tiles + f32 intermediates, with headroom (clamped to physical VMEM).
    weight_bytes = sum(int(w.size) * w.dtype.itemsize for w in weights)
    io_bytes = 2 * block_b * (K1 * 2 + n_out * 4)
    inter_cols = (prepared['m1'].shape[1] + prepared['m1'].shape[1] // 4
                  + prepared['m2'].shape[1] + prepared['m2'].shape[1] // 4
                  + 2 * 128 + n_out)
    inter_bytes = 4 * block_b * inter_cols
    vmem_limit = int(min(max(weight_bytes + io_bytes + 3 * inter_bytes
                             + (8 << 20), 32 << 20), 64 << 20))

    x_spec = pl.BlockSpec((block_b, K1), lambda i: (i, 0))
    # Weights/biases: whole-array blocks with constant index maps -> DMA'd to
    # VMEM once and kept resident; single-buffered (never re-fetched).
    w_kwargs = {}
    if single_buffer_weights and hasattr(pl, "Buffered"):
        w_kwargs["pipeline_mode"] = pl.Buffered(1)
    w_specs = [pl.BlockSpec(w.shape, lambda i: (0, 0), **w_kwargs)
               for w in weights]

    out = pl.pallas_call(
        _simplenet_kernel,
        out_shape=jax.ShapeDtypeStruct((Bp, n_out), jnp.float32),
        grid=(Bp // block_b,),
        in_specs=[x_spec] + w_specs,
        out_specs=pl.BlockSpec((block_b, n_out), lambda i: (i, 0)),
        compiler_params=pltpu.CompilerParams(
            dimension_semantics=("parallel",),
            vmem_limit_bytes=vmem_limit),
    )(x, *weights)
    return out[:B, :prepared['classes']]


# ---------------------------------------------------------------------------
# Pure-JAX reference (for a correctness self-check).
# ---------------------------------------------------------------------------

def reference_forward(params, x, eps=1e-5):
    hp = lax.Precision.HIGHEST

    def bn(y, g, b, m, v):
        s = g / jnp.sqrt(v + eps)
        return y * s[None, :, None, None] + (b - m * s)[None, :, None, None]

    y = lax.conv_general_dilated(x, params['conv1_w'], (1, 1), ((2, 2), (2, 2)),
                                 dimension_numbers=('NCHW', 'OIHW', 'NCHW'),
                                 precision=hp)
    y = y + params['conv1_b'][None, :, None, None]
    y = jnp.maximum(bn(y, params['bn1_gamma'], params['bn1_beta'],
                       params['bn1_mean'], params['bn1_var']), 0.0)
    y = lax.reduce_window(y, -jnp.inf, lax.max, (1, 1, 2, 2), (1, 1, 2, 2), 'VALID')
    y = lax.conv_general_dilated(y, params['conv2_w'], (1, 1), ((0, 0), (0, 0)),
                                 dimension_numbers=('NCHW', 'OIHW', 'NCHW'),
                                 precision=hp)
    y = y + params['conv2_b'][None, :, None, None]
    y = jnp.maximum(bn(y, params['bn2_gamma'], params['bn2_beta'],
                       params['bn2_mean'], params['bn2_var']), 0.0)
    y = lax.reduce_window(y, -jnp.inf, lax.max, (1, 1, 2, 2), (1, 1, 2, 2), 'VALID')
    flat = y.reshape(x.shape[0], -1)
    h = jnp.maximum(jnp.dot(flat, params['fc1_w'].T, precision=hp) + params['fc1_b'], 0.0)
    h = jnp.maximum(jnp.dot(h, params['fc2_w'].T, precision=hp) + params['fc2_b'], 0.0)
    return jnp.dot(h, params['fc3_w'].T, precision=hp) + params['fc3_b']


if __name__ == "__main__":
    input_size = 16       # (16 - 8) % 4 == 0
    classes = 10
    batch = 2

    key = jax.random.PRNGKey(0)
    k_param, k_x = jax.random.split(key)
    params = init_params(k_param, input_size, classes)
    prepared = prepare_params(params, input_size, classes)
    x = jax.random.normal(k_x, (batch, 1, input_size, input_size), jnp.float32)

    try:
        fwd = jax.jit(lambda xx: simplenet_forward(prepared, xx))
        out = fwd(x)
        jax.block_until_ready(out)
    except Exception:
        # Fallback: default (double-buffered) weight pipelining.
        fwd = jax.jit(lambda xx: simplenet_forward(
            prepared, xx, single_buffer_weights=False))
        out = fwd(x)
        jax.block_until_ready(out)
    assert out.shape == (batch, classes), out.shape

    # Correctness self-check against a pure-JAX/XLA fp32 reference.
    # Tolerance is deliberately ~1-2% relative because matmul operands are
    # bf16 (accumulation in f32).
    ref = jax.jit(lambda xx: reference_forward(params, xx))(x)
    jax.block_until_ready(ref)
    max_err = float(jnp.max(jnp.abs(out - ref)))
    scale = float(jnp.max(jnp.abs(ref)))
    assert max_err <= 5e-3 + 2e-2 * scale, (
        f"kernel/reference mismatch: max_err={max_err}, scale={scale}")

    print("KERNEL_OK")
</pallas_src>

<mosaic_0001>
module attributes {stable_mosaic.version = 11 : i64} {
  func.func @_simplenet_kernel(%arg0: i32, %arg1: memref<8x256xbf16, #tpu.memory_space<vmem>>, %arg2: memref<256x1536xbf16, #tpu.memory_space<vmem>>, %arg3: memref<1x1536xf32, #tpu.memory_space<vmem>>, %arg4: memref<384x512xbf16, #tpu.memory_space<vmem>>, %arg5: memref<1x512xf32, #tpu.memory_space<vmem>>, %arg6: memref<128x128xbf16, #tpu.memory_space<vmem>>, %arg7: memref<1x128xf32, #tpu.memory_space<vmem>>, %arg8: memref<128x128xbf16, #tpu.memory_space<vmem>>, %arg9: memref<1x128xf32, #tpu.memory_space<vmem>>, %arg10: memref<128x128xbf16, #tpu.memory_space<vmem>>, %arg11: memref<1x128xf32, #tpu.memory_space<vmem>>, %arg12: memref<8x128xf32, #tpu.memory_space<vmem>>) attributes {dimension_semantics = [#tpu.dimension_semantics<parallel>], iteration_bounds = array<i64: 1>, scalar_prefetch = 0 : i64, scratch_operands = 0 : i64, tpu.core_type = #tpu.core_type<tc>, window_params = [{transform_indices = @transform_0, window_bounds = array<i64: 8, 256>}, {pipeline_mode = #tpu.pipeline_mode<synchronous>, transform_indices = @transform_1, window_bounds = array<i64: 256, 1536>}, {pipeline_mode = #tpu.pipeline_mode<synchronous>, transform_indices = @transform_2, window_bounds = array<i64: 1, 1536>}, {pipeline_mode = #tpu.pipeline_mode<synchronous>, transform_indices = @transform_3, window_bounds = array<i64: 384, 512>}, {pipeline_mode = #tpu.pipeline_mode<synchronous>, transform_indices = @transform_4, window_bounds = array<i64: 1, 512>}, {pipeline_mode = #tpu.pipeline_mode<synchronous>, transform_indices = @transform_5, window_bounds = array<i64: 128, 128>}, {pipeline_mode = #tpu.pipeline_mode<synchronous>, transform_indices = @transform_6, window_bounds = array<i64: 1, 128>}, {pipeline_mode = #tpu.pipeline_mode<synchronous>, transform_indices = @transform_7, window_bounds = array<i64: 128, 128>}, {pipeline_mode = #tpu.pipeline_mode<synchronous>, transform_indices = @transform_8, window_bounds = array<i64: 1, 128>}, {pipeline_mode = #tpu.pipeline_mode<synchronous>, transform_indices = @transform_9, window_bounds = array<i64: 128, 128>}, {pipeline_mode = #tpu.pipeline_mode<synchronous>, transform_indices = @transform_10, window_bounds = array<i64: 1, 128>}, {transform_indices = @transform_11, window_bounds = array<i64: 8, 128>}]} {
    %c0 = arith.constant 0 : index
    %c0_0 = arith.constant 0 : index
    %0 = vector.load %arg1[%c0, %c0_0] : memref<8x256xbf16, #tpu.memory_space<vmem>>, vector<8x256xbf16>
    %c0_1 = arith.constant 0 : index
    %c0_2 = arith.constant 0 : index
    %1 = vector.load %arg2[%c0_1, %c0_2] : memref<256x1536xbf16, #tpu.memory_space<vmem>>, vector<256x1536xbf16>
    %cst = arith.constant dense<0.000000e+00> : vector<8x1536xf32>
    %2 = tpu.matmul %0, %1, %cst {dimension_numbers = #tpu.dot_dimension_numbers<[1], [0], [0], [1], [0, 0, 1, 1], [], []>} : vector<8x256xbf16>, vector<256x1536xbf16>, vector<8x1536xf32> -> vector<8x1536xf32>
    %c0_3 = arith.constant 0 : index
    %c0_4 = arith.constant 0 : index
    %3 = vector.load %arg3[%c0_3, %c0_4] : memref<1x1536xf32, #tpu.memory_space<vmem>>, vector<1x1536xf32>
    %4 = vector.broadcast %3 : vector<1x1536xf32> to vector<8x1536xf32>
    %5 = arith.addf %2, %4 : vector<8x1536xf32>
    %cst_5 = arith.constant 0.000000e+00 : f32
    %6 = vector.broadcast %cst_5 : f32 to vector<8x1536xf32>
    %7 = arith.maximumf %5, %6 : vector<8x1536xf32>
    %8 = vector.extract_strided_slice %7 {offsets = [0, 0], sizes = [8, 384], strides = [1, 1]} : vector<8x1536xf32> to vector<8x384xf32>
    %9 = vector.extract_strided_slice %7 {offsets = [0, 384], sizes = [8, 384], strides = [1, 1]} : vector<8x1536xf32> to vector<8x384xf32>
    %10 = arith.maximumf %8, %9 : vector<8x384xf32>
    %11 = vector.extract_strided_slice %7 {offsets = [0, 768], sizes = [8, 384], strides = [1, 1]} : vector<8x1536xf32> to vector<8x384xf32>
    %12 = vector.extract_strided_slice %7 {offsets = [0, 1152], sizes = [8, 384], strides = [1, 1]} : vector<8x1536xf32> to vector<8x384xf32>
    %13 = arith.maximumf %11, %12 : vector<8x384xf32>
    %14 = arith.maximumf %10, %13 : vector<8x384xf32>
    %15 = arith.truncf %14 : vector<8x384xf32> to vector<8x384xbf16>
    %c0_6 = arith.constant 0 : index
    %c0_7 = arith.constant 0 : index
    %16 = vector.load %arg4[%c0_6, %c0_7] : memref<384x512xbf16, #tpu.memory_space<vmem>>, vector<384x512xbf16>
    %cst_8 = arith.constant dense<0.000000e+00> : vector<8x512xf32>
    %17 = tpu.matmul %15, %16, %cst_8 {dimension_numbers = #tpu.dot_dimension_numbers<[1], [0], [0], [1], [0, 0, 1, 1], [], []>} : vector<8x384xbf16>, vector<384x512xbf16>, vector<8x512xf32> -> vector<8x512xf32>
    %c0_9 = arith.constant 0 : index
    %c0_10 = arith.constant 0 : index
    %18 = vector.load %arg5[%c0_9, %c0_10] : memref<1x512xf32, #tpu.memory_space<vmem>>, vector<1x512xf32>
    %19 = vector.broadcast %18 : vector<1x512xf32> to vector<8x512xf32>
    %20 = arith.addf %17, %19 : vector<8x512xf32>
    %cst_11 = arith.constant 0.000000e+00 : f32
    %21 = vector.broadcast %cst_11 : f32 to vector<8x512xf32>
    %22 = arith.maximumf %20, %21 : vector<8x512xf32>
    %23 = vector.extract_strided_slice %22 {offsets = [0, 0], sizes = [8, 128], strides = [1, 1]} : vector<8x512xf32> to vector<8x128xf32>
    %24 = vector.extract_strided_slice %22 {offsets = [0, 128], sizes = [8, 128], strides = [1, 1]} : vector<8x512xf32> to vector<8x128xf32>
    %25 = arith.maximumf %23, %24 : vector<8x128xf32>
    %26 = vector.extract_strided_slice %22 {offsets = [0, 256], sizes = [8, 128], strides = [1, 1]} : vector<8x512xf32> to vector<8x128xf32>
    %27 = vector.extract_strided_slice %22 {offsets = [0, 384], sizes = [8, 128], strides = [1, 1]} : vector<8x512xf32> to vector<8x128xf32>
    %28 = arith.maximumf %26, %27 : vector<8x128xf32>
    %29 = arith.maximumf %25, %28 : vector<8x128xf32>
    %30 = arith.truncf %29 : vector<8x128xf32> to vector<8x128xbf16>
    %c0_12 = arith.constant 0 : index
    %c0_13 = arith.constant 0 : index
    %31 = vector.load %arg6[%c0_12, %c0_13] : memref<128x128xbf16, #tpu.memory_space<vmem>>, vector<128x128xbf16>
    %cst_14 = arith.constant dense<0.000000e+00> : vector<8x128xf32>
    %32 = tpu.matmul %30, %31, %cst_14 {dimension_numbers = #tpu.dot_dimension_numbers<[1], [0], [0], [1], [0, 0, 1, 1], [], []>} : vector<8x128xbf16>, vector<128x128xbf16>, vector<8x128xf32> -> vector<8x128xf32>
    %c0_15 = arith.constant 0 : index
    %c0_16 = arith.constant 0 : index
    %33 = vector.load %arg7[%c0_15, %c0_16] : memref<1x128xf32, #tpu.memory_space<vmem>>, vector<1x128xf32>
    %34 = vector.broadcast %33 : vector<1x128xf32> to vector<8x128xf32>
    %35 = arith.addf %32, %34 : vector<8x128xf32>
    %cst_17 = arith.constant 0.000000e+00 : f32
    %36 = vector.broadcast %cst_17 : f32 to vector<8x128xf32>
    %37 = arith.maximumf %35, %36 : vector<8x128xf32>
    %38 = arith.truncf %37 : vector<8x128xf32> to vector<8x128xbf16>
    %c0_18 = arith.constant 0 : index
    %c0_19 = arith.constant 0 : index
    %39 = vector.load %arg8[%c0_18, %c0_19] : memref<128x128xbf16, #tpu.memory_space<vmem>>, vector<128x128xbf16>
    %cst_20 = arith.constant dense<0.000000e+00> : vector<8x128xf32>
    %40 = tpu.matmul %38, %39, %cst_20 {dimension_numbers = #tpu.dot_dimension_numbers<[1], [0], [0], [1], [0, 0, 1, 1], [], []>} : vector<8x128xbf16>, vector<128x128xbf16>, vector<8x128xf32> -> vector<8x128xf32>
    %c0_21 = arith.constant 0 : index
    %c0_22 = arith.constant 0 : index
    %41 = vector.load %arg9[%c0_21, %c0_22] : memref<1x128xf32, #tpu.memory_space<vmem>>, vector<1x128xf32>
    %42 = vector.broadcast %41 : vector<1x128xf32> to vector<8x128xf32>
    %43 = arith.addf %40, %42 : vector<8x128xf32>
    %cst_23 = arith.constant 0.000000e+00 : f32
    %44 = vector.broadcast %cst_23 : f32 to vector<8x128xf32>
    %45 = arith.maximumf %43, %44 : vector<8x128xf32>
    %46 = arith.truncf %45 : vector<8x128xf32> to vector<8x128xbf16>
    %c0_24 = arith.constant 0 : index
    %c0_25 = arith.constant 0 : index
    %47 = vector.load %arg10[%c0_24, %c0_25] : memref<128x128xbf16, #tpu.memory_space<vmem>>, vector<128x128xbf16>
    %cst_26 = arith.constant dense<0.000000e+00> : vector<8x128xf32>
    %48 = tpu.matmul %46, %47, %cst_26 {dimension_numbers = #tpu.dot_dimension_numbers<[1], [0], [0], [1], [0, 0, 1, 1], [], []>} : vector<8x128xbf16>, vector<128x128xbf16>, vector<8x128xf32> -> vector<8x128xf32>
    %c0_27 = arith.constant 0 : index
    %c0_28 = arith.constant 0 : index
    %49 = vector.load %arg11[%c0_27, %c0_28] : memref<1x128xf32, #tpu.memory_space<vmem>>, vector<1x128xf32>
    %50 = vector.broadcast %49 : vector<1x128xf32> to vector<8x128xf32>
    %51 = arith.addf %48, %50 : vector<8x128xf32>
    %c0_29 = arith.constant 0 : index
    %c0_30 = arith.constant 0 : index
    %52 = vector.load %arg12[%c0_29, %c0_30] : memref<8x128xf32, #tpu.memory_space<vmem>>, vector<8x128xf32>
    tpu.vector_store %arg12[%c0_29, %c0_30], %51 {strides = array<i32>} : memref<8x128xf32, #tpu.memory_space<vmem>>, vector<8x128xf32>,
    return
  }
  func.func @transform_0(%arg0: i32) -> (i32, i32) {
    %c0_i32 = arith.constant 0 : i32
    %c0_i32_0 = arith.constant 0 : i32
    return %arg0, %c0_i32 : i32, i32
  }
  func.func @transform_1(%arg0: i32) -> (i32, i32) {
    %c0_i32 = arith.constant 0 : i32
    %c0_i32_0 = arith.constant 0 : i32
    %c0_i32_1 = arith.constant 0 : i32
    return %c0_i32, %c0_i32_0 : i32, i32
  }
  func.func @transform_2(%arg0: i32) -> (i32, i32) {
    %c0_i32 = arith.constant 0 : i32
    %c0_i32_0 = arith.constant 0 : i32
    %c0_i32_1 = arith.constant 0 : i32
    return %c0_i32, %c0_i32_0 : i32, i32
  }
  func.func @transform_3(%arg0: i32) -> (i32, i32) {
    %c0_i32 = arith.constant 0 : i32
    %c0_i32_0 = arith.constant 0 : i32
    %c0_i32_1 = arith.constant 0 : i32
    return %c0_i32, %c0_i32_0 : i32, i32
  }
  func.func @transform_4(%arg0: i32) -> (i32, i32) {
    %c0_i32 = arith.constant 0 : i32
    %c0_i32_0 = arith.constant 0 : i32
    %c0_i32_1 = arith.constant 0 : i32
    return %c0_i32, %c0_i32_0 : i32, i32
  }
  func.func @transform_5(%arg0: i32) -> (i32, i32) {
    %c0_i32 = arith.constant 0 : i32
    %c0_i32_0 = arith.constant 0 : i32
    %c0_i32_1 = arith.constant 0 : i32
    return %c0_i32, %c0_i32_0 : i32, i32
  }
  func.func @transform_6(%arg0: i32) -> (i32, i32) {
    %c0_i32 = arith.constant 0 : i32
    %c0_i32_0 = arith.constant 0 : i32
    %c0_i32_1 = arith.constant 0 : i32
    return %c0_i32, %c0_i32_0 : i32, i32
  }
  func.func @transform_7(%arg0: i32) -> (i32, i32) {
    %c0_i32 = arith.constant 0 : i32
    %c0_i32_0 = arith.constant 0 : i32
    %c0_i32_1 = arith.constant 0 : i32
    return %c0_i32, %c0_i32_0 : i32, i32
  }
  func.func @transform_8(%arg0: i32) -> (i32, i32) {
    %c0_i32 = arith.constant 0 : i32
    %c0_i32_0 = arith.constant 0 : i32
    %c0_i32_1 = arith.constant 0 : i32
    return %c0_i32, %c0_i32_0 : i32, i32
  }
  func.func @transform_9(%arg0: i32) -> (i32, i32) {
    %c0_i32 = arith.constant 0 : i32
    %c0_i32_0 = arith.constant 0 : i32
    %c0_i32_1 = arith.constant 0 : i32
    return %c0_i32, %c0_i32_0 : i32, i32
  }
  func.func @transform_10(%arg0: i32) -> (i32, i32) {
    %c0_i32 = arith.constant 0 : i32
    %c0_i32_0 = arith.constant 0 : i32
    %c0_i32_1 = arith.constant 0 : i32
    return %c0_i32, %c0_i32_0 : i32, i32
  }
  func.func @transform_11(%arg0: i32) -> (i32, i32) {
    %c0_i32 = arith.constant 0 : i32
    %c0_i32_0 = arith.constant 0 : i32
    return %arg0, %c0_i32 : i32, i32
  }
}

module attributes {stable_mosaic.version = 11 : i64} {
  func.func @_simplenet_kernel(%arg0: i32, %arg1: memref<8x256xbf16, #tpu.memory_space<vmem>>, %arg2: memref<256x1536xbf16, #tpu.memory_space<vmem>>, %arg3: memref<1x1536xf32, #tpu.memory_space<vmem>>, %arg4: memref<384x512xbf16, #tpu.memory_space<vmem>>, %arg5: memref<1x512xf32, #tpu.memory_space<vmem>>, %arg6: memref<128x128xbf16, #tpu.memory_space<vmem>>, %arg7: memref<1x128xf32, #tpu.memory_space<vmem>>, %arg8: memref<128x128xbf16, #tpu.memory_space<vmem>>, %arg9: memref<1x128xf32, #tpu.memory_space<vmem>>, %arg10: memref<128x128xbf16, #tpu.memory_space<vmem>>, %arg11: memref<1x128xf32, #tpu.memory_space<vmem>>, %arg12: memref<8x128xf32, #tpu.memory_space<vmem>>) attributes {dimension_semantics = [#tpu.dimension_semantics<parallel>], iteration_bounds = array<i64: 1>, scalar_prefetch = 0 : i64, scratch_operands = 0 : i64, tpu.core_type = #tpu.core_type<tc>, window_params = [{transform_indices = @transform_0, window_bounds = array<i64: 8, 256>}, {pipeline_mode = #tpu.pipeline_mode<synchronous>, transform_indices = @transform_1, window_bounds = array<i64: 256, 1536>}, {pipeline_mode = #tpu.pipeline_mode<synchronous>, transform_indices = @transform_2, window_bounds = array<i64: 1, 1536>}, {pipeline_mode = #tpu.pipeline_mode<synchronous>, transform_indices = @transform_3, window_bounds = array<i64: 384, 512>}, {pipeline_mode = #tpu.pipeline_mode<synchronous>, transform_indices = @transform_4, window_bounds = array<i64: 1, 512>}, {pipeline_mode = #tpu.pipeline_mode<synchronous>, transform_indices = @transform_5, window_bounds = array<i64: 128, 128>}, {pipeline_mode = #tpu.pipeline_mode<synchronous>, transform_indices = @transform_6, window_bounds = array<i64: 1, 128>}, {pipeline_mode = #tpu.pipeline_mode<synchronous>, transform_indices = @transform_7, window_bounds = array<i64: 128, 128>}, {pipeline_mode = #tpu.pipeline_mode<synchronous>, transform_indices = @transform_8, window_bounds = array<i64: 1, 128>}, {pipeline_mode = #tpu.pipeline_mode<synchronous>, transform_indices = @transform_9, window_bounds = array<i64: 128, 128>}, {pipeline_mode = #tpu.pipeline_mode<synchronous>, transform_indices = @transform_10, window_bounds = array<i64: 1, 128>}, {transform_indices = @transform_11, window_bounds = array<i64: 8, 128>}]} {
    %c0 = arith.constant 0 : index
    %c0_0 = arith.constant 0 : index
    %0 = vector.load %arg1[%c0, %c0_0] : memref<8x256xbf16, #tpu.memory_space<vmem>>, vector<8x256xbf16>
    %c0_1 = arith.constant 0 : index
    %c0_2 = arith.constant 0 : index
    %1 = vector.load %arg2[%c0_1, %c0_2] : memref<256x1536xbf16, #tpu.memory_space<vmem>>, vector<256x1536xbf16>
    %cst = arith.constant dense<0.000000e+00> : vector<8x1536xf32>
    %2 = tpu.matmul %0, %1, %cst {dimension_numbers = #tpu.dot_dimension_numbers<[1], [0], [0], [1], [0, 0, 1, 1], [], []>} : vector<8x256xbf16>, vector<256x1536xbf16>, vector<8x1536xf32> -> vector<8x1536xf32>
    %c0_3 = arith.constant 0 : index
    %c0_4 = arith.constant 0 : index
    %3 = vector.load %arg3[%c0_3, %c0_4] : memref<1x1536xf32, #tpu.memory_space<vmem>>, vector<1x1536xf32>
    %4 = vector.broadcast %3 : vector<1x1536xf32> to vector<8x1536xf32>
    %5 = arith.addf %2, %4 : vector<8x1536xf32>
    %cst_5 = arith.constant 0.000000e+00 : f32
    %6 = vector.broadcast %cst_5 : f32 to vector<8x1536xf32>
    %7 = arith.maximumf %5, %6 : vector<8x1536xf32>
    %8 = vector.extract_strided_slice %7 {offsets = [0, 0], sizes = [8, 384], strides = [1, 1]} : vector<8x1536xf32> to vector<8x384xf32>
    %9 = vector.extract_strided_slice %7 {offsets = [0, 384], sizes = [8, 384], strides = [1, 1]} : vector<8x1536xf32> to vector<8x384xf32>
    %10 = arith.maximumf %8, %9 : vector<8x384xf32>
    %11 = vector.extract_strided_slice %7 {offsets = [0, 768], sizes = [8, 384], strides = [1, 1]} : vector<8x1536xf32> to vector<8x384xf32>
    %12 = vector.extract_strided_slice %7 {offsets = [0, 1152], sizes = [8, 384], strides = [1, 1]} : vector<8x1536xf32> to vector<8x384xf32>
    %13 = arith.maximumf %11, %12 : vector<8x384xf32>
    %14 = arith.maximumf %10, %13 : vector<8x384xf32>
    %15 = arith.truncf %14 : vector<8x384xf32> to vector<8x384xbf16>
    %c0_6 = arith.constant 0 : index
    %c0_7 = arith.constant 0 : index
    %16 = vector.load %arg4[%c0_6, %c0_7] : memref<384x512xbf16, #tpu.memory_space<vmem>>, vector<384x512xbf16>
    %cst_8 = arith.constant dense<0.000000e+00> : vector<8x512xf32>
    %17 = tpu.matmul %15, %16, %cst_8 {dimension_numbers = #tpu.dot_dimension_numbers<[1], [0], [0], [1], [0, 0, 1, 1], [], []>} : vector<8x384xbf16>, vector<384x512xbf16>, vector<8x512xf32> -> vector<8x512xf32>
    %c0_9 = arith.constant 0 : index
    %c0_10 = arith.constant 0 : index
    %18 = vector.load %arg5[%c0_9, %c0_10] : memref<1x512xf32, #tpu.memory_space<vmem>>, vector<1x512xf32>
    %19 = vector.broadcast %18 : vector<1x512xf32> to vector<8x512xf32>
    %20 = arith.addf %17, %19 : vector<8x512xf32>
    %cst_11 = arith.constant 0.000000e+00 : f32
    %21 = vector.broadcast %cst_11 : f32 to vector<8x512xf32>
    %22 = arith.maximumf %20, %21 : vector<8x512xf32>
    %23 = vector.extract_strided_slice %22 {offsets = [0, 0], sizes = [8, 128], strides = [1, 1]} : vector<8x512xf32> to vector<8x128xf32>
    %24 = vector.extract_strided_slice %22 {offsets = [0, 128], sizes = [8, 128], strides = [1, 1]} : vector<8x512xf32> to vector<8x128xf32>
    %25 = arith.maximumf %23, %24 : vector<8x128xf32>
    %26 = vector.extract_strided_slice %22 {offsets = [0, 256], sizes = [8, 128], strides = [1, 1]} : vector<8x512xf32> to vector<8x128xf32>
    %27 = vector.extract_strided_slice %22 {offsets = [0, 384], sizes = [8, 128], strides = [1, 1]} : vector<8x512xf32> to vector<8x128xf32>
    %28 = arith.maximumf %26, %27 : vector<8x128xf32>
    %29 = arith.maximumf %25, %28 : vector<8x128xf32>
    %30 = arith.truncf %29 : vector<8x128xf32> to vector<8x128xbf16>
    %c0_12 = arith.constant 0 : index
    %c0_13 = arith.constant 0 : index
    %31 = vector.load %arg6[%c0_12, %c0_13] : memref<128x128xbf16, #tpu.memory_space<vmem>>, vector<128x128xbf16>
    %cst_14 = arith.constant dense<0.000000e+00> : vector<8x128xf32>
    %32 = tpu.matmul %30, %31, %cst_14 {dimension_numbers = #tpu.dot_dimension_numbers<[1], [0], [0], [1], [0, 0, 1, 1], [], []>} : vector<8x128xbf16>, vector<128x128xbf16>, vector<8x128xf32> -> vector<8x128xf32>
    %c0_15 = arith.constant 0 : index
    %c0_16 = arith.constant 0 : index
    %33 = vector.load %arg7[%c0_15, %c0_16] : memref<1x128xf32, #tpu.memory_space<vmem>>, vector<1x128xf32>
    %34 = vector.broadcast %33 : vector<1x128xf32> to vector<8x128xf32>
    %35 = arith.addf %32, %34 : vector<8x128xf32>
    %cst_17 = arith.constant 0.000000e+00 : f32
    %36 = vector.broadcast %cst_17 : f32 to vector<8x128xf32>
    %37 = arith.maximumf %35, %36 : vector<8x128xf32>
    %38 = arith.truncf %37 : vector<8x128xf32> to vector<8x128xbf16>
    %c0_18 = arith.constant 0 : index
    %c0_19 = arith.constant 0 : index
    %39 = vector.load %arg8[%c0_18, %c0_19] : memref<128x128xbf16, #tpu.memory_space<vmem>>, vector<128x128xbf16>
    %cst_20 = arith.constant dense<0.000000e+00> : vector<8x128xf32>
    %40 = tpu.matmul %38, %39, %cst_20 {dimension_numbers = #tpu.dot_dimension_numbers<[1], [0], [0], [1], [0, 0, 1, 1], [], []>} : vector<8x128xbf16>, vector<128x128xbf16>, vector<8x128xf32> -> vector<8x128xf32>
    %c0_21 = arith.constant 0 : index
    %c0_22 = arith.constant 0 : index
    %41 = vector.load %arg9[%c0_21, %c0_22] : memref<1x128xf32, #tpu.memory_space<vmem>>, vector<1x128xf32>
    %42 = vector.broadcast %41 : vector<1x128xf32> to vector<8x128xf32>
    %43 = arith.addf %40, %42 : vector<8x128xf32>
    %cst_23 = arith.constant 0.000000e+00 : f32
    %44 = vector.broadcast %cst_23 : f32 to vector<8x128xf32>
    %45 = arith.maximumf %43, %44 : vector<8x128xf32>
    %46 = arith.truncf %45 : vector<8x128xf32> to vector<8x128xbf16>
    %c0_24 = arith.constant 0 : index
    %c0_25 = arith.constant 0 : index
    %47 = vector.load %arg10[%c0_24, %c0_25] : memref<128x128xbf16, #tpu.memory_space<vmem>>, vector<128x128xbf16>
    %cst_26 = arith.constant dense<0.000000e+00> : vector<8x128xf32>
    %48 = tpu.matmul %46, %47, %cst_26 {dimension_numbers = #tpu.dot_dimension_numbers<[1], [0], [0], [1], [0, 0, 1, 1], [], []>} : vector<8x128xbf16>, vector<128x128xbf16>, vector<8x128xf32> -> vector<8x128xf32>
    %c0_27 = arith.constant 0 : index
    %c0_28 = arith.constant 0 : index
    %49 = vector.load %arg11[%c0_27, %c0_28] : memref<1x128xf32, #tpu.memory_space<vmem>>, vector<1x128xf32>
    %50 = vector.broadcast %49 : vector<1x128xf32> to vector<8x128xf32>
    %51 = arith.addf %48, %50 : vector<8x128xf32>
    %c0_29 = arith.constant 0 : index
    %c0_30 = arith.constant 0 : index
    %52 = vector.load %arg12[%c0_29, %c0_30] : memref<8x128xf32, #tpu.memory_space<vmem>>, vector<8x128xf32>
    tpu.vector_store %arg12[%c0_29, %c0_30], %51 {strides = array<i32>} : memref<8x128xf32, #tpu.memory_space<vmem>>, vector<8x128xf32>,
    return
  }
  func.func @transform_0(%arg0: i32) -> (i32, i32) {
    %c0_i32 = arith.constant 0 : i32
    %c0_i32_0 = arith.constant 0 : i32
    return %arg0, %c0_i32 : i32, i32
  }
  func.func @transform_1(%arg0: i32) -> (i32, i32) {
    %c0_i32 = arith.constant 0 : i32
    %c0_i32_0 = arith.constant 0 : i32
    %c0_i32_1 = arith.constant 0 : i32
    return %c0_i32, %c0_i32_0 : i32, i32
  }
  func.func @transform_2(%arg0: i32) -> (i32, i32) {
    %c0_i32 = arith.constant 0 : i32
    %c0_i32_0 = arith.constant 0 : i32
    %c0_i32_1 = arith.constant 0 : i32
    return %c0_i32, %c0_i32_0 : i32, i32
  }
  func.func @transform_3(%arg0: i32) -> (i32, i32) {
    %c0_i32 = arith.constant 0 : i32
    %c0_i32_0 = arith.constant 0 : i32
    %c0_i32_1 = arith.constant 0 : i32
    return %c0_i32, %c0_i32_0 : i32, i32
  }
  func.func @transform_4(%arg0: i32) -> (i32, i32) {
    %c0_i32 = arith.constant 0 : i32
    %c0_i32_0 = arith.constant 0 : i32
    %c0_i32_1 = arith.constant 0 : i32
    return %c0_i32, %c0_i32_0 : i32, i32
  }
  func.func @transform_5(%arg0: i32) -> (i32, i32) {
    %c0_i32 = arith.constant 0 : i32
    %c0_i32_0 = arith.constant 0 : i32
    %c0_i32_1 = arith.constant 0 : i32
    return %c0_i32, %c0_i32_0 : i32, i32
  }
  func.func @transform_6(%arg0: i32) -> (i32, i32) {
    %c0_i32 = arith.constant 0 : i32
    %c0_i32_0 = arith.constant 0 : i32
    %c0_i32_1 = arith.constant 0 : i32
    return %c0_i32, %c0_i32_0 : i32, i32
  }
  func.func @transform_7(%arg0: i32) -> (i32, i32) {
    %c0_i32 = arith.constant 0 : i32
    %c0_i32_0 = arith.constant 0 : i32
    %c0_i32_1 = arith.constant 0 : i32
    return %c0_i32, %c0_i32_0 : i32, i32
  }
  func.func @transform_8(%arg0: i32) -> (i32, i32) {
    %c0_i32 = arith.constant 0 : i32
    %c0_i32_0 = arith.constant 0 : i32
    %c0_i32_1 = arith.constant 0 : i32
    return %c0_i32, %c0_i32_0 : i32, i32
  }
  func.func @transform_9(%arg0: i32) -> (i32, i32) {
    %c0_i32 = arith.constant 0 : i32
    %c0_i32_0 = arith.constant 0 : i32
    %c0_i32_1 = arith.constant 0 : i32
    return %c0_i32, %c0_i32_0 : i32, i32
  }
  func.func @transform_10(%arg0: i32) -> (i32, i32) {
    %c0_i32 = arith.constant 0 : i32
    %c0_i32_0 = arith.constant 0 : i32
    %c0_i32_1 = arith.constant 0 : i32
    return %c0_i32, %c0_i32_0 : i32, i32
  }
  func.func @transform_11(%arg0: i32) -> (i32, i32) {
    %c0_i32 = arith.constant 0 : i32
    %c0_i32_0 = arith.constant 0 : i32
    return %arg0, %c0_i32 : i32, i32
  }
}

</mosaic_0001>

<bundles_post_ra>
// kernel: _lambda_.1
= control target key start
LH: loop header
LB: loop body
LE: loop exit
PB: predicated region body
PF: predicated region fallthrough
CT: control target
= control target key end

     0   :  { %vm3524_vm0 = vmmov 0   ;;  %s4638_s1 = inlined_call_operand.vmem [shape: bf16[256,1536], index: 1, kind: input, shape index: {}]   ;;  %s4639_s0 = inlined_call_operand.vmem [shape: bf16[8,256], index: 0, kind: input, shape index: {}]   ;;  %s4640_s3 = inlined_call_operand.vmem [shape: bf16[384,512], index: 3, kind: input, shape index: {}]   ;;  %s4641_s2 = inlined_call_operand.vmem [shape: f32[1,1536], index: 2, kind: input, shape index: {}]   ;;  %s4642_s5 = inlined_call_operand.vmem [shape: bf16[128,128], index: 5, kind: input, shape index: {}]   ;;  %s4643_s7 = inlined_call_operand.vmem [shape: bf16[128,128], index: 7, kind: input, shape index: {}]   ;;  %s4644_s4 = inlined_call_operand.vmem [shape: f32[1,512], index: 4, kind: input, shape index: {}]   ;;  %s4645_s9 = inlined_call_operand.vmem [shape: bf16[128,128], index: 9, kind: input, shape index: {}]   ;;  %s4646_s6 = inlined_call_operand.vmem [shape: f32[1,128], index: 6, kind: input, shape index: {}]   ;;  %s4647_s8 = inlined_call_operand.vmem [shape: f32[1,128], index: 8, kind: input, shape index: {}]   ;;  %s4648_s10 = inlined_call_operand.vmem [shape: f32[1,128], index: 10, kind: input, shape index: {}]   ;;  %s4649_s11 = inlined_call_operand.vmem [shape: f32[8,128], index: 11, kind: output, shape index: {}]  }
   0x1   :  { %v3064_v0 = vld [vmem:[%s4638_s1 + $0x4] ss:$48 sps:$4 sm:$0xff]   ;;  %v3066_v1 = vld [vmem:[%s4638_s1 + $0xc] ss:$48 sps:$4 sm:$0xff]   ;;  %v3068_v2 = vld [vmem:[%s4638_s1] ss:$48 sps:$4 sm:$0xff]  }
   0x2   :  { %1263 = vmatprep.subr.bf16.mxu0 %v3064_v0  ;;  %v3069_v3 = vld [vmem:[%s4638_s1 + $0x8] ss:$48 sps:$4 sm:$0xff]   ;;  %1304 = vmatprep.subr.bf16.mxu1 %v3066_v1  ;;  %v3070_v4 = vld [vmem:[%s4638_s1 + $0x64] ss:$48 sps:$4 sm:$0xff]   ;;  %v3072_v5 = vld [vmem:[%s4638_s1 + $0x6c] ss:$48 sps:$4 sm:$0xff]  }
   0x3   :  { %1264 = vmatpush1.bf16.msra.mxu0 %v3068_v2  ;;  %1305 = vmatpush1.bf16.msra.mxu1 %v3069_v3  ;;  %v3074_v6 = vld [vmem:[%s4638_s1 + $0x60] ss:$48 sps:$4 sm:$0xff]   ;;  %v3075_v7 = vld [vmem:[%s4638_s1 + $0x68] ss:$48 sps:$4 sm:$0xff]   ;;  %v3076_v8 = vld [vmem:[%s4638_s1 + $0xc4] ss:$48 sps:$4 sm:$0xff]  }
   0x4   :  { %1265 = vmatprep.subr.bf16.mxu0 %v3070_v4  ;;  %1306 = vmatprep.subr.bf16.mxu1 %v3072_v5  ;;  %v3078_v9 = vld [vmem:[%s4638_s1 + $0xcc] ss:$48 sps:$4 sm:$0xff]   ;;  %v3080_v10 = vld [vmem:[%s4638_s1 + $0xc0] ss:$48 sps:$4 sm:$0xff]   ;;  %v3081_v11 = vld [vmem:[%s4638_s1 + $0xc8] ss:$48 sps:$4 sm:$0xff]  }
   0x5   :  { %v3082_v12 = vld [vmem:[%s4638_s1 + $0x124] ss:$48 sps:$4 sm:$0xff]   ;;  %v3084_v13 = vld [vmem:[%s4638_s1 + $0x12c] ss:$48 sps:$4 sm:$0xff]   ;;  %v3086_v14 = vld [vmem:[%s4638_s1 + $0x120] ss:$48 sps:$4 sm:$0xff]  }
   0x6   :  { %v3087_v15 = vld [vmem:[%s4638_s1 + $0x128] ss:$48 sps:$4 sm:$0xff]   ;;  %v3088_v16 = vld [vmem:[%s4638_s1 + $0x184] ss:$48 sps:$4 sm:$0xff]   ;;  %v3090_v17 = vld [vmem:[%s4638_s1 + $0x18c] ss:$48 sps:$4 sm:$0xff]  }
   0x7   :  { %1266 = vmatpush1.bf16.msra.mxu0 %v3074_v6  ;;  %1307 = vmatpush1.bf16.msra.mxu1 %v3075_v7  ;;  %v3092_v18 = vld [vmem:[%s4638_s1 + $0x180] ss:$48 sps:$4 sm:$0xff]   ;;  %v3093_v19 = vld [vmem:[%s4638_s1 + $0x188] ss:$48 sps:$4 sm:$0xff]   ;;  %v3094_v20 = vld [vmem:[%s4638_s1 + $0x1e4] ss:$48 sps:$4 sm:$0xff]  }
   0x8   :  { %1267 = vmatprep.subr.bf16.mxu0 %v3076_v8  ;;  %1308 = vmatprep.subr.bf16.mxu1 %v3078_v9  ;;  %v3096_v21 = vld [vmem:[%s4638_s1 + $0x1ec] ss:$48 sps:$4 sm:$0xff]   ;;  %v3098_v22 = vld [vmem:[%s4638_s1 + $0x1e0] ss:$48 sps:$4 sm:$0xff]   ;;  %v3099_v23 = vld [vmem:[%s4638_s1 + $0x1e8] ss:$48 sps:$4 sm:$0xff]  }
   0x9   :  { %v3100_v24 = vld [vmem:[%s4638_s1 + $0x244] ss:$48 sps:$4 sm:$0xff]   ;;  %v3102_v25 = vld [vmem:[%s4638_s1 + $0x24c] ss:$48 sps:$4 sm:$0xff]   ;;  %v3104_v26 = vld [vmem:[%s4638_s1 + $0x240] ss:$48 sps:$4 sm:$0xff]  }
   0xa   :  { %v3105_v27 = vld [vmem:[%s4638_s1 + $0x248] ss:$48 sps:$4 sm:$0xff]   ;;  %v3106_v28 = vld [vmem:[%s4638_s1 + $0x2a4] ss:$48 sps:$4 sm:$0xff]   ;;  %v3108_v29 = vld [vmem:[%s4638_s1 + $0x2ac] ss:$48 sps:$4 sm:$0xff]  }
   0xb   :  { %1268 = vmatpush1.bf16.msra.mxu0 %v3080_v10  ;;  %1309 = vmatpush1.bf16.msra.mxu1 %v3081_v11  ;;  %v3110_v30 = vld [vmem:[%s4638_s1 + $0x2a0] ss:$48 sps:$4 sm:$0xff]   ;;  %v3111_v31 = vld [vmem:[%s4638_s1 + $0x2a8] ss:$48 sps:$4 sm:$0xff]   ;;  %v3112_v32 = vld [vmem:[%s4638_s1 + $0x304] ss:$48 sps:$4 sm:$0xff]  }
   0xc   :  { %1269 = vmatprep.subr.bf16.mxu0 %v3082_v12  ;;  %1310 = vmatprep.subr.bf16.mxu1 %v3084_v13  ;;  %v3114_v33 = vld [vmem:[%s4638_s1 + $0x30c] ss:$48 sps:$4 sm:$0xff]   ;;  %v3116_v34 = vld [vmem:[%s4638_s1 + $0x300] ss:$48 sps:$4 sm:$0xff]   ;;  %v3117_v35 = vld [vmem:[%s4638_s1 + $0x308] ss:$48 sps:$4 sm:$0xff]  }
   0xd   :  { %v3118_v36 = vld [vmem:[%s4638_s1 + $0x364] ss:$48 sps:$4 sm:$0xff]   ;;  %v3120_v37 = vld [vmem:[%s4638_s1 + $0x36c] ss:$48 sps:$4 sm:$0xff]   ;;  %v3122_v38 = vld [vmem:[%s4638_s1 + $0x360] ss:$48 sps:$4 sm:$0xff]  }
   0xe   :  { %v3123_v39 = vld [vmem:[%s4638_s1 + $0x368] ss:$48 sps:$4 sm:$0xff]   ;;  %v3124_v40 = vld [vmem:[%s4638_s1 + $0x3c4] ss:$48 sps:$4 sm:$0xff]   ;;  %v3126_v41 = vld [vmem:[%s4638_s1 + $0x3cc] ss:$48 sps:$4 sm:$0xff]  }
   0xf   :  { %1270 = vmatpush1.bf16.msra.mxu0 %v3086_v14  ;;  %1311 = vmatpush1.bf16.msra.mxu1 %v3087_v15  ;;  %v3128_v42 = vld [vmem:[%s4638_s1 + $0x3c0] ss:$48 sps:$4 sm:$0xff]   ;;  %v3129_v43 = vld [vmem:[%s4638_s1 + $0x3c8] ss:$48 sps:$4 sm:$0xff]   ;;  %v3130_v44 = vld [vmem:[%s4638_s1 + $0x424] ss:$48 sps:$4 sm:$0xff]  }
  0x10   :  { %1271 = vmatprep.subr.bf16.mxu0 %v3088_v16  ;;  %1312 = vmatprep.subr.bf16.mxu1 %v3090_v17  ;;  %v3132_v45 = vld [vmem:[%s4638_s1 + $0x42c] ss:$48 sps:$4 sm:$0xff]   ;;  %v39_v46 = vld [vmem:[%s4639_s0] sm:$0xff]  ;;  %v3135_v49 = vld [vmem:[%s4638_s1 + $0x428] ss:$48 sps:$4 sm:$0xff]  }
  0x11   :  { %v3134_v47 = vld [vmem:[%s4638_s1 + $0x420] ss:$48 sps:$4 sm:$0xff]   ;;  %v3729_v48 = vcombine.high %v39_v46, %v39_v46  ;;  %v3136_v50 = vld [vmem:[%s4638_s1 + $0x484] ss:$48 sps:$4 sm:$0xff]   ;;  %v3138_v51 = vld [vmem:[%s4638_s1 + $0x48c] ss:$48 sps:$4 sm:$0xff]   ;;  %v3790_v4 = vcombine.low %v39_v46, %v39_v46 }
  0x12   :  { %v3140_v52 = vld [vmem:[%s4638_s1 + $0x480] ss:$48 sps:$4 sm:$0xff]   ;;  %v3141_v53 = vld [vmem:[%s4638_s1 + $0x488] ss:$48 sps:$4 sm:$0xff]   ;;  %v3142_v54 = vld [vmem:[%s4638_s1 + $0x4e4] ss:$48 sps:$4 sm:$0xff]  }
  0x13   :  { %1272 = vmatpush1.bf16.msra.mxu0 %v3092_v18  ;;  %1313 = vmatpush1.bf16.msra.mxu1 %v3093_v19  ;;  %v3144_v55 = vld [vmem:[%s4638_s1 + $0x4ec] ss:$48 sps:$4 sm:$0xff]   ;;  %v3146_v56 = vld [vmem:[%s4638_s1 + $0x4e0] ss:$48 sps:$4 sm:$0xff]   ;;  %v3147_v57 = vld [vmem:[%s4638_s1 + $0x4e8] ss:$48 sps:$4 sm:$0xff]  }
  0x14   :  { %1273 = vmatprep.subr.bf16.mxu0 %v3094_v20  ;;  %1314 = vmatprep.subr.bf16.mxu1 %v3096_v21  ;;  %v3148_v58 = vld [vmem:[%s4638_s1 + $0x544] ss:$48 sps:$4 sm:$0xff]   ;;  %v3150_v59 = vld [vmem:[%s4638_s1 + $0x54c] ss:$48 sps:$4 sm:$0xff]   ;;  %v3152_v60 = vld [vmem:[%s4638_s1 + $0x540] ss:$48 sps:$4 sm:$0xff]  }
  0x15   :  { %1295 = vmatprep.mubr.bf16.mxu0 %v3729_v48  ;;  %1336 = vmatprep.mubr.bf16.mxu1 %v3729_v48  ;;  %v3153_v61 = vld [vmem:[%s4638_s1 + $0x548] ss:$48 sps:$4 sm:$0xff]   ;;  %v3154_v62 = vld [vmem:[%s4638_s1 + $0x5a4] ss:$48 sps:$4 sm:$0xff]   ;;  %v3156_v63 = vld [vmem:[%s4638_s1 + $0x5ac] ss:$48 sps:$4 sm:$0xff]  }
  0x16   :  { %v3158_v0 = vld [vmem:[%s4638_s1 + $0x5a0] ss:$48 sps:$4 sm:$0xff]   ;;  %v3159_v1 = vld [vmem:[%s4638_s1 + $0x5a8] ss:$48 sps:$4 sm:$0xff]   ;;  %v3164_v2 = vld [vmem:[%s4638_s1 + $0x14] ss:$48 sps:$4 sm:$0xff]  }
  0x17   :  { %1274 = vmatpush1.bf16.msra.mxu0 %v3098_v22  ;;  %1315 = vmatpush1.bf16.msra.mxu1 %v3099_v23  ;;  %v3167_v3 = vld [vmem:[%s4638_s1 + $0x1c] ss:$48 sps:$4 sm:$0xff]   ;;  %v3162_v5 = vld [vmem:[%s4638_s1 + $0x10] ss:$48 sps:$4 sm:$0xff]   ;;  %v3165_v6 = vld [vmem:[%s4638_s1 + $0x18] ss:$48 sps:$4 sm:$0xff]  }
  0x18   :  { %1275 = vmatprep.subr.bf16.mxu0 %v3100_v24  ;;  %1316 = vmatprep.subr.bf16.mxu1 %v3102_v25  ;;  %v3170_v7 = vld [vmem:[%s4638_s1 + $0x74] ss:$48 sps:$4 sm:$0xff]   ;;  %v3173_v8 = vld [vmem:[%s4638_s1 + $0x7c] ss:$48 sps:$4 sm:$0xff]   ;;  %v3168_v9 = vld [vmem:[%s4638_s1 + $0x70] ss:$48 sps:$4 sm:$0xff]  }
  0x19   :  { %v3171_v10 = vld [vmem:[%s4638_s1 + $0x78] ss:$48 sps:$4 sm:$0xff]   ;;  %v3176_v11 = vld [vmem:[%s4638_s1 + $0xd4] ss:$48 sps:$4 sm:$0xff]   ;;  %v3179_v12 = vld [vmem:[%s4638_s1 + $0xdc] ss:$48 sps:$4 sm:$0xff]  }
  0x1a   :  { %v3174_v13 = vld [vmem:[%s4638_s1 + $0xd0] ss:$48 sps:$4 sm:$0xff]   ;;  %v3177_v14 = vld [vmem:[%s4638_s1 + $0xd8] ss:$48 sps:$4 sm:$0xff]   ;;  %v3182_v15 = vld [vmem:[%s4638_s1 + $0x134] ss:$48 sps:$4 sm:$0xff]  }
  0x1b   :  { %1276 = vmatpush1.bf16.msra.mxu0 %v3104_v26  ;;  %1317 = vmatpush1.bf16.msra.mxu1 %v3105_v27  ;;  %v3185_v16 = vld [vmem:[%s4638_s1 + $0x13c] ss:$48 sps:$4 sm:$0xff]   ;;  %v3180_v17 = vld [vmem:[%s4638_s1 + $0x130] ss:$48 sps:$4 sm:$0xff]   ;;  %v3183_v18 = vld [vmem:[%s4638_s1 + $0x138] ss:$48 sps:$4 sm:$0xff]  }
  0x1c   :  { %1277 = vmatprep.subr.bf16.mxu0 %v3106_v28  ;;  %1318 = vmatprep.subr.bf16.mxu1 %v3108_v29  ;;  %v3188_v19 = vld [vmem:[%s4638_s1 + $0x194] ss:$48 sps:$4 sm:$0xff]   ;;  %v3191_v20 = vld [vmem:[%s4638_s1 + $0x19c] ss:$48 sps:$4 sm:$0xff]   ;;  %v3186_v21 = vld [vmem:[%s4638_s1 + $0x190] ss:$48 sps:$4 sm:$0xff]  }
  0x1d   :  { %v3189_v22 = vld [vmem:[%s4638_s1 + $0x198] ss:$48 sps:$4 sm:$0xff]   ;;  %v3194_v23 = vld [vmem:[%s4638_s1 + $0x1f4] ss:$48 sps:$4 sm:$0xff]   ;;  %v3197_v24 = vld [vmem:[%s4638_s1 + $0x1fc] ss:$48 sps:$4 sm:$0xff]  }
  0x1e   :  { %v3192_v25 = vld [vmem:[%s4638_s1 + $0x1f0] ss:$48 sps:$4 sm:$0xff]   ;;  %v3195_v26 = vld [vmem:[%s4638_s1 + $0x1f8] ss:$48 sps:$4 sm:$0xff]   ;;  %v3200_v27 = vld [vmem:[%s4638_s1 + $0x254] ss:$48 sps:$4 sm:$0xff]  }
  0x1f   :  { %1278 = vmatpush1.bf16.msra.mxu0 %v3110_v30  ;;  %1319 = vmatpush1.bf16.msra.mxu1 %v3111_v31  ;;  %v3203_v28 = vld [vmem:[%s4638_s1 + $0x25c] ss:$48 sps:$4 sm:$0xff]   ;;  %v3198_v29 = vld [vmem:[%s4638_s1 + $0x250] ss:$48 sps:$4 sm:$0xff]   ;;  %v3201_v30 = vld [vmem:[%s4638_s1 + $0x258] ss:$48 sps:$4 sm:$0xff]  }
  0x20   :  { %1279 = vmatprep.subr.bf16.mxu0 %v3112_v32  ;;  %1320 = vmatprep.subr.bf16.mxu1 %v3114_v33  ;;  %v3206_v31 = vld [vmem:[%s4638_s1 + $0x2b4] ss:$48 sps:$4 sm:$0xff]   ;;  %v3209_v32 = vld [vmem:[%s4638_s1 + $0x2bc] ss:$48 sps:$4 sm:$0xff]   ;;  %v3204_v33 = vld [vmem:[%s4638_s1 + $0x2b0] ss:$48 sps:$4 sm:$0xff]  }
  0x21   :  { %v3225_v46 = vld [vmem:[%s4638_s1 + $0x3d8] ss:$48 sps:$4 sm:$0xff]  }
  0x23   :  { %1280 = vmatpush1.bf16.msra.mxu0 %v3116_v34  ;;  %1321 = vmatpush1.bf16.msra.mxu1 %v3117_v35  ;;  %v3207_v34 = vld [vmem:[%s4638_s1 + $0x2b8] ss:$48 sps:$4 sm:$0xff]   ;;  %v3212_v35 = vld [vmem:[%s4638_s1 + $0x314] ss:$48 sps:$4 sm:$0xff]  }
  0x24   :  { %1281 = vmatprep.subr.bf16.mxu0 %v3118_v36  ;;  %1322 = vmatprep.subr.bf16.mxu1 %v3120_v37  ;;  %v3215_v36 = vld [vmem:[%s4638_s1 + $0x31c] ss:$48 sps:$4 sm:$0xff]   ;;  %v3210_v37 = vld [vmem:[%s4638_s1 + $0x310] ss:$48 sps:$4 sm:$0xff]  }
  0x27   :  { %1282 = vmatpush1.bf16.msra.mxu0 %v3122_v38  ;;  %1323 = vmatpush1.bf16.msra.mxu1 %v3123_v39  ;;  %v3213_v38 = vld [vmem:[%s4638_s1 + $0x318] ss:$48 sps:$4 sm:$0xff]   ;;  %v3218_v39 = vld [vmem:[%s4638_s1 + $0x374] ss:$48 sps:$4 sm:$0xff]  }
  0x28   :  { %1283 = vmatprep.subr.bf16.mxu0 %v3124_v40  ;;  %1324 = vmatprep.subr.bf16.mxu1 %v3126_v41  ;;  %v3221_v40 = vld [vmem:[%s4638_s1 + $0x37c] ss:$48 sps:$4 sm:$0xff]   ;;  %v3216_v41 = vld [vmem:[%s4638_s1 + $0x370] ss:$48 sps:$4 sm:$0xff]  }
  0x2b   :  { %1284 = vmatpush1.bf16.msra.mxu0 %v3128_v42  ;;  %1325 = vmatpush1.bf16.msra.mxu1 %v3129_v43  ;;  %v3219_v42 = vld [vmem:[%s4638_s1 + $0x378] ss:$48 sps:$4 sm:$0xff]   ;;  %v3224_v43 = vld [vmem:[%s4638_s1 + $0x3d4] ss:$48 sps:$4 sm:$0xff]  }
  0x2c   :  { %1285 = vmatprep.subr.bf16.mxu0 %v3130_v44  ;;  %1326 = vmatprep.subr.bf16.mxu1 %v3132_v45  ;;  %v3227_v44 = vld [vmem:[%s4638_s1 + $0x3dc] ss:$48 sps:$4 sm:$0xff]   ;;  %v3222_v45 = vld [vmem:[%s4638_s1 + $0x3d0] ss:$48 sps:$4 sm:$0xff]  }
  0x2f   :  { %1286 = vmatpush1.bf16.msra.mxu0 %v3134_v47  ;;  %1327 = vmatpush1.bf16.msra.mxu1 %v3135_v49  ;;  %v3230_v47 = vld [vmem:[%s4638_s1 + $0x434] ss:$48 sps:$4 sm:$0xff]   ;;  %v3233_v49 = vld [vmem:[%s4638_s1 + $0x43c] ss:$48 sps:$4 sm:$0xff]  }
  0x30   :  { %1287 = vmatprep.subr.bf16.mxu0 %v3136_v50  ;;  %1328 = vmatprep.subr.bf16.mxu1 %v3138_v51  ;;  %v3228_v50 = vld [vmem:[%s4638_s1 + $0x430] ss:$48 sps:$4 sm:$0xff]   ;;  %v3231_v51 = vld [vmem:[%s4638_s1 + $0x438] ss:$48 sps:$4 sm:$0xff]  }
  0x33   :  { %1288 = vmatpush1.bf16.msra.mxu0 %v3140_v52  ;;  %1329 = vmatpush1.bf16.msra.mxu1 %v3141_v53  ;;  %v3236_v52 = vld [vmem:[%s4638_s1 + $0x494] ss:$48 sps:$4 sm:$0xff]   ;;  %v3239_v53 = vld [vmem:[%s4638_s1 + $0x49c] ss:$48 sps:$4 sm:$0xff]  }
  0x34   :  { %1289 = vmatprep.subr.bf16.mxu0 %v3142_v54  ;;  %1330 = vmatprep.subr.bf16.mxu1 %v3144_v55  ;;  %v3234_v54 = vld [vmem:[%s4638_s1 + $0x490] ss:$48 sps:$4 sm:$0xff]   ;;  %v3237_v55 = vld [vmem:[%s4638_s1 + $0x498] ss:$48 sps:$4 sm:$0xff]  }
  0x37   :  { %1290 = vmatpush1.bf16.msra.mxu0 %v3146_v56  ;;  %1331 = vmatpush1.bf16.msra.mxu1 %v3147_v57  ;;  %v3242_v56 = vld [vmem:[%s4638_s1 + $0x4f4] ss:$48 sps:$4 sm:$0xff]   ;;  %v3245_v57 = vld [vmem:[%s4638_s1 + $0x4fc] ss:$48 sps:$4 sm:$0xff]  }
  0x38   :  { %1291 = vmatprep.subr.bf16.mxu0 %v3148_v58  ;;  %1332 = vmatprep.subr.bf16.mxu1 %v3150_v59  ;;  %v3240_v58 = vld [vmem:[%s4638_s1 + $0x4f0] ss:$48 sps:$4 sm:$0xff]   ;;  %v3243_v59 = vld [vmem:[%s4638_s1 + $0x4f8] ss:$48 sps:$4 sm:$0xff]  }
  0x3b   :  { %1292 = vmatpush1.bf16.msra.mxu0 %v3152_v60  ;;  %1333 = vmatpush1.bf16.msra.mxu1 %v3153_v61  ;;  %v3248_v60 = vld [vmem:[%s4638_s1 + $0x554] ss:$48 sps:$4 sm:$0xff]   ;;  %v3251_v61 = vld [vmem:[%s4638_s1 + $0x55c] ss:$48 sps:$4 sm:$0xff]  }
  0x3c   :  { %1293 = vmatprep.subr.bf16.mxu0 %v3154_v62  ;;  %1334 = vmatprep.subr.bf16.mxu1 %v3156_v63  ;;  %v3246_v62 = vld [vmem:[%s4638_s1 + $0x550] ss:$48 sps:$4 sm:$0xff]   ;;  %v3249_v63 = vld [vmem:[%s4638_s1 + $0x558] ss:$48 sps:$4 sm:$0xff]  }
  0x3f   :  { %1294 = vmatpush1.bf16.msra.mxu0 %v3158_v0  ;;  %1335 = vmatpush1.bf16.msra.mxu1 %v3159_v1  ;;  %v3254_v0 = vld [vmem:[%s4638_s1 + $0x5b4] ss:$48 sps:$4 sm:$0xff]   ;;  %v3257_v1 = vld [vmem:[%s4638_s1 + $0x5bc] ss:$48 sps:$4 sm:$0xff]  }
  0x40   :  { %1345 = vmatprep.subr.bf16.mxu0 %v3164_v2  ;;  %1386 = vmatprep.subr.bf16.mxu1 %v3167_v3  ;;  %v3252_v2 = vld [vmem:[%s4638_s1 + $0x5b0] ss:$48 sps:$4 sm:$0xff]   ;;  %v3255_v3 = vld [vmem:[%s4638_s1 + $0x5b8] ss:$48 sps:$4 sm:$0xff]  }
  0x42   :  { %1296 = vmatmul.mubr.bf16.vlgmr.msra.gmra.mrb[0].mxu0 %v3790_v4  ;;  %1337 = vmatmul.mubr.bf16.vlgmr.msra.gmra.mrb[0].mxu1 %v3790_v4 }
  0x43   :  { %1346 = vmatpush1.bf16.msra.mxu0 %v3162_v5  ;;  %1387 = vmatpush1.bf16.msra.mxu1 %v3165_v6  ;;  %v3260_v5 = vld [vmem:[%s4638_s1 + $0x24] ss:$48 sps:$4 sm:$0xff]   ;;  %v3263_v6 = vld [vmem:[%s4638_s1 + $0x2c] ss:$48 sps:$4 sm:$0xff]  }
  0x44   :  { %1347 = vmatprep.subr.bf16.mxu0 %v3170_v7  ;;  %1388 = vmatprep.subr.bf16.mxu1 %v3173_v8  ;;  %v3258_v7 = vld [vmem:[%s4638_s1 + $0x20] ss:$48 sps:$4 sm:$0xff]   ;;  %v3261_v8 = vld [vmem:[%s4638_s1 + $0x28] ss:$48 sps:$4 sm:$0xff]  }
  0x45   :  { %1377 = vmatprep.mubr.bf16.mxu0 %v3729_v48  ;;  %1418 = vmatprep.mubr.bf16.mxu1 %v3729_v48 }
  0x47   :  { %1348 = vmatpush1.bf16.msra.mxu0 %v3168_v9  ;;  %1389 = vmatpush1.bf16.msra.mxu1 %v3171_v10  ;;  %v3266_v9 = vld [vmem:[%s4638_s1 + $0x84] ss:$48 sps:$4 sm:$0xff]   ;;  %v3269_v10 = vld [vmem:[%s4638_s1 + $0x8c] ss:$48 sps:$4 sm:$0xff]  }
  0x48   :  { %1349 = vmatprep.subr.bf16.mxu0 %v3176_v11  ;;  %1390 = vmatprep.subr.bf16.mxu1 %v3179_v12  ;;  %v3264_v11 = vld [vmem:[%s4638_s1 + $0x80] ss:$48 sps:$4 sm:$0xff]   ;;  %v3267_v12 = vld [vmem:[%s4638_s1 + $0x88] ss:$48 sps:$4 sm:$0xff]  }
  0x4b   :  { %1350 = vmatpush1.bf16.msra.mxu0 %v3174_v13  ;;  %1391 = vmatpush1.bf16.msra.mxu1 %v3177_v14  ;;  %v3272_v13 = vld [vmem:[%s4638_s1 + $0xe4] ss:$48 sps:$4 sm:$0xff]   ;;  %v3275_v14 = vld [vmem:[%s4638_s1 + $0xec] ss:$48 sps:$4 sm:$0xff]  }
  0x4c   :  { %1351 = vmatprep.subr.bf16.mxu0 %v3182_v15  ;;  %1392 = vmatprep.subr.bf16.mxu1 %v3185_v16  ;;  %v3270_v15 = vld [vmem:[%s4638_s1 + $0xe0] ss:$48 sps:$4 sm:$0xff]   ;;  %v3273_v16 = vld [vmem:[%s4638_s1 + $0xe8] ss:$48 sps:$4 sm:$0xff]  }
  0x4f   :  { %1352 = vmatpush1.bf16.msra.mxu0 %v3180_v17  ;;  %1393 = vmatpush1.bf16.msra.mxu1 %v3183_v18  ;;  %v3278_v17 = vld [vmem:[%s4638_s1 + $0x144] ss:$48 sps:$4 sm:$0xff]   ;;  %v3276_v18 = vld [vmem:[%s4638_s1 + $0x140] ss:$48 sps:$4 sm:$0xff]  }
  0x50   :  { %1353 = vmatprep.subr.bf16.mxu0 %v3188_v19  ;;  %1394 = vmatprep.subr.bf16.mxu1 %v3191_v20  ;;  %v3279_v19 = vld [vmem:[%s4638_s1 + $0x148] ss:$48 sps:$4 sm:$0xff]   ;;  %v3284_v20 = vld [vmem:[%s4638_s1 + $0x1a4] ss:$48 sps:$4 sm:$0xff]  }
  0x53   :  { %1354 = vmatpush1.bf16.msra.mxu0 %v3186_v21  ;;  %1395 = vmatpush1.bf16.msra.mxu1 %v3189_v22  ;;  %v3287_v21 = vld [vmem:[%s4638_s1 + $0x1ac] ss:$48 sps:$4 sm:$0xff]   ;;  %v3282_v22 = vld [vmem:[%s4638_s1 + $0x1a0] ss:$48 sps:$4 sm:$0xff]  }
  0x54   :  { %1355 = vmatprep.subr.bf16.mxu0 %v3194_v23  ;;  %1396 = vmatprep.subr.bf16.mxu1 %v3197_v24  ;;  %v3285_v23 = vld [vmem:[%s4638_s1 + $0x1a8] ss:$48 sps:$4 sm:$0xff]   ;;  %v3290_v24 = vld [vmem:[%s4638_s1 + $0x204] ss:$48 sps:$4 sm:$0xff]  }
  0x57   :  { %1356 = vmatpush1.bf16.msra.mxu0 %v3192_v25  ;;  %1397 = vmatpush1.bf16.msra.mxu1 %v3195_v26  ;;  %v3293_v25 = vld [vmem:[%s4638_s1 + $0x20c] ss:$48 sps:$4 sm:$0xff]   ;;  %v3288_v26 = vld [vmem:[%s4638_s1 + $0x200] ss:$48 sps:$4 sm:$0xff]  }
  0x58   :  { %1357 = vmatprep.subr.bf16.mxu0 %v3200_v27  ;;  %1398 = vmatprep.subr.bf16.mxu1 %v3203_v28  ;;  %v3291_v27 = vld [vmem:[%s4638_s1 + $0x208] ss:$48 sps:$4 sm:$0xff]   ;;  %v3296_v28 = vld [vmem:[%s4638_s1 + $0x264] ss:$48 sps:$4 sm:$0xff]  }
  0x5b   :  { %1358 = vmatpush1.bf16.msra.mxu0 %v3198_v29  ;;  %1399 = vmatpush1.bf16.msra.mxu1 %v3201_v30  ;;  %v3299_v29 = vld [vmem:[%s4638_s1 + $0x26c] ss:$48 sps:$4 sm:$0xff]   ;;  %v3294_v30 = vld [vmem:[%s4638_s1 + $0x260] ss:$48 sps:$4 sm:$0xff]  }
  0x5c   :  { %1359 = vmatprep.subr.bf16.mxu0 %v3206_v31  ;;  %1400 = vmatprep.subr.bf16.mxu1 %v3209_v32  ;;  %v3297_v31 = vld [vmem:[%s4638_s1 + $0x268] ss:$48 sps:$4 sm:$0xff]   ;;  %v3302_v32 = vld [vmem:[%s4638_s1 + $0x2c4] ss:$48 sps:$4 sm:$0xff]  }
  0x5f   :  { %1360 = vmatpush1.bf16.msra.mxu0 %v3204_v33  ;;  %1401 = vmatpush1.bf16.msra.mxu1 %v3207_v34  ;;  %v3305_v33 = vld [vmem:[%s4638_s1 + $0x2cc] ss:$48 sps:$4 sm:$0xff]   ;;  %v3300_v34 = vld [vmem:[%s4638_s1 + $0x2c0] ss:$48 sps:$4 sm:$0xff]  }
  0x60   :  { %1361 = vmatprep.subr.bf16.mxu0 %v3212_v35  ;;  %1402 = vmatprep.subr.bf16.mxu1 %v3215_v36  ;;  %v3303_v35 = vld [vmem:[%s4638_s1 + $0x2c8] ss:$48 sps:$4 sm:$0xff]   ;;  %v3308_v36 = vld [vmem:[%s4638_s1 + $0x324] ss:$48 sps:$4 sm:$0xff]  }
  0x63   :  { %1362 = vmatpush1.bf16.msra.mxu0 %v3210_v37  ;;  %1403 = vmatpush1.bf16.msra.mxu1 %v3213_v38  ;;  %v3311_v37 = vld [vmem:[%s4638_s1 + $0x32c] ss:$48 sps:$4 sm:$0xff]   ;;  %v3306_v38 = vld [vmem:[%s4638_s1 + $0x320] ss:$48 sps:$4 sm:$0xff]  }
  0x64   :  { %1363 = vmatprep.subr.bf16.mxu0 %v3218_v39  ;;  %1404 = vmatprep.subr.bf16.mxu1 %v3221_v40  ;;  %v3309_v39 = vld [vmem:[%s4638_s1 + $0x328] ss:$48 sps:$4 sm:$0xff]   ;;  %v3314_v40 = vld [vmem:[%s4638_s1 + $0x384] ss:$48 sps:$4 sm:$0xff]  }
  0x67   :  { %1364 = vmatpush1.bf16.msra.mxu0 %v3216_v41  ;;  %1405 = vmatpush1.bf16.msra.mxu1 %v3219_v42  ;;  %v3317_v41 = vld [vmem:[%s4638_s1 + $0x38c] ss:$48 sps:$4 sm:$0xff]   ;;  %v3312_v42 = vld [vmem:[%s4638_s1 + $0x380] ss:$48 sps:$4 sm:$0xff]  }
  0x68   :  { %1365 = vmatprep.subr.bf16.mxu0 %v3224_v43  ;;  %1406 = vmatprep.subr.bf16.mxu1 %v3227_v44  ;;  %v3315_v43 = vld [vmem:[%s4638_s1 + $0x388] ss:$48 sps:$4 sm:$0xff]   ;;  %v3320_v44 = vld [vmem:[%s4638_s1 + $0x3e4] ss:$48 sps:$4 sm:$0xff]  }
  0x6b   :  { %1366 = vmatpush1.bf16.msra.mxu0 %v3222_v45  ;;  %1407 = vmatpush1.bf16.msra.mxu1 %v3225_v46  ;;  %v3323_v45 = vld [vmem:[%s4638_s1 + $0x3ec] ss:$48 sps:$4 sm:$0xff]   ;;  %v3318_v46 = vld [vmem:[%s4638_s1 + $0x3e0] ss:$48 sps:$4 sm:$0xff]  }
  0x6c   :  { %1367 = vmatprep.subr.bf16.mxu0 %v3230_v47  ;;  %1408 = vmatprep.subr.bf16.mxu1 %v3233_v49  ;;  %v3321_v47 = vld [vmem:[%s4638_s1 + $0x3e8] ss:$48 sps:$4 sm:$0xff]   ;;  %v3326_v49 = vld [vmem:[%s4638_s1 + $0x444] ss:$48 sps:$4 sm:$0xff]  }
  0x6f   :  { %1368 = vmatpush1.bf16.msra.mxu0 %v3228_v50  ;;  %1409 = vmatpush1.bf16.msra.mxu1 %v3231_v51  ;;  %v3329_v50 = vld [vmem:[%s4638_s1 + $0x44c] ss:$48 sps:$4 sm:$0xff]   ;;  %v3324_v51 = vld [vmem:[%s4638_s1 + $0x440] ss:$48 sps:$4 sm:$0xff]  }
  0x70   :  { %1369 = vmatprep.subr.bf16.mxu0 %v3236_v52  ;;  %1410 = vmatprep.subr.bf16.mxu1 %v3239_v53  ;;  %v3327_v52 = vld [vmem:[%s4638_s1 + $0x448] ss:$48 sps:$4 sm:$0xff]   ;;  %v3332_v53 = vld [vmem:[%s4638_s1 + $0x4a4] ss:$48 sps:$4 sm:$0xff]  }
  0x73   :  { %1370 = vmatpush1.bf16.msra.mxu0 %v3234_v54  ;;  %1411 = vmatpush1.bf16.msra.mxu1 %v3237_v55  ;;  %v3335_v54 = vld [vmem:[%s4638_s1 + $0x4ac] ss:$48 sps:$4 sm:$0xff]   ;;  %v3330_v55 = vld [vmem:[%s4638_s1 + $0x4a0] ss:$48 sps:$4 sm:$0xff]  }
  0x74   :  { %1371 = vmatprep.subr.bf16.mxu0 %v3242_v56  ;;  %1412 = vmatprep.subr.bf16.mxu1 %v3245_v57  ;;  %v3333_v56 = vld [vmem:[%s4638_s1 + $0x4a8] ss:$48 sps:$4 sm:$0xff]   ;;  %v3338_v57 = vld [vmem:[%s4638_s1 + $0x504] ss:$48 sps:$4 sm:$0xff]  }
  0x77   :  { %1372 = vmatpush1.bf16.msra.mxu0 %v3240_v58  ;;  %1413 = vmatpush1.bf16.msra.mxu1 %v3243_v59  ;;  %v3341_v58 = vld [vmem:[%s4638_s1 + $0x50c] ss:$48 sps:$4 sm:$0xff]   ;;  %v3336_v59 = vld [vmem:[%s4638_s1 + $0x500] ss:$48 sps:$4 sm:$0xff]  }
  0x78   :  { %1373 = vmatprep.subr.bf16.mxu0 %v3248_v60  ;;  %1414 = vmatprep.subr.bf16.mxu1 %v3251_v61  ;;  %v3339_v60 = vld [vmem:[%s4638_s1 + $0x508] ss:$48 sps:$4 sm:$0xff]   ;;  %v3344_v61 = vld [vmem:[%s4638_s1 + $0x564] ss:$48 sps:$4 sm:$0xff]  }
  0x7b   :  { %1374 = vmatpush1.bf16.msra.mxu0 %v3246_v62  ;;  %1415 = vmatpush1.bf16.msra.mxu1 %v3249_v63  ;;  %v3347_v62 = vld [vmem:[%s4638_s1 + $0x56c] ss:$48 sps:$4 sm:$0xff]   ;;  %v3342_v63 = vld [vmem:[%s4638_s1 + $0x560] ss:$48 sps:$4 sm:$0xff]  }
  0x7c   :  { %1375 = vmatprep.subr.bf16.mxu0 %v3254_v0  ;;  %1416 = vmatprep.subr.bf16.mxu1 %v3257_v1  ;;  %v3345_v0 = vld [vmem:[%s4638_s1 + $0x568] ss:$48 sps:$4 sm:$0xff]   ;;  %v3350_v1 = vld [vmem:[%s4638_s1 + $0x5c4] ss:$48 sps:$4 sm:$0xff]  }
  0x7f   :  { %1376 = vmatpush1.bf16.msra.mxu0 %v3252_v2  ;;  %1417 = vmatpush1.bf16.msra.mxu1 %v3255_v3  ;;  %v3353_v2 = vld [vmem:[%s4638_s1 + $0x5cc] ss:$48 sps:$4 sm:$0xff]   ;;  %v3348_v3 = vld [vmem:[%s4638_s1 + $0x5c0] ss:$48 sps:$4 sm:$0xff]  }
  0x80   :  { %1427 = vmatprep.subr.bf16.mxu0 %v3260_v5  ;;  %1468 = vmatprep.subr.bf16.mxu1 %v3263_v6  ;;  %v3351_v5 = vld [vmem:[%s4638_s1 + $0x5c8] ss:$48 sps:$4 sm:$0xff]   ;;  %v3354_v6 = vld [vmem:[%s4640_s3] ss:$16 sps:$4 sm:$0xff]  }
  0x82   :  { %1378 = vmatmul.mubr.bf16.vlgmr.msra.gmra.mrb[4].mxu0 %v3790_v4  ;;  %1419 = vmatmul.mubr.bf16.vlgmr.msra.gmra.mrb[4].mxu1 %v3790_v4 }
  0x83   :  { %1428 = vmatpush1.bf16.msra.mxu0 %v3258_v7  ;;  %1469 = vmatpush1.bf16.msra.mxu1 %v3261_v8  ;;  %v3356_v7 = vld [vmem:[%s4640_s3 + $0x4] ss:$16 sps:$4 sm:$0xff]   ;;  %v3357_v8 = vld [vmem:[%s4640_s3 + $0x8] ss:$16 sps:$4 sm:$0xff]  }
  0x84   :  { %1429 = vmatprep.subr.bf16.mxu0 %v3266_v9  ;;  %1470 = vmatprep.subr.bf16.mxu1 %v3269_v10  ;;  %v3359_v9 = vld [vmem:[%s4640_s3 + $0xc] ss:$16 sps:$4 sm:$0xff]   ;;  %v3362_v10 = vld [vmem:[%s4640_s3 + $0x24] ss:$16 sps:$4 sm:$0xff]  }
  0x85   :  { %1459 = vmatprep.mubr.bf16.mxu0 %v3729_v48  ;;  %1500 = vmatprep.mubr.bf16.mxu1 %v3729_v48  ;;  %v3281_v48 = vld [vmem:[%s4638_s1 + $0x14c] ss:$48 sps:$4 sm:$0xff]  }
  0x87   :  { %1430 = vmatpush1.bf16.msra.mxu0 %v3264_v11  ;;  %1471 = vmatpush1.bf16.msra.mxu1 %v3267_v12  ;;  %v3363_v11 = vld [vmem:[%s4640_s3 + $0x28] ss:$16 sps:$4 sm:$0xff]   ;;  %v3365_v12 = vld [vmem:[%s4640_s3 + $0x2c] ss:$16 sps:$4 sm:$0xff]  }
  0x88   :  { %1431 = vmatprep.subr.bf16.mxu0 %v3272_v13  ;;  %1472 = vmatprep.subr.bf16.mxu1 %v3275_v14  ;;  %v3368_v13 = vld [vmem:[%s4640_s3 + $0x44] ss:$16 sps:$4 sm:$0xff]   ;;  %v3366_v14 = vld [vmem:[%s4640_s3 + $0x40] ss:$16 sps:$4 sm:$0xff]  }
  0x8b   :  { %1432 = vmatpush1.bf16.msra.mxu0 %v3270_v15  ;;  %1473 = vmatpush1.bf16.msra.mxu1 %v3273_v16  ;;  %v3371_v15 = vld [vmem:[%s4640_s3 + $0x4c] ss:$16 sps:$4 sm:$0xff]   ;;  %v3369_v16 = vld [vmem:[%s4640_s3 + $0x48] ss:$16 sps:$4 sm:$0xff]  }
  0x8c   :  { %1433 = vmatprep.subr.bf16.mxu0 %v3278_v17  ;;  %1474 = vmatprep.subr.bf16.mxu1 %v3281_v48  ;;  %v3374_v17 = vld [vmem:[%s4640_s3 + $0x64] ss:$16 sps:$4 sm:$0xff]   ;;  %v3377_v48 = vld [vmem:[%s4640_s3 + $0x6c] ss:$16 sps:$4 sm:$0xff]  }
  0x8f   :  { %1434 = vmatpush1.bf16.msra.mxu0 %v3276_v18  ;;  %1475 = vmatpush1.bf16.msra.mxu1 %v3279_v19  ;;  %v3372_v18 = vld [vmem:[%s4640_s3 + $0x60] ss:$16 sps:$4 sm:$0xff]   ;;  %v3375_v19 = vld [vmem:[%s4640_s3 + $0x68] ss:$16 sps:$4 sm:$0xff]  }
  0x90   :  { %1435 = vmatprep.subr.bf16.mxu0 %v3284_v20  ;;  %1476 = vmatprep.subr.bf16.mxu1 %v3287_v21  ;;  %v3380_v20 = vld [vmem:[%s4640_s3 + $0x84] ss:$16 sps:$4 sm:$0xff]   ;;  %v3383_v21 = vld [vmem:[%s4640_s3 + $0x8c] ss:$16 sps:$4 sm:$0xff]  }
  0x93   :  { %1436 = vmatpush1.bf16.msra.mxu0 %v3282_v22  ;;  %1477 = vmatpush1.bf16.msra.mxu1 %v3285_v23  ;;  %v3378_v22 = vld [vmem:[%s4640_s3 + $0x80] ss:$16 sps:$4 sm:$0xff]   ;;  %v3381_v23 = vld [vmem:[%s4640_s3 + $0x88] ss:$16 sps:$4 sm:$0xff]  }
  0x94   :  { %1437 = vmatprep.subr.bf16.mxu0 %v3290_v24  ;;  %1478 = vmatprep.subr.bf16.mxu1 %v3293_v25  ;;  %v3386_v24 = vld [vmem:[%s4640_s3 + $0xa4] ss:$16 sps:$4 sm:$0xff]   ;;  %v3389_v25 = vld [vmem:[%s4640_s3 + $0xac] ss:$16 sps:$4 sm:$0xff]  }
  0x97   :  { %1438 = vmatpush1.bf16.msra.mxu0 %v3288_v26  ;;  %1479 = vmatpush1.bf16.msra.mxu1 %v3291_v27  ;;  %v3384_v26 = vld [vmem:[%s4640_s3 + $0xa0] ss:$16 sps:$4 sm:$0xff]   ;;  %v3387_v27 = vld [vmem:[%s4640_s3 + $0xa8] ss:$16 sps:$4 sm:$0xff]  }
  0x98   :  { %1439 = vmatprep.subr.bf16.mxu0 %v3296_v28  ;;  %1480 = vmatprep.subr.bf16.mxu1 %v3299_v29  ;;  %v3392_v28 = vld [vmem:[%s4640_s3 + $0xc4] ss:$16 sps:$4 sm:$0xff]   ;;  %v3395_v29 = vld [vmem:[%s4640_s3 + $0xcc] ss:$16 sps:$4 sm:$0xff]  }
  0x9b   :  { %1440 = vmatpush1.bf16.msra.mxu0 %v3294_v30  ;;  %1481 = vmatpush1.bf16.msra.mxu1 %v3297_v31  ;;  %v3390_v30 = vld [vmem:[%s4640_s3 + $0xc0] ss:$16 sps:$4 sm:$0xff]   ;;  %v3393_v31 = vld [vmem:[%s4640_s3 + $0xc8] ss:$16 sps:$4 sm:$0xff]  }
  0x9c   :  { %1441 = vmatprep.subr.bf16.mxu0 %v3302_v32  ;;  %1482 = vmatprep.subr.bf16.mxu1 %v3305_v33  ;;  %v3398_v32 = vld [vmem:[%s4640_s3 + $0xe4] ss:$16 sps:$4 sm:$0xff]   ;;  %v3401_v33 = vld [vmem:[%s4640_s3 + $0xec] ss:$16 sps:$4 sm:$0xff]  }
  0x9f   :  { %1442 = vmatpush1.bf16.msra.mxu0 %v3300_v34  ;;  %1483 = vmatpush1.bf16.msra.mxu1 %v3303_v35  ;;  %v3396_v34 = vld [vmem:[%s4640_s3 + $0xe0] ss:$16 sps:$4 sm:$0xff]   ;;  %v3399_v35 = vld [vmem:[%s4640_s3 + $0xe8] ss:$16 sps:$4 sm:$0xff]  }
  0xa0   :  { %1443 = vmatprep.subr.bf16.mxu0 %v3308_v36  ;;  %1484 = vmatprep.subr.bf16.mxu1 %v3311_v37  ;;  %v3404_v36 = vld [vmem:[%s4640_s3 + $0x104] ss:$16 sps:$4 sm:$0xff]   ;;  %v3407_v37 = vld [vmem:[%s4640_s3 + $0x10c] ss:$16 sps:$4 sm:$0xff]  }
  0xa3   :  { %1444 = vmatpush1.bf16.msra.mxu0 %v3306_v38  ;;  %1485 = vmatpush1.bf16.msra.mxu1 %v3309_v39  ;;  %v3402_v38 = vld [vmem:[%s4640_s3 + $0x100] ss:$16 sps:$4 sm:$0xff]   ;;  %v3405_v39 = vld [vmem:[%s4640_s3 + $0x108] ss:$16 sps:$4 sm:$0xff]  }
  0xa4   :  { %1445 = vmatprep.subr.bf16.mxu0 %v3314_v40  ;;  %1486 = vmatprep.subr.bf16.mxu1 %v3317_v41  ;;  %v3410_v40 = vld [vmem:[%s4640_s3 + $0x124] ss:$16 sps:$4 sm:$0xff]   ;;  %v3413_v41 = vld [vmem:[%s4640_s3 + $0x12c] ss:$16 sps:$4 sm:$0xff]  }
  0xa7   :  { %1446 = vmatpush1.bf16.msra.mxu0 %v3312_v42  ;;  %1487 = vmatpush1.bf16.msra.mxu1 %v3315_v43  ;;  %v3408_v42 = vld [vmem:[%s4640_s3 + $0x120] ss:$16 sps:$4 sm:$0xff]   ;;  %v3411_v43 = vld [vmem:[%s4640_s3 + $0x128] ss:$16 sps:$4 sm:$0xff]  }
  0xa8   :  { %1447 = vmatprep.subr.bf16.mxu0 %v3320_v44  ;;  %1488 = vmatprep.subr.bf16.mxu1 %v3323_v45  ;;  %v3416_v44 = vld [vmem:[%s4640_s3 + $0x144] ss:$16 sps:$4 sm:$0xff]   ;;  %v3419_v45 = vld [vmem:[%s4640_s3 + $0x14c] ss:$16 sps:$4 sm:$0xff]  }
  0xab   :  { %1448 = vmatpush1.bf16.msra.mxu0 %v3318_v46  ;;  %1489 = vmatpush1.bf16.msra.mxu1 %v3321_v47  ;;  %v3414_v46 = vld [vmem:[%s4640_s3 + $0x140] ss:$16 sps:$4 sm:$0xff]   ;;  %v3417_v47 = vld [vmem:[%s4640_s3 + $0x148] ss:$16 sps:$4 sm:$0xff]  }
  0xac   :  { %1449 = vmatprep.subr.bf16.mxu0 %v3326_v49  ;;  %1490 = vmatprep.subr.bf16.mxu1 %v3329_v50  ;;  %v3422_v49 = vld [vmem:[%s4640_s3 + $0x164] ss:$16 sps:$4 sm:$0xff]   ;;  %v3425_v50 = vld [vmem:[%s4640_s3 + $0x16c] ss:$16 sps:$4 sm:$0xff]  }
  0xaf   :  { %1450 = vmatpush1.bf16.msra.mxu0 %v3324_v51  ;;  %1491 = vmatpush1.bf16.msra.mxu1 %v3327_v52  ;;  %v236_v51 = vlaneseq  ;;  %v3420_v52 = vld [vmem:[%s4640_s3 + $0x160] ss:$16 sps:$4 sm:$0xff]  }
  0xb0   :  { %1451 = vmatprep.subr.bf16.mxu0 %v3332_v53  ;;  %1492 = vmatprep.subr.bf16.mxu1 %v3335_v54  ;;  %v3423_v53 = vld [vmem:[%s4640_s3 + $0x168] ss:$16 sps:$4 sm:$0xff]   ;;  %v3428_v54 = vld [vmem:[%s4640_s3 + $0x184] ss:$16 sps:$4 sm:$0xff]  }
  0xb3   :  { %1452 = vmatpush1.bf16.msra.mxu0 %v3330_v55  ;;  %1493 = vmatpush1.bf16.msra.mxu1 %v3333_v56  ;;  %v3431_v55 = vld [vmem:[%s4640_s3 + $0x18c] ss:$16 sps:$4 sm:$0xff]   ;;  %v4330_v56 = vshrl.u32 %v236_v51, 7 }
  0xb4   :  { %1453 = vmatprep.subr.bf16.mxu0 %v3338_v57  ;;  %1494 = vmatprep.subr.bf16.mxu1 %v3341_v58  ;;  %v3426_v57 = vld [vmem:[%s4640_s3 + $0x180] ss:$16 sps:$4 sm:$0xff]   ;;  %v3429_v58 = vld [vmem:[%s4640_s3 + $0x188] ss:$16 sps:$4 sm:$0xff]  }
  0xb7   :  { %1454 = vmatpush1.bf16.msra.mxu0 %v3336_v59  ;;  %1495 = vmatpush1.bf16.msra.mxu1 %v3339_v60  ;;  %v3434_v59 = vld [vmem:[%s4640_s3 + $0x1a4] ss:$16 sps:$4 sm:$0xff]   ;;  %v4342_v60 = vsub.s32 0, %v4330_v56 }
  0xb8   :  { %1455 = vmatprep.subr.bf16.mxu0 %v3344_v61  ;;  %1496 = vmatprep.subr.bf16.mxu1 %v3347_v62  ;;  %v3437_v61 = vld [vmem:[%s4640_s3 + $0x1ac] ss:$16 sps:$4 sm:$0xff]   ;;  %v4350_v62 = vld [vmem:[%s4641_s2] sm:$0xff] }
  0xbb   :  { %1456 = vmatpush1.bf16.msra.mxu0 %v3342_v63  ;;  %1497 = vmatpush1.bf16.msra.mxu1 %v3345_v0  ;;  %v4353_v63 = vsub.s32 3, %v4330_v56  ;;  %v3432_v0 = vld [vmem:[%s4640_s3 + $0x1a0] ss:$16 sps:$4 sm:$0xff]  }
  0xbc   :  { %1457 = vmatprep.subr.bf16.mxu0 %v3350_v1  ;;  %1498 = vmatprep.subr.bf16.mxu1 %v3353_v2  ;;  %v3435_v1 = vld [vmem:[%s4640_s3 + $0x1a8] ss:$16 sps:$4 sm:$0xff]   ;;  %v239_v2 = vrot.slane %v4350_v62, %v4342_v60 }
  0xbf   :  { %1458 = vmatpush1.bf16.msra.mxu0 %v3348_v3  ;;  %1499 = vmatpush1.bf16.msra.mxu1 %v3351_v5  ;;  %v251_v3 = vrot.slane %v4350_v62, %v4353_v63 }
  0xc0   :  { %2131 = vmatprep.subr.bf16.mxu0 %v3356_v7  ;;  %2213 = vmatprep.subr.bf16.mxu1 %v3359_v9 }
  0xc2   :  { %1460 = vmatmul.mubr.bf16.vlgmr.msra.gmra.mrb[8].mxu0 %v3790_v4  ;;  %1501 = vmatmul.mubr.bf16.vlgmr.msra.gmra.mrb[8].mxu1 %v3790_v4  ;;  %v3360_v4 = vld [vmem:[%s4640_s3 + $0x20] ss:$16 sps:$4 sm:$0xff]  }
  0xc3   :  { %2132 = vmatpush1.bf16.msra.mxu0 %v3354_v6  ;;  %2214 = vmatpush1.bf16.msra.mxu1 %v3357_v8 }
  0xc4   :  { %2133 = vmatprep.subr.bf16.mxu0 %v3362_v10  ;;  %2215 = vmatprep.subr.bf16.mxu1 %v3365_v12  ;;  %v3443_v10 = vld [vmem:[%s4640_s3 + $0x1cc] ss:$16 sps:$4 sm:$0xff]  }
  0xc7   :  { %2134 = vmatpush1.bf16.msra.mxu0 %v3360_v4  ;;  %2216 = vmatpush1.bf16.msra.mxu1 %v3363_v11  ;;  %v3440_v4 = vld [vmem:[%s4640_s3 + $0x1c4] ss:$16 sps:$4 sm:$0xff]  }
  0xc8   :  { %2135 = vmatprep.subr.bf16.mxu0 %v3368_v13  ;;  %2217 = vmatprep.subr.bf16.mxu1 %v3371_v15  ;;  %v3441_v15 = vld [vmem:[%s4640_s3 + $0x1c8] ss:$16 sps:$4 sm:$0xff]  }
  0xcb   :  { %2136 = vmatpush1.bf16.msra.mxu0 %v3366_v14  ;;  %2218 = vmatpush1.bf16.msra.mxu1 %v3369_v16  ;;  %v3438_v14 = vld [vmem:[%s4640_s3 + $0x1c0] ss:$16 sps:$4 sm:$0xff]  }
  0xcc   :  { %2137 = vmatprep.subr.bf16.mxu0 %v3374_v17  ;;  %2219 = vmatprep.subr.bf16.mxu1 %v3377_v48 }
  0xcf   :  { %2138 = vmatpush1.bf16.msra.mxu0 %v3372_v18  ;;  %2220 = vmatpush1.bf16.msra.mxu1 %v3375_v19  ;;  %v3446_v19 = vld [vmem:[%s4640_s3 + $0x1e4] ss:$16 sps:$4 sm:$0xff]  }
  0xd0   :  { %2139 = vmatprep.subr.bf16.mxu0 %v3380_v20  ;;  %2221 = vmatprep.subr.bf16.mxu1 %v3383_v21  ;;  %v3449_v20 = vld [vmem:[%s4640_s3 + $0x1ec] ss:$16 sps:$4 sm:$0xff]  }
  0xd3   :  { %2140 = vmatpush1.bf16.msra.mxu0 %v3378_v22  ;;  %2222 = vmatpush1.bf16.msra.mxu1 %v3381_v23  ;;  %v3444_v22 = vld [vmem:[%s4640_s3 + $0x1e0] ss:$16 sps:$4 sm:$0xff]   ;;  %v3447_v23 = vld [vmem:[%s4640_s3 + $0x1e8] ss:$16 sps:$4 sm:$0xff]  }
  0xd4   :  { %2141 = vmatprep.subr.bf16.mxu0 %v3386_v24  ;;  %2223 = vmatprep.subr.bf16.mxu1 %v3389_v25  ;;  %v3452_v24 = vld [vmem:[%s4640_s3 + $0x204] ss:$16 sps:$4 sm:$0xff]   ;;  %v3455_v25 = vld [vmem:[%s4640_s3 + $0x20c] ss:$16 sps:$4 sm:$0xff]  }
  0xd7   :  { %2142 = vmatpush1.bf16.msra.mxu0 %v3384_v26  ;;  %2224 = vmatpush1.bf16.msra.mxu1 %v3387_v27  ;;  %v4398_v26 = vsub.s32 1, %v4330_v56  ;;  %v4401_v27 = vsub.s32 2, %v4330_v56 }
  0xd8   :  { %2143 = vmatprep.subr.bf16.mxu0 %v3392_v28  ;;  %2225 = vmatprep.subr.bf16.mxu1 %v3395_v29  ;;  %v254_v28 = vsub.s32 4, %v4330_v56  ;;  %v258_v29 = vsub.s32 5, %v4330_v56 }
  0xdb   :  { %2144 = vmatpush1.bf16.msra.mxu0 %v3390_v30  ;;  %2226 = vmatpush1.bf16.msra.mxu1 %v3393_v31  ;;  %v243_v30 = vrot.slane %v4350_v62, %v4398_v26  ;;  %v247_v31 = vrot.slane %v4350_v62, %v4401_v27 }
  0xdc   :  { %2145 = vmatprep.subr.bf16.mxu0 %v3398_v32  ;;  %2227 = vmatprep.subr.bf16.mxu1 %v3401_v33  ;;  %v255_v32 = vrot.slane %v4350_v62, %v254_v28  ;;  %v259_v33 = vrot.slane %v4350_v62, %v258_v29  ;;  %v3450_v29 = vld [vmem:[%s4640_s3 + $0x200] ss:$16 sps:$4 sm:$0xff]  }
  0xdf   :  { %2146 = vmatpush1.bf16.msra.mxu0 %v3396_v34  ;;  %2228 = vmatpush1.bf16.msra.mxu1 %v3399_v35 }
  0xe0   :  { %2147 = vmatprep.subr.bf16.mxu0 %v3404_v36  ;;  %2229 = vmatprep.subr.bf16.mxu1 %v3407_v37 }
  0xe3   :  { %2148 = vmatpush1.bf16.msra.mxu0 %v3402_v38  ;;  %2230 = vmatpush1.bf16.msra.mxu1 %v3405_v39 }
  0xe4   :  { %2149 = vmatprep.subr.bf16.mxu0 %v3410_v40  ;;  %2231 = vmatprep.subr.bf16.mxu1 %v3413_v41 }
  0xe7   :  { %2150 = vmatpush1.bf16.msra.mxu0 %v3408_v42  ;;  %2232 = vmatpush1.bf16.msra.mxu1 %v3411_v43 }
  0xe8   :  { %2151 = vmatprep.subr.bf16.mxu0 %v3416_v44  ;;  %2233 = vmatprep.subr.bf16.mxu1 %v3419_v45 }
  0xeb   :  { %2152 = vmatpush1.bf16.msra.mxu0 %v3414_v46  ;;  %2234 = vmatpush1.bf16.msra.mxu1 %v3417_v47 }
  0xec   :  { %2153 = vmatprep.subr.bf16.mxu0 %v3422_v49  ;;  %2235 = vmatprep.subr.bf16.mxu1 %v3425_v50 }
  0xef   :  { %2154 = vmatpush1.bf16.msra.mxu0 %v3420_v52  ;;  %2236 = vmatpush1.bf16.msra.mxu1 %v3423_v53  ;;  %v266_v53 = vsub.s32 7, %v4330_v56 }
  0xf0   :  { %2155 = vmatprep.subr.bf16.mxu0 %v3428_v54  ;;  %2237 = vmatprep.subr.bf16.mxu1 %v3431_v55  ;;  %v262_v54 = vsub.s32 6, %v4330_v56  ;;  %v233_v55 = vld [vmem:[%s4641_s2 + $0x8] sm:$0xf] }
  0xf3   :  { %2156 = vmatpush1.bf16.msra.mxu0 %v3426_v57  ;;  %2238 = vmatpush1.bf16.msra.mxu1 %v3429_v58  ;;  %v267_v57 = vrot.slane %v4350_v62, %v266_v53  ;;  %v263_v58 = vrot.slane %v4350_v62, %v262_v54  ;;  %v3488_v53 = vld [vmem:[%s4640_s3 + $0x2c4] ss:$16 sps:$4 sm:$0xff]   ;;  %v3491_v54 = vld [vmem:[%s4640_s3 + $0x2cc] ss:$16 sps:$4 sm:$0xff]  }
  0xf4   :  { %2157 = vmatprep.subr.bf16.mxu0 %v3434_v59  ;;  %2239 = vmatprep.subr.bf16.mxu1 %v3437_v61  ;;  %v271_v59 = vrot.slane %v233_v55, %v4342_v60  ;;  %v279_v61 = vrot.slane %v233_v55, %v4401_v27 }
  0xf7   :  { %2158 = vmatpush1.bf16.msra.mxu0 %v3432_v0  ;;  %2240 = vmatpush1.bf16.msra.mxu1 %v3435_v1  ;;  %v275_v0 = vrot.slane %v233_v55, %v4398_v26  ;;  %v283_v1 = vrot.slane %v233_v55, %v4353_v63  ;;  %v3486_v55 = vld [vmem:[%s4640_s3 + $0x2c0] ss:$16 sps:$4 sm:$0xff]  }
  0xf8   :  { %2159 = vmatprep.subr.bf16.mxu0 %v3440_v4  ;;  %2241 = vmatprep.subr.bf16.mxu1 %v3443_v10 }
  0xfb   :  { %2160 = vmatpush1.bf16.msra.mxu0 %v3438_v14  ;;  %2242 = vmatpush1.bf16.msra.mxu1 %v3441_v15 }
  0xfc   :  { %2161 = vmatprep.subr.bf16.mxu0 %v3446_v19  ;;  %2243 = vmatprep.subr.bf16.mxu1 %v3449_v20 }
  0xff   :  { %2162 = vmatpush1.bf16.msra.mxu0 %v3444_v22  ;;  %2244 = vmatpush1.bf16.msra.mxu1 %v3447_v23 }
 0x100   :  { %2172 = vmatprep.subr.bf16.mxu0 %v3452_v24  ;;  %2254 = vmatprep.subr.bf16.mxu1 %v3455_v25 }
 0x115   :  { %v1297_v5 = vpop.f32.mrb[0].mxu0  ;;  %v1338_v6 = vpop.f32.mrb[0].mxu1 }
 0x116   :  { %v1298_v7 = vadd.f32 %v1297_v5, %v239_v2  ;;  %v1299_v8 = vpop.f32.mrb[1].mxu0  ;;  %v1340_v9 = vpop.f32.mrb[1].mxu1  ;;  %v1339_v35 = vadd.f32 %v1338_v6, %v247_v31 }
 0x117   :  { %v1341_v11 = vadd.f32 %v1340_v9, %v251_v3  ;;  %v1301_v12 = vpop.f32.mrb[2].mxu0  ;;  %v1342_v13 = vpop.f32.mrb[2].mxu1  ;;  %v1300_v34 = vadd.f32 %v1299_v8, %v243_v30  ;;  %v3453_v30 = vld [vmem:[%s4640_s3 + $0x208] ss:$16 sps:$4 sm:$0xff]  }
 0x118   :  { %v1509_v16 = vmax.f32 %v1298_v7, 0.0  ;;  %v1302_v17 = vpop.f32.mrb[3].mxu0  ;;  %v1343_v48 = vpop.f32.mrb[3].mxu1  ;;  %v1511_v49 = vmax.f32 %v1339_v35, 0.0  ;;  %v3464_v35 = vld [vmem:[%s4640_s3 + $0x244] ss:$16 sps:$4 sm:$0xff]  }
 0x119   :  { %v1512_v18 = vmax.f32 %v1341_v11, 0.0  ;;  %v1510_v44 = vmax.f32 %v1300_v34, 0.0  ;;  %v3459_v34 = vld [vmem:[%s4640_s3 + $0x228] ss:$16 sps:$4 sm:$0xff]  }
 0x11b   :  { %v4383_v21 = vmax.f32 %v1509_v16, %v1512_v18 }
 0x155   :  { %v1379_v36 = vpop.f32.mrb[4].mxu0  ;;  %v1420_v37 = vpop.f32.mrb[4].mxu1 }
 0x156   :  { %v1380_v38 = vadd.f32 %v1379_v36, %v255_v32  ;;  %v1381_v39 = vpop.f32.mrb[5].mxu0  ;;  %v1422_v40 = vpop.f32.mrb[5].mxu1  ;;  %v1421_v3 = vadd.f32 %v1420_v37, %v263_v58  ;;  %v3458_v32 = vld [vmem:[%s4640_s3 + $0x224] ss:$16 sps:$4 sm:$0xff]   ;;  %v3467_v36 = vld [vmem:[%s4640_s3 + $0x24c] ss:$16 sps:$4 sm:$0xff]  }
 0x157   :  { %v1382_v41 = vadd.f32 %v1381_v39, %v259_v33  ;;  %v1383_v42 = vpop.f32.mrb[6].mxu0  ;;  %v1424_v43 = vpop.f32.mrb[6].mxu1  ;;  %v1423_v2 = vadd.f32 %v1422_v40, %v267_v57  ;;  %v3456_v33 = vld [vmem:[%s4640_s3 + $0x220] ss:$16 sps:$4 sm:$0xff]   ;;  %v3522_v37 = vmov 0  }
 0x158   :  { %v1513_v45 = vmax.f32 %v1380_v38, 0.0  ;;  %v1384_v46 = vpop.f32.mrb[7].mxu0  ;;  %v1425_v47 = vpop.f32.mrb[7].mxu1  ;;  %v1515_v17 = vmax.f32 %v1421_v3, 0.0  ;;  %v3462_v38 = vld [vmem:[%s4640_s3 + $0x240] ss:$16 sps:$4 sm:$0xff]  }
 0x159   :  { %v1514_v50 = vmax.f32 %v1382_v41, 0.0  ;;  %v1516_v12 = vmax.f32 %v1423_v2, 0.0  ;;  %v3465_v39 = vld [vmem:[%s4640_s3 + $0x248] ss:$16 sps:$4 sm:$0xff]   ;;  %v3470_v40 = vld [vmem:[%s4640_s3 + $0x264] ss:$16 sps:$4 sm:$0xff]  }
 0x15a   :  { %v1522_v51 = vmax.f32 %v1510_v44, %v1513_v45  ;;  %v3473_v41 = vld [vmem:[%s4640_s3 + $0x26c] ss:$16 sps:$4 sm:$0xff]   ;;  %v3468_v42 = vld [vmem:[%s4640_s3 + $0x260] ss:$16 sps:$4 sm:$0xff]   ;;  %v3471_v43 = vld [vmem:[%s4640_s3 + $0x268] ss:$16 sps:$4 sm:$0xff]  }
 0x15b   :  { %v1523_v52 = vmax.f32 %v1511_v49, %v1514_v50  ;;  %v3476_v44 = vld [vmem:[%s4640_s3 + $0x284] ss:$16 sps:$4 sm:$0xff]   ;;  %v3479_v45 = vld [vmem:[%s4640_s3 + $0x28c] ss:$16 sps:$4 sm:$0xff]   ;;  %v3474_v46 = vld [vmem:[%s4640_s3 + $0x280] ss:$16 sps:$4 sm:$0xff]  }
 0x15c   :  { %v3477_v47 = vld [vmem:[%s4640_s3 + $0x288] ss:$16 sps:$4 sm:$0xff]   ;;  %v3482_v49 = vld [vmem:[%s4640_s3 + $0x2a4] ss:$16 sps:$4 sm:$0xff]   ;;  %v3485_v50 = vld [vmem:[%s4640_s3 + $0x2ac] ss:$16 sps:$4 sm:$0xff]  }
 0x15d   :  { %v3489_v57 = vld [vmem:[%s4640_s3 + $0x2c8] ss:$16 sps:$4 sm:$0xff]   ;;  %v3494_v58 = vld [vmem:[%s4640_s3 + $0x2e4] ss:$16 sps:$4 sm:$0xff]   ;;  %v3523_v3 = vmov 0.0  }
 0x195   :  { %v1461_v5 = vpop.f32.mrb[8].mxu0  ;;  %v1502_v56 = vpop.f32.mrb[8].mxu1 }
 0x196   :  { %v1462_v6 = vadd.f32 %v1461_v5, %v271_v59  ;;  %v1503_v7 = vadd.f32 %v1502_v56, %v279_v61  ;;  %v1463_v8 = vpop.f32.mrb[9].mxu0  ;;  %v1504_v9 = vpop.f32.mrb[9].mxu1  ;;  %v3497_v59 = vld [vmem:[%s4640_s3 + $0x2ec] ss:$16 sps:$4 sm:$0xff]   ;;  %v3492_v61 = vld [vmem:[%s4640_s3 + $0x2e0] ss:$16 sps:$4 sm:$0xff]  }
 0x197   :  { %v1464_v4 = vadd.f32 %v1463_v8, %v275_v0  ;;  %v1505_v10 = vadd.f32 %v1504_v9, %v283_v1  ;;  %v1465_v11 = vpop.f32.mrb[10].mxu0  ;;  %v1506_v62 = vpop.f32.mrb[10].mxu1  ;;  %v3495_v0 = vld [vmem:[%s4640_s3 + $0x2e8] ss:$16 sps:$4 sm:$0xff]   ;;  %v3498_v1 = vld [vmem:[%s4642_s5] sm:$0xff]   ;;  %v3500_v56 = vld [vmem:[%s4642_s5 + $0x10] sm:$0xff]  }
 0x198   :  { %v1517_v13 = vmax.f32 %v1462_v6, 0.0  ;;  %v1519_v14 = vmax.f32 %v1503_v7, 0.0  ;;  %v1466_v15 = vpop.f32.mrb[11].mxu0  ;;  %v1507_v16 = vpop.f32.mrb[11].mxu1  ;;  %v3499_v5 = vld [vmem:[%s4642_s5 + $0x8] sm:$0xff]   ;;  %v3501_v6 = vld [vmem:[%s4642_s5 + $0x18] sm:$0xff]  }
 0x199   :  { %v1518_v48 = vmax.f32 %v1464_v4, 0.0  ;;  %v1520_v18 = vmax.f32 %v1505_v10, 0.0  ;;  %v3502_v7 = vld [vmem:[%s4642_s5 + $0x20] sm:$0xff]   ;;  %v3503_v8 = vld [vmem:[%s4642_s5 + $0x28] sm:$0xff]   ;;  %v3504_v9 = vld [vmem:[%s4642_s5 + $0x30] sm:$0xff]  }
 0x19a   :  { %v1525_v19 = vmax.f32 %v1516_v12, %v1519_v14  ;;  %v3505_v4 = vld [vmem:[%s4642_s5 + $0x38] sm:$0xff]   ;;  %v3506_v10 = vld [vmem:[%s4643_s7] sm:$0xff]   ;;  %v3507_v11 = vld [vmem:[%s4643_s7 + $0x8] sm:$0xff]  }
 0x19b   :  { %v1524_v20 = vmax.f32 %v1515_v17, %v1518_v48  ;;  %v1526_v22 = vmax.f32 %v1517_v13, %v1520_v18  ;;  %v3508_v62 = vld [vmem:[%s4643_s7 + $0x10] sm:$0xff]   ;;  %v3509_v12 = vld [vmem:[%s4643_s7 + $0x18] sm:$0xff]   ;;  %v3510_v13 = vld [vmem:[%s4643_s7 + $0x20] sm:$0xff]  }
 0x19c   :  { %v1528_v23 = vmax.f32 %v1522_v51, %v1525_v19  ;;  %v3480_v51 = vld [vmem:[%s4640_s3 + $0x2a0] ss:$16 sps:$4 sm:$0xff]   ;;  %v3511_v14 = vld [vmem:[%s4643_s7 + $0x28] sm:$0xff]  }
 0x19d   :  { %v1527_v24 = vmax.f32 %v4383_v21, %v1524_v20  ;;  %v4423_v25 = vmax.f32 %v1523_v52, %v1526_v22  ;;  %v3461_v21 = vld [vmem:[%s4640_s3 + $0x22c] ss:$16 sps:$4 sm:$0xff]   ;;  %v3483_v52 = vld [vmem:[%s4640_s3 + $0x2a8] ss:$16 sps:$4 sm:$0xff]   ;;  %v1629_v15 = vld [vmem:[%s4644_s4] sm:$0xf] }
 0x19e   :  { %v1531_v28 = vpack.c.bf16 %v1528_v23, %v1528_v23  ;;  %v1634_v16 = vrot.slane %v1629_v15, %v4342_v60  ;;  %v1642_v17 = vrot.slane %v1629_v15, %v4401_v27  ;;  %v1638_v48 = vrot.slane %v1629_v15, %v4398_v26 }
 0x19f   :  { %v1530_v31 = vpack.c.bf16 %v1527_v24, %v1527_v24  ;;  %v1532_v2 = vpack.c.bf16 %v4423_v25, %v4423_v25  ;;  %v1646_v18 = vrot.slane %v1629_v15, %v4353_v63 }
 0x1a0   :  { %2163 = vmatprep.mubr.bf16.mxu0 %v1531_v28  ;;  %2245 = vmatprep.mubr.bf16.mxu1 %v1531_v28 }
 0x1a1   :  { %2164 = vmatmul.mubr.bf16.vlgmr.msra.gmra.mrb[12].mxu0 %v1530_v31  ;;  %2246 = vmatmul.mubr.bf16.vlgmr.msra.gmra.mrb[12].mxu1 %v1530_v31 }
 0x1a2   :  { %2173 = vmatpush1.bf16.msra.mxu0 %v3450_v29  ;;  %2255 = vmatpush1.bf16.msra.mxu1 %v3453_v30 }
 0x1a3   :  { %2174 = vmatprep.subr.bf16.mxu0 %v3458_v32  ;;  %2256 = vmatprep.subr.bf16.mxu1 %v3461_v21 }
 0x1a4   :  { %2204 = vmatprep.mubr.bf16.mxu0 %v3522_v37  ;;  %2286 = vmatprep.mubr.bf16.mxu1 %v3522_v37  ;;  %v3512_v37 = vld [vmem:[%s4643_s7 + $0x30] sm:$0xff]  }
 0x1a6   :  { %2175 = vmatpush1.bf16.msra.mxu0 %v3456_v33  ;;  %2257 = vmatpush1.bf16.msra.mxu1 %v3459_v34 }
 0x1a7   :  { %2176 = vmatprep.subr.bf16.mxu0 %v3464_v35  ;;  %2258 = vmatprep.subr.bf16.mxu1 %v3467_v36 }
 0x1aa   :  { %2177 = vmatpush1.bf16.msra.mxu0 %v3462_v38  ;;  %2259 = vmatpush1.bf16.msra.mxu1 %v3465_v39  ;;  %v3513_v38 = vld [vmem:[%s4643_s7 + $0x38] sm:$0xff]   ;;  %v3514_v39 = vld [vmem:[%s4645_s9] sm:$0xff]  }
 0x1ab   :  { %2178 = vmatprep.subr.bf16.mxu0 %v3470_v40  ;;  %2260 = vmatprep.subr.bf16.mxu1 %v3473_v41  ;;  %v3515_v40 = vld [vmem:[%s4645_s9 + $0x8] sm:$0xff]   ;;  %v3516_v41 = vld [vmem:[%s4645_s9 + $0x10] sm:$0xff]  }
 0x1ae   :  { %2179 = vmatpush1.bf16.msra.mxu0 %v3468_v42  ;;  %2261 = vmatpush1.bf16.msra.mxu1 %v3471_v43  ;;  %v3517_v42 = vld [vmem:[%s4645_s9 + $0x18] sm:$0xff]   ;;  %v3518_v43 = vld [vmem:[%s4645_s9 + $0x20] sm:$0xff]  }
 0x1af   :  { %2180 = vmatprep.subr.bf16.mxu0 %v3476_v44  ;;  %2262 = vmatprep.subr.bf16.mxu1 %v3479_v45  ;;  %v3519_v44 = vld [vmem:[%s4645_s9 + $0x28] sm:$0xff]   ;;  %v2935_v45 = vld [vmem:[%s4646_s6] ss:$0 sm:$0xff] }
 0x1b2   :  { %2181 = vmatpush1.bf16.msra.mxu0 %v3474_v46  ;;  %2263 = vmatpush1.bf16.msra.mxu1 %v3477_v47 }
 0x1b3   :  { %2182 = vmatprep.subr.bf16.mxu0 %v3482_v49  ;;  %2264 = vmatprep.subr.bf16.mxu1 %v3485_v50 }
 0x1b6   :  { %2183 = vmatpush1.bf16.msra.mxu0 %v3480_v51  ;;  %2265 = vmatpush1.bf16.msra.mxu1 %v3483_v52 }
 0x1b7   :  { %2184 = vmatprep.subr.bf16.mxu0 %v3488_v53  ;;  %2266 = vmatprep.subr.bf16.mxu1 %v3491_v54  ;;  %v3520_v54 = vld [vmem:[%s4645_s9 + $0x30] sm:$0xff]  }
 0x1ba   :  { %2185 = vmatpush1.bf16.msra.mxu0 %v3486_v55  ;;  %2267 = vmatpush1.bf16.msra.mxu1 %v3489_v57  ;;  %v3521_v55 = vld [vmem:[%s4645_s9 + $0x38] sm:$0xff]   ;;  %v2944_v57 = vld [vmem:[%s4647_s8] ss:$0 sm:$0xff] }
 0x1bb   :  { %2186 = vmatprep.subr.bf16.mxu0 %v3494_v58  ;;  %2268 = vmatprep.subr.bf16.mxu1 %v3497_v59 }
 0x1be   :  { %2187 = vmatpush1.bf16.msra.mxu0 %v3492_v61  ;;  %2269 = vmatpush1.bf16.msra.mxu1 %v3495_v0 }
 0x1bf   :  { %2989 = vmatprep.subr.bf16.mxu0 %v3523_v3  ;;  %3009 = vmatprep.subr.bf16.mxu1 %v3523_v3 }
 0x1c1   :  { %2205 = vmatmul.mubr.bf16.vlgmr.msra.gmra.mrb[12].mxu0 %v1532_v2  ;;  %2287 = vmatmul.mubr.bf16.vlgmr.msra.gmra.mrb[12].mxu1 %v1532_v2 }
 0x1c2   :  { %2990 = vmatpush3.bf16.msra.mxu0 %v3498_v1  ;;  %3005 = vmatprep.mubr.msk.bf16.mxu0 %vm3524_vm0, %v3523_v3 }
 0x1c3   :  { %2991 = vmatprep.subr.bf16.mxu0 %v3523_v3  ;;  %3025 = vmatprep.mubr.msk.bf16.mxu1 %vm3524_vm0, %v3523_v3 }
 0x1c4   :  { %3010 = vmatpush3.bf16.msra.mxu1 %v3506_v10 }
 0x1c5   :  { %3011 = vmatprep.subr.bf16.mxu1 %v3523_v3 }
 0x1c6   :  { %2992 = vmatpush3.bf16.msra.mxu0 %v3499_v5 }
 0x1c7   :  { %2993 = vmatprep.subr.bf16.mxu0 %v3523_v3 }
 0x1c8   :  { %3012 = vmatpush3.bf16.msra.mxu1 %v3507_v11 }
 0x1c9   :  { %3013 = vmatprep.subr.bf16.mxu1 %v3523_v3 }
 0x1ca   :  { %2994 = vmatpush3.bf16.msra.mxu0 %v3500_v56 }
 0x1cb   :  { %2995 = vmatprep.subr.bf16.mxu0 %v3523_v3 }
 0x1cc   :  { %3014 = vmatpush3.bf16.msra.mxu1 %v3508_v62 }
 0x1cd   :  { %3015 = vmatprep.subr.bf16.mxu1 %v3523_v3 }
 0x1ce   :  { %2996 = vmatpush3.bf16.msra.mxu0 %v3501_v6 }
 0x1cf   :  { %2997 = vmatprep.subr.bf16.mxu0 %v3523_v3 }
 0x1d0   :  { %3016 = vmatpush3.bf16.msra.mxu1 %v3509_v12 }
 0x1d1   :  { %3017 = vmatprep.subr.bf16.mxu1 %v3523_v3 }
 0x1d2   :  { %2998 = vmatpush3.bf16.msra.mxu0 %v3502_v7 }
 0x1d3   :  { %2999 = vmatprep.subr.bf16.mxu0 %v3523_v3 }
 0x1d4   :  { %3018 = vmatpush3.bf16.msra.mxu1 %v3510_v13 }
 0x1d5   :  { %3019 = vmatprep.subr.bf16.mxu1 %v3523_v3 }
 0x1d6   :  { %3000 = vmatpush3.bf16.msra.mxu0 %v3503_v8 }
 0x1d7   :  { %3001 = vmatprep.subr.bf16.mxu0 %v3523_v3 }
 0x1d8   :  { %3020 = vmatpush3.bf16.msra.mxu1 %v3511_v14 }
 0x1d9   :  { %3021 = vmatprep.subr.bf16.mxu1 %v3523_v3 }
 0x1da   :  { %3002 = vmatpush3.bf16.msra.mxu0 %v3504_v9 }
 0x1db   :  { %3003 = vmatprep.subr.bf16.mxu0 %v3523_v3 }
 0x1dc   :  { %3022 = vmatpush3.bf16.msra.mxu1 %v3512_v37 }
 0x1dd   :  { %3023 = vmatprep.subr.bf16.mxu1 %v3523_v3 }
 0x1de   :  { %3004 = vmatpush3.bf16.msra.mxu0 %v3505_v4 }
 0x1df   :  { %3029 = vmatprep.subr.bf16.mxu0 %v3523_v3 }
 0x1e0   :  { %3024 = vmatpush3.bf16.msra.mxu1 %v3513_v38 }
 0x294   :  { %v2206_v19 = vpop.f32.mrb[12].mxu0  ;;  %v2288_v20 = vpop.f32.mrb[12].mxu1 }
 0x295   :  { %v3049_v22 = vadd.f32 %v2206_v19, %v1634_v16  ;;  %v3051_v23 = vadd.f32 %v2288_v20, %v1642_v17  ;;  %v2208_v24 = vpop.f32.mrb[13].mxu0  ;;  %v2290_v25 = vpop.f32.mrb[13].mxu1 }
 0x296   :  { %v3050_v28 = vadd.f32 %v2208_v24, %v1638_v48  ;;  %v3052_v29 = vadd.f32 %v2290_v25, %v1646_v18  ;;  %v2210_v30 = vpop.f32.mrb[14].mxu0  ;;  %v2292_v31 = vpop.f32.mrb[14].mxu1 }
 0x297   :  { %v2295_v32 = vmax.f32 %v3049_v22, 0.0  ;;  %v2297_v21 = vmax.f32 %v3051_v23, 0.0  ;;  %v2211_v33 = vpop.f32.mrb[15].mxu0  ;;  %v2293_v60 = vpop.f32.mrb[15].mxu1 }
 0x298   :  { %v2296_v34 = vmax.f32 %v3050_v28, 0.0  ;;  %v2298_v27 = vmax.f32 %v3052_v29, 0.0 }
 0x29a   :  { %v2299_v35 = vmax.f32 %v2295_v32, %v2296_v34  ;;  %v2300_v26 = vmax.f32 %v2297_v21, %v2298_v27 }
 0x29c   :  { %v2301_v36 = vmax.f32 %v2299_v35, %v2300_v26 }
 0x29e   :  { %v2302_v63 = vpack.c.bf16 %v2301_v36, %v2301_v36 }
 0x2a0   :  { %3006 = vmatmul.mubr.bf16.vlgmr.msra.gmra.mrb[16].mxu0 %v2302_v63 }
 0x2a1   :  { %3045 = vmatprep.mubr.msk.bf16.mxu0 %vm3524_vm0, %v3523_v3  ;;  %3030 = vmatpush3.bf16.msra.mxu0 %v3514_v39 }
 0x2a2   :  { %3031 = vmatprep.subr.bf16.mxu0 %v3523_v3 }
 0x2a5   :  { %3032 = vmatpush3.bf16.msra.mxu0 %v3515_v40 }
 0x2a6   :  { %3033 = vmatprep.subr.bf16.mxu0 %v3523_v3 }
 0x2a9   :  { %3034 = vmatpush3.bf16.msra.mxu0 %v3516_v41 }
 0x2aa   :  { %3035 = vmatprep.subr.bf16.mxu0 %v3523_v3 }
 0x2ad   :  { %3036 = vmatpush3.bf16.msra.mxu0 %v3517_v42 }
 0x2ae   :  { %3037 = vmatprep.subr.bf16.mxu0 %v3523_v3 }
 0x2b1   :  { %3038 = vmatpush3.bf16.msra.mxu0 %v3518_v43 }
 0x2b2   :  { %3039 = vmatprep.subr.bf16.mxu0 %v3523_v3 }
 0x2b5   :  { %3040 = vmatpush3.bf16.msra.mxu0 %v3519_v44 }
 0x2b6   :  { %3041 = vmatprep.subr.bf16.mxu0 %v3523_v3 }
 0x2b9   :  { %3042 = vmatpush3.bf16.msra.mxu0 %v3520_v54 }
 0x2ba   :  { %3043 = vmatprep.subr.bf16.mxu0 %v3523_v3  ;;  %v2953_v3 = vld [vmem:[%s4648_s10] ss:$0 sm:$0xff] }
 0x2bd   :  { %3044 = vmatpush3.bf16.msra.mxu0 %v3521_v55 }
 0x373   :  { %v2408_v46 = vpop.f32.mrb[16].mxu0 }
 0x374   :  { %v2409_v47 = vadd.f32 %v2935_v45, %v2408_v46  ;;  %v3007_v49 = vpop.f32.mrb[17].mxu0 }
 0x375   :  { %v2411_v50 = vpop.f32.mrb[18].mxu0 }
 0x376   :  { %v2414_v51 = vmax.f32 %v2409_v47, 0.0  ;;  %v3008_v52 = vpop.f32.mrb[19].mxu0 }
 0x378   :  { %v2415_v53 = vpack.c.bf16 %v2414_v51, %v2414_v51 }
 0x37a   :  { %3026 = vmatmul.mubr.bf16.vlgmr.msra.gmra.mrb[16].mxu1 %v2415_v53 }
 0x44d   :  { %v2521_v58 = vpop.f32.mrb[16].mxu1 }
 0x44e   :  { %v2522_v59 = vadd.f32 %v2944_v57, %v2521_v58  ;;  %v3027_v61 = vpop.f32.mrb[17].mxu1 }
 0x44f   :  { %v2524_v0 = vpop.f32.mrb[18].mxu1 }
 0x450   :  { %v2527_v1 = vmax.f32 %v2522_v59, 0.0  ;;  %v3028_v2 = vpop.f32.mrb[19].mxu1 }
 0x452   :  { %v2528_v5 = vpack.c.bf16 %v2527_v1, %v2527_v1 }
 0x454   :  { %3046 = vmatmul.mubr.bf16.vlgmr.msra.gmra.mrb[20].mxu0 %v2528_v5 }
 0x527   :  { %v2634_v56 = vpop.f32.mrb[20].mxu0 }
 0x528   :  { %v2635_v6 = vadd.f32 %v2953_v3, %v2634_v56  ;;  %v3047_v7 = vpop.f32.mrb[21].mxu0 }
 0x529   :  { %v2637_v8 = vpop.f32.mrb[22].mxu0 }
 0x52a   :  { %2640 = vst [vmem:[%s4649_s11] sm:$0xff] %v2635_v6  ;;  %v3048_v9 = vpop.f32.mrb[23].mxu0 }

// kernel: _lambda_.1
= control target key start
LH: loop header
LB: loop body
LE: loop exit
PB: predicated region body
PF: predicated region fallthrough
CT: control target
= control target key end

     0   :  { %vm3524_vm0 = vmmov 0   ;;  %s4638_s1 = inlined_call_operand.vmem [shape: bf16[256,1536], index: 1, kind: input, shape index: {}]   ;;  %s4639_s0 = inlined_call_operand.vmem [shape: bf16[8,256], index: 0, kind: input, shape index: {}]   ;;  %s4640_s3 = inlined_call_operand.vmem [shape: bf16[384,512], index: 3, kind: input, shape index: {}]   ;;  %s4641_s2 = inlined_call_operand.vmem [shape: f32[1,1536], index: 2, kind: input, shape index: {}]   ;;  %s4642_s5 = inlined_call_operand.vmem [shape: bf16[128,128], index: 5, kind: input, shape index: {}]   ;;  %s4643_s7 = inlined_call_operand.vmem [shape: bf16[128,128], index: 7, kind: input, shape index: {}]   ;;  %s4644_s4 = inlined_call_operand.vmem [shape: f32[1,512], index: 4, kind: input, shape index: {}]   ;;  %s4645_s9 = inlined_call_operand.vmem [shape: bf16[128,128], index: 9, kind: input, shape index: {}]   ;;  %s4646_s6 = inlined_call_operand.vmem [shape: f32[1,128], index: 6, kind: input, shape index: {}]   ;;  %s4647_s8 = inlined_call_operand.vmem [shape: f32[1,128], index: 8, kind: input, shape index: {}]   ;;  %s4648_s10 = inlined_call_operand.vmem [shape: f32[1,128], index: 10, kind: input, shape index: {}]   ;;  %s4649_s11 = inlined_call_operand.vmem [shape: f32[8,128], index: 11, kind: output, shape index: {}]  }
   0x1   :  { %v3064_v0 = vld [vmem:[%s4638_s1 + $0x4] ss:$48 sps:$4 sm:$0xff]   ;;  %v3066_v1 = vld [vmem:[%s4638_s1 + $0xc] ss:$48 sps:$4 sm:$0xff]   ;;  %v3068_v2 = vld [vmem:[%s4638_s1] ss:$48 sps:$4 sm:$0xff]  }
   0x2   :  { %1263 = vmatprep.subr.bf16.mxu0 %v3064_v0  ;;  %v3069_v3 = vld [vmem:[%s4638_s1 + $0x8] ss:$48 sps:$4 sm:$0xff]   ;;  %1304 = vmatprep.subr.bf16.mxu1 %v3066_v1  ;;  %v3070_v4 = vld [vmem:[%s4638_s1 + $0x64] ss:$48 sps:$4 sm:$0xff]   ;;  %v3072_v5 = vld [vmem:[%s4638_s1 + $0x6c] ss:$48 sps:$4 sm:$0xff]  }
   0x3   :  { %1264 = vmatpush1.bf16.msra.mxu0 %v3068_v2  ;;  %1305 = vmatpush1.bf16.msra.mxu1 %v3069_v3  ;;  %v3074_v6 = vld [vmem:[%s4638_s1 + $0x60] ss:$48 sps:$4 sm:$0xff]   ;;  %v3075_v7 = vld [vmem:[%s4638_s1 + $0x68] ss:$48 sps:$4 sm:$0xff]   ;;  %v3076_v8 = vld [vmem:[%s4638_s1 + $0xc4] ss:$48 sps:$4 sm:$0xff]  }
   0x4   :  { %1265 = vmatprep.subr.bf16.mxu0 %v3070_v4  ;;  %1306 = vmatprep.subr.bf16.mxu1 %v3072_v5  ;;  %v3078_v9 = vld [vmem:[%s4638_s1 + $0xcc] ss:$48 sps:$4 sm:$0xff]   ;;  %v3080_v10 = vld [vmem:[%s4638_s1 + $0xc0] ss:$48 sps:$4 sm:$0xff]   ;;  %v3081_v11 = vld [vmem:[%s4638_s1 + $0xc8] ss:$48 sps:$4 sm:$0xff]  }
   0x5   :  { %v3082_v12 = vld [vmem:[%s4638_s1 + $0x124] ss:$48 sps:$4 sm:$0xff]   ;;  %v3084_v13 = vld [vmem:[%s4638_s1 + $0x12c] ss:$48 sps:$4 sm:$0xff]   ;;  %v3086_v14 = vld [vmem:[%s4638_s1 + $0x120] ss:$48 sps:$4 sm:$0xff]  }
   0x6   :  { %v3087_v15 = vld [vmem:[%s4638_s1 + $0x128] ss:$48 sps:$4 sm:$0xff]   ;;  %v3088_v16 = vld [vmem:[%s4638_s1 + $0x184] ss:$48 sps:$4 sm:$0xff]   ;;  %v3090_v17 = vld [vmem:[%s4638_s1 + $0x18c] ss:$48 sps:$4 sm:$0xff]  }
   0x7   :  { %1266 = vmatpush1.bf16.msra.mxu0 %v3074_v6  ;;  %1307 = vmatpush1.bf16.msra.mxu1 %v3075_v7  ;;  %v3092_v18 = vld [vmem:[%s4638_s1 + $0x180] ss:$48 sps:$4 sm:$0xff]   ;;  %v3093_v19 = vld [vmem:[%s4638_s1 + $0x188] ss:$48 sps:$4 sm:$0xff]   ;;  %v3094_v20 = vld [vmem:[%s4638_s1 + $0x1e4] ss:$48 sps:$4 sm:$0xff]  }
   0x8   :  { %1267 = vmatprep.subr.bf16.mxu0 %v3076_v8  ;;  %1308 = vmatprep.subr.bf16.mxu1 %v3078_v9  ;;  %v3096_v21 = vld [vmem:[%s4638_s1 + $0x1ec] ss:$48 sps:$4 sm:$0xff]   ;;  %v3098_v22 = vld [vmem:[%s4638_s1 + $0x1e0] ss:$48 sps:$4 sm:$0xff]   ;;  %v3099_v23 = vld [vmem:[%s4638_s1 + $0x1e8] ss:$48 sps:$4 sm:$0xff]  }
   0x9   :  { %v3100_v24 = vld [vmem:[%s4638_s1 + $0x244] ss:$48 sps:$4 sm:$0xff]   ;;  %v3102_v25 = vld [vmem:[%s4638_s1 + $0x24c] ss:$48 sps:$4 sm:$0xff]   ;;  %v3104_v26 = vld [vmem:[%s4638_s1 + $0x240] ss:$48 sps:$4 sm:$0xff]  }
   0xa   :  { %v3105_v27 = vld [vmem:[%s4638_s1 + $0x248] ss:$48 sps:$4 sm:$0xff]   ;;  %v3106_v28 = vld [vmem:[%s4638_s1 + $0x2a4] ss:$48 sps:$4 sm:$0xff]   ;;  %v3108_v29 = vld [vmem:[%s4638_s1 + $0x2ac] ss:$48 sps:$4 sm:$0xff]  }
   0xb   :  { %1268 = vmatpush1.bf16.msra.mxu0 %v3080_v10  ;;  %1309 = vmatpush1.bf16.msra.mxu1 %v3081_v11  ;;  %v3110_v30 = vld [vmem:[%s4638_s1 + $0x2a0] ss:$48 sps:$4 sm:$0xff]   ;;  %v3111_v31 = vld [vmem:[%s4638_s1 + $0x2a8] ss:$48 sps:$4 sm:$0xff]   ;;  %v3112_v32 = vld [vmem:[%s4638_s1 + $0x304] ss:$48 sps:$4 sm:$0xff]  }
   0xc   :  { %1269 = vmatprep.subr.bf16.mxu0 %v3082_v12  ;;  %1310 = vmatprep.subr.bf16.mxu1 %v3084_v13  ;;  %v3114_v33 = vld [vmem:[%s4638_s1 + $0x30c] ss:$48 sps:$4 sm:$0xff]   ;;  %v3116_v34 = vld [vmem:[%s4638_s1 + $0x300] ss:$48 sps:$4 sm:$0xff]   ;;  %v3117_v35 = vld [vmem:[%s4638_s1 + $0x308] ss:$48 sps:$4 sm:$0xff]  }
   0xd   :  { %v3118_v36 = vld [vmem:[%s4638_s1 + $0x364] ss:$48 sps:$4 sm:$0xff]   ;;  %v3120_v37 = vld [vmem:[%s4638_s1 + $0x36c] ss:$48 sps:$4 sm:$0xff]   ;;  %v3122_v38 = vld [vmem:[%s4638_s1 + $0x360] ss:$48 sps:$4 sm:$0xff]  }
   0xe   :  { %v3123_v39 = vld [vmem:[%s4638_s1 + $0x368] ss:$48 sps:$4 sm:$0xff]   ;;  %v3124_v40 = vld [vmem:[%s4638_s1 + $0x3c4] ss:$48 sps:$4 sm:$0xff]   ;;  %v3126_v41 = vld [vmem:[%s4638_s1 + $0x3cc] ss:$48 sps:$4 sm:$0xff]  }
   0xf   :  { %1270 = vmatpush1.bf16.msra.mxu0 %v3086_v14  ;;  %1311 = vmatpush1.bf16.msra.mxu1 %v3087_v15  ;;  %v3128_v42 = vld [vmem:[%s4638_s1 + $0x3c0] ss:$48 sps:$4 sm:$0xff]   ;;  %v3129_v43 = vld [vmem:[%s4638_s1 + $0x3c8] ss:$48 sps:$4 sm:$0xff]   ;;  %v3130_v44 = vld [vmem:[%s4638_s1 + $0x424] ss:$48 sps:$4 sm:$0xff]  }
  0x10   :  { %1271 = vmatprep.subr.bf16.mxu0 %v3088_v16  ;;  %1312 = vmatprep.subr.bf16.mxu1 %v3090_v17  ;;  %v3132_v45 = vld [vmem:[%s4638_s1 + $0x42c] ss:$48 sps:$4 sm:$0xff]   ;;  %v39_v46 = vld [vmem:[%s4639_s0] sm:$0xff]  ;;  %v3135_v49 = vld [vmem:[%s4638_s1 + $0x428] ss:$48 sps:$4 sm:$0xff]  }
  0x11   :  { %v3134_v47 = vld [vmem:[%s4638_s1 + $0x420] ss:$48 sps:$4 sm:$0xff]   ;;  %v3729_v48 = vcombine.high %v39_v46, %v39_v46  ;;  %v3136_v50 = vld [vmem:[%s4638_s1 + $0x484] ss:$48 sps:$4 sm:$0xff]   ;;  %v3138_v51 = vld [vmem:[%s4638_s1 + $0x48c] ss:$48 sps:$4 sm:$0xff]   ;;  %v3790_v4 = vcombine.low %v39_v46, %v39_v46 }
  0x12   :  { %v3140_v52 = vld [vmem:[%s4638_s1 + $0x480] ss:$48 sps:$4 sm:$0xff]   ;;  %v3141_v53 = vld [vmem:[%s4638_s1 + $0x488] ss:$48 sps:$4 sm:$0xff]   ;;  %v3142_v54 = vld [vmem:[%s4638_s1 + $0x4e4] ss:$48 sps:$4 sm:$0xff]  }
  0x13   :  { %1272 = vmatpush1.bf16.msra.mxu0 %v3092_v18  ;;  %1313 = vmatpush1.bf16.msra.mxu1 %v3093_v19  ;;  %v3144_v55 = vld [vmem:[%s4638_s1 + $0x4ec] ss:$48 sps:$4 sm:$0xff]   ;;  %v3146_v56 = vld [vmem:[%s4638_s1 + $0x4e0] ss:$48 sps:$4 sm:$0xff]   ;;  %v3147_v57 = vld [vmem:[%s4638_s1 + $0x4e8] ss:$48 sps:$4 sm:$0xff]  }
  0x14   :  { %1273 = vmatprep.subr.bf16.mxu0 %v3094_v20  ;;  %1314 = vmatprep.subr.bf16.mxu1 %v3096_v21  ;;  %v3148_v58 = vld [vmem:[%s4638_s1 + $0x544] ss:$48 sps:$4 sm:$0xff]   ;;  %v3150_v59 = vld [vmem:[%s4638_s1 + $0x54c] ss:$48 sps:$4 sm:$0xff]   ;;  %v3152_v60 = vld [vmem:[%s4638_s1 + $0x540] ss:$48 sps:$4 sm:$0xff]  }
  0x15   :  { %1295 = vmatprep.mubr.bf16.mxu0 %v3729_v48  ;;  %1336 = vmatprep.mubr.bf16.mxu1 %v3729_v48  ;;  %v3153_v61 = vld [vmem:[%s4638_s1 + $0x548] ss:$48 sps:$4 sm:$0xff]   ;;  %v3154_v62 = vld [vmem:[%s4638_s1 + $0x5a4] ss:$48 sps:$4 sm:$0xff]   ;;  %v3156_v63 = vld [vmem:[%s4638_s1 + $0x5ac] ss:$48 sps:$4 sm:$0xff]  }
  0x16   :  { %v3158_v0 = vld [vmem:[%s4638_s1 + $0x5a0] ss:$48 sps:$4 sm:$0xff]   ;;  %v3159_v1 = vld [vmem:[%s4638_s1 + $0x5a8] ss:$48 sps:$4 sm:$0xff]   ;;  %v3164_v2 = vld [vmem:[%s4638_s1 + $0x14] ss:$48 sps:$4 sm:$0xff]  }
  0x17   :  { %1274 = vmatpush1.bf16.msra.mxu0 %v3098_v22  ;;  %1315 = vmatpush1.bf16.msra.mxu1 %v3099_v23  ;;  %v3167_v3 = vld [vmem:[%s4638_s1 + $0x1c] ss:$48 sps:$4 sm:$0xff]   ;;  %v3162_v5 = vld [vmem:[%s4638_s1 + $0x10] ss:$48 sps:$4 sm:$0xff]   ;;  %v3165_v6 = vld [vmem:[%s4638_s1 + $0x18] ss:$48 sps:$4 sm:$0xff]  }
  0x18   :  { %1275 = vmatprep.subr.bf16.mxu0 %v3100_v24  ;;  %1316 = vmatprep.subr.bf16.mxu1 %v3102_v25  ;;  %v3170_v7 = vld [vmem:[%s4638_s1 + $0x74] ss:$48 sps:$4 sm:$0xff]   ;;  %v3173_v8 = vld [vmem:[%s4638_s1 + $0x7c] ss:$48 sps:$4 sm:$0xff]   ;;  %v3168_v9 = vld [vmem:[%s4638_s1 + $0x70] ss:$48 sps:$4 sm:$0xff]  }
  0x19   :  { %v3171_v10 = vld [vmem:[%s4638_s1 + $0x78] ss:$48 sps:$4 sm:$0xff]   ;;  %v3176_v11 = vld [vmem:[%s4638_s1 + $0xd4] ss:$48 sps:$4 sm:$0xff]   ;;  %v3179_v12 = vld [vmem:[%s4638_s1 + $0xdc] ss:$48 sps:$4 sm:$0xff]  }
  0x1a   :  { %v3174_v13 = vld [vmem:[%s4638_s1 + $0xd0] ss:$48 sps:$4 sm:$0xff]   ;;  %v3177_v14 = vld [vmem:[%s4638_s1 + $0xd8] ss:$48 sps:$4 sm:$0xff]   ;;  %v3182_v15 = vld [vmem:[%s4638_s1 + $0x134] ss:$48 sps:$4 sm:$0xff]  }
  0x1b   :  { %1276 = vmatpush1.bf16.msra.mxu0 %v3104_v26  ;;  %1317 = vmatpush1.bf16.msra.mxu1 %v3105_v27  ;;  %v3185_v16 = vld [vmem:[%s4638_s1 + $0x13c] ss:$48 sps:$4 sm:$0xff]   ;;  %v3180_v17 = vld [vmem:[%s4638_s1 + $0x130] ss:$48 sps:$4 sm:$0xff]   ;;  %v3183_v18 = vld [vmem:[%s4638_s1 + $0x138] ss:$48 sps:$4 sm:$0xff]  }
  0x1c   :  { %1277 = vmatprep.subr.bf16.mxu0 %v3106_v28  ;;  %1318 = vmatprep.subr.bf16.mxu1 %v3108_v29  ;;  %v3188_v19 = vld [vmem:[%s4638_s1 + $0x194] ss:$48 sps:$4 sm:$0xff]   ;;  %v3191_v20 = vld [vmem:[%s4638_s1 + $0x19c] ss:$48 sps:$4 sm:$0xff]   ;;  %v3186_v21 = vld [vmem:[%s4638_s1 + $0x190] ss:$48 sps:$4 sm:$0xff]  }
  0x1d   :  { %v3189_v22 = vld [vmem:[%s4638_s1 + $0x198] ss:$48 sps:$4 sm:$0xff]   ;;  %v3194_v23 = vld [vmem:[%s4638_s1 + $0x1f4] ss:$48 sps:$4 sm:$0xff]   ;;  %v3197_v24 = vld [vmem:[%s4638_s1 + $0x1fc] ss:$48 sps:$4 sm:$0xff]  }
  0x1e   :  { %v3192_v25 = vld [vmem:[%s4638_s1 + $0x1f0] ss:$48 sps:$4 sm:$0xff]   ;;  %v3195_v26 = vld [vmem:[%s4638_s1 + $0x1f8] ss:$48 sps:$4 sm:$0xff]   ;;  %v3200_v27 = vld [vmem:[%s4638_s1 + $0x254] ss:$48 sps:$4 sm:$0xff]  }
  0x1f   :  { %1278 = vmatpush1.bf16.msra.mxu0 %v3110_v30  ;;  %1319 = vmatpush1.bf16.msra.mxu1 %v3111_v31  ;;  %v3203_v28 = vld [vmem:[%s4638_s1 + $0x25c] ss:$48 sps:$4 sm:$0xff]   ;;  %v3198_v29 = vld [vmem:[%s4638_s1 + $0x250] ss:$48 sps:$4 sm:$0xff]   ;;  %v3201_v30 = vld [vmem:[%s4638_s1 + $0x258] ss:$48 sps:$4 sm:$0xff]  }
  0x20   :  { %1279 = vmatprep.subr.bf16.mxu0 %v3112_v32  ;;  %1320 = vmatprep.subr.bf16.mxu1 %v3114_v33  ;;  %v3206_v31 = vld [vmem:[%s4638_s1 + $0x2b4] ss:$48 sps:$4 sm:$0xff]   ;;  %v3209_v32 = vld [vmem:[%s4638_s1 + $0x2bc] ss:$48 sps:$4 sm:$0xff]   ;;  %v3204_v33 = vld [vmem:[%s4638_s1 + $0x2b0] ss:$48 sps:$4 sm:$0xff]  }
  0x21   :  { %v3225_v46 = vld [vmem:[%s4638_s1 + $0x3d8] ss:$48 sps:$4 sm:$0xff]  }
  0x23   :  { %1280 = vmatpush1.bf16.msra.mxu0 %v3116_v34  ;;  %1321 = vmatpush1.bf16.msra.mxu1 %v3117_v35  ;;  %v3207_v34 = vld [vmem:[%s4638_s1 + $0x2b8] ss:$48 sps:$4 sm:$0xff]   ;;  %v3212_v35 = vld [vmem:[%s4638_s1 + $0x314] ss:$48 sps:$4 sm:$0xff]  }
  0x24   :  { %1281 = vmatprep.subr.bf16.mxu0 %v3118_v36  ;;  %1322 = vmatprep.subr.bf16.mxu1 %v3120_v37  ;;  %v3215_v36 = vld [vmem:[%s4638_s1 + $0x31c] ss:$48 sps:$4 sm:$0xff]   ;;  %v3210_v37 = vld [vmem:[%s4638_s1 + $0x310] ss:$48 sps:$4 sm:$0xff]  }
  0x27   :  { %1282 = vmatpush1.bf16.msra.mxu0 %v3122_v38  ;;  %1323 = vmatpush1.bf16.msra.mxu1 %v3123_v39  ;;  %v3213_v38 = vld [vmem:[%s4638_s1 + $0x318] ss:$48 sps:$4 sm:$0xff]   ;;  %v3218_v39 = vld [vmem:[%s4638_s1 + $0x374] ss:$48 sps:$4 sm:$0xff]  }
  0x28   :  { %1283 = vmatprep.subr.bf16.mxu0 %v3124_v40  ;;  %1324 = vmatprep.subr.bf16.mxu1 %v3126_v41  ;;  %v3221_v40 = vld [vmem:[%s4638_s1 + $0x37c] ss:$48 sps:$4 sm:$0xff]   ;;  %v3216_v41 = vld [vmem:[%s4638_s1 + $0x370] ss:$48 sps:$4 sm:$0xff]  }
  0x2b   :  { %1284 = vmatpush1.bf16.msra.mxu0 %v3128_v42  ;;  %1325 = vmatpush1.bf16.msra.mxu1 %v3129_v43  ;;  %v3219_v42 = vld [vmem:[%s4638_s1 + $0x378] ss:$48 sps:$4 sm:$0xff]   ;;  %v3224_v43 = vld [vmem:[%s4638_s1 + $0x3d4] ss:$48 sps:$4 sm:$0xff]  }
  0x2c   :  { %1285 = vmatprep.subr.bf16.mxu0 %v3130_v44  ;;  %1326 = vmatprep.subr.bf16.mxu1 %v3132_v45  ;;  %v3227_v44 = vld [vmem:[%s4638_s1 + $0x3dc] ss:$48 sps:$4 sm:$0xff]   ;;  %v3222_v45 = vld [vmem:[%s4638_s1 + $0x3d0] ss:$48 sps:$4 sm:$0xff]  }
  0x2f   :  { %1286 = vmatpush1.bf16.msra.mxu0 %v3134_v47  ;;  %1327 = vmatpush1.bf16.msra.mxu1 %v3135_v49  ;;  %v3230_v47 = vld [vmem:[%s4638_s1 + $0x434] ss:$48 sps:$4 sm:$0xff]   ;;  %v3233_v49 = vld [vmem:[%s4638_s1 + $0x43c] ss:$48 sps:$4 sm:$0xff]  }
  0x30   :  { %1287 = vmatprep.subr.bf16.mxu0 %v3136_v50  ;;  %1328 = vmatprep.subr.bf16.mxu1 %v3138_v51  ;;  %v3228_v50 = vld [vmem:[%s4638_s1 + $0x430] ss:$48 sps:$4 sm:$0xff]   ;;  %v3231_v51 = vld [vmem:[%s4638_s1 + $0x438] ss:$48 sps:$4 sm:$0xff]  }
  0x33   :  { %1288 = vmatpush1.bf16.msra.mxu0 %v3140_v52  ;;  %1329 = vmatpush1.bf16.msra.mxu1 %v3141_v53  ;;  %v3236_v52 = vld [vmem:[%s4638_s1 + $0x494] ss:$48 sps:$4 sm:$0xff]   ;;  %v3239_v53 = vld [vmem:[%s4638_s1 + $0x49c] ss:$48 sps:$4 sm:$0xff]  }
  0x34   :  { %1289 = vmatprep.subr.bf16.mxu0 %v3142_v54  ;;  %1330 = vmatprep.subr.bf16.mxu1 %v3144_v55  ;;  %v3234_v54 = vld [vmem:[%s4638_s1 + $0x490] ss:$48 sps:$4 sm:$0xff]   ;;  %v3237_v55 = vld [vmem:[%s4638_s1 + $0x498] ss:$48 sps:$4 sm:$0xff]  }
  0x37   :  { %1290 = vmatpush1.bf16.msra.mxu0 %v3146_v56  ;;  %1331 = vmatpush1.bf16.msra.mxu1 %v3147_v57  ;;  %v3242_v56 = vld [vmem:[%s4638_s1 + $0x4f4] ss:$48 sps:$4 sm:$0xff]   ;;  %v3245_v57 = vld [vmem:[%s4638_s1 + $0x4fc] ss:$48 sps:$4 sm:$0xff]  }
  0x38   :  { %1291 = vmatprep.subr.bf16.mxu0 %v3148_v58  ;;  %1332 = vmatprep.subr.bf16.mxu1 %v3150_v59  ;;  %v3240_v58 = vld [vmem:[%s4638_s1 + $0x4f0] ss:$48 sps:$4 sm:$0xff]   ;;  %v3243_v59 = vld [vmem:[%s4638_s1 + $0x4f8] ss:$48 sps:$4 sm:$0xff]  }
  0x3b   :  { %1292 = vmatpush1.bf16.msra.mxu0 %v3152_v60  ;;  %1333 = vmatpush1.bf16.msra.mxu1 %v3153_v61  ;;  %v3248_v60 = vld [vmem:[%s4638_s1 + $0x554] ss:$48 sps:$4 sm:$0xff]   ;;  %v3251_v61 = vld [vmem:[%s4638_s1 + $0x55c] ss:$48 sps:$4 sm:$0xff]  }
  0x3c   :  { %1293 = vmatprep.subr.bf16.mxu0 %v3154_v62  ;;  %1334 = vmatprep.subr.bf16.mxu1 %v3156_v63  ;;  %v3246_v62 = vld [vmem:[%s4638_s1 + $0x550] ss:$48 sps:$4 sm:$0xff]   ;;  %v3249_v63 = vld [vmem:[%s4638_s1 + $0x558] ss:$48 sps:$4 sm:$0xff]  }
  0x3f   :  { %1294 = vmatpush1.bf16.msra.mxu0 %v3158_v0  ;;  %1335 = vmatpush1.bf16.msra.mxu1 %v3159_v1  ;;  %v3254_v0 = vld [vmem:[%s4638_s1 + $0x5b4] ss:$48 sps:$4 sm:$0xff]   ;;  %v3257_v1 = vld [vmem:[%s4638_s1 + $0x5bc] ss:$48 sps:$4 sm:$0xff]  }
  0x40   :  { %1345 = vmatprep.subr.bf16.mxu0 %v3164_v2  ;;  %1386 = vmatprep.subr.bf16.mxu1 %v3167_v3  ;;  %v3252_v2 = vld [vmem:[%s4638_s1 + $0x5b0] ss:$48 sps:$4 sm:$0xff]   ;;  %v3255_v3 = vld [vmem:[%s4638_s1 + $0x5b8] ss:$48 sps:$4 sm:$0xff]  }
  0x42   :  { %1296 = vmatmul.mubr.bf16.vlgmr.msra.gmra.mrb[0].mxu0 %v3790_v4  ;;  %1337 = vmatmul.mubr.bf16.vlgmr.msra.gmra.mrb[0].mxu1 %v3790_v4 }
  0x43   :  { %1346 = vmatpush1.bf16.msra.mxu0 %v3162_v5  ;;  %1387 = vmatpush1.bf16.msra.mxu1 %v3165_v6  ;;  %v3260_v5 = vld [vmem:[%s4638_s1 + $0x24] ss:$48 sps:$4 sm:$0xff]   ;;  %v3263_v6 = vld [vmem:[%s4638_s1 + $0x2c] ss:$48 sps:$4 sm:$0xff]  }
  0x44   :  { %1347 = vmatprep.subr.bf16.mxu0 %v3170_v7  ;;  %1388 = vmatprep.subr.bf16.mxu1 %v3173_v8  ;;  %v3258_v7 = vld [vmem:[%s4638_s1 + $0x20] ss:$48 sps:$4 sm:$0xff]   ;;  %v3261_v8 = vld [vmem:[%s4638_s1 + $0x28] ss:$48 sps:$4 sm:$0xff]  }
  0x45   :  { %1377 = vmatprep.mubr.bf16.mxu0 %v3729_v48  ;;  %1418 = vmatprep.mubr.bf16.mxu1 %v3729_v48 }
  0x47   :  { %1348 = vmatpush1.bf16.msra.mxu0 %v3168_v9  ;;  %1389 = vmatpush1.bf16.msra.mxu1 %v3171_v10  ;;  %v3266_v9 = vld [vmem:[%s4638_s1 + $0x84] ss:$48 sps:$4 sm:$0xff]   ;;  %v3269_v10 = vld [vmem:[%s4638_s1 + $0x8c] ss:$48 sps:$4 sm:$0xff]  }
  0x48   :  { %1349 = vmatprep.subr.bf16.mxu0 %v3176_v11  ;;  %1390 = vmatprep.subr.bf16.mxu1 %v3179_v12  ;;  %v3264_v11 = vld [vmem:[%s4638_s1 + $0x80] ss:$48 sps:$4 sm:$0xff]   ;;  %v3267_v12 = vld [vmem:[%s4638_s1 + $0x88] ss:$48 sps:$4 sm:$0xff]  }
  0x4b   :  { %1350 = vmatpush1.bf16.msra.mxu0 %v3174_v13  ;;  %1391 = vmatpush1.bf16.msra.mxu1 %v3177_v14  ;;  %v3272_v13 = vld [vmem:[%s4638_s1 + $0xe4] ss:$48 sps:$4 sm:$0xff]   ;;  %v3275_v14 = vld [vmem:[%s4638_s1 + $0xec] ss:$48 sps:$4 sm:$0xff]  }
  0x4c   :  { %1351 = vmatprep.subr.bf16.mxu0 %v3182_v15  ;;  %1392 = vmatprep.subr.bf16.mxu1 %v3185_v16  ;;  %v3270_v15 = vld [vmem:[%s4638_s1 + $0xe0] ss:$48 sps:$4 sm:$0xff]   ;;  %v3273_v16 = vld [vmem:[%s4638_s1 + $0xe8] ss:$48 sps:$4 sm:$0xff]  }
  0x4f   :  { %1352 = vmatpush1.bf16.msra.mxu0 %v3180_v17  ;;  %1393 = vmatpush1.bf16.msra.mxu1 %v3183_v18  ;;  %v3278_v17 = vld [vmem:[%s4638_s1 + $0x144] ss:$48 sps:$4 sm:$0xff]   ;;  %v3276_v18 = vld [vmem:[%s4638_s1 + $0x140] ss:$48 sps:$4 sm:$0xff]  }
  0x50   :  { %1353 = vmatprep.subr.bf16.mxu0 %v3188_v19  ;;  %1394 = vmatprep.subr.bf16.mxu1 %v3191_v20  ;;  %v3279_v19 = vld [vmem:[%s4638_s1 + $0x148] ss:$48 sps:$4 sm:$0xff]   ;;  %v3284_v20 = vld [vmem:[%s4638_s1 + $0x1a4] ss:$48 sps:$4 sm:$0xff]  }
  0x53   :  { %1354 = vmatpush1.bf16.msra.mxu0 %v3186_v21  ;;  %1395 = vmatpush1.bf16.msra.mxu1 %v3189_v22  ;;  %v3287_v21 = vld [vmem:[%s4638_s1 + $0x1ac] ss:$48 sps:$4 sm:$0xff]   ;;  %v3282_v22 = vld [vmem:[%s4638_s1 + $0x1a0] ss:$48 sps:$4 sm:$0xff]  }
  0x54   :  { %1355 = vmatprep.subr.bf16.mxu0 %v3194_v23  ;;  %1396 = vmatprep.subr.bf16.mxu1 %v3197_v24  ;;  %v3285_v23 = vld [vmem:[%s4638_s1 + $0x1a8] ss:$48 sps:$4 sm:$0xff]   ;;  %v3290_v24 = vld [vmem:[%s4638_s1 + $0x204] ss:$48 sps:$4 sm:$0xff]  }
  0x57   :  { %1356 = vmatpush1.bf16.msra.mxu0 %v3192_v25  ;;  %1397 = vmatpush1.bf16.msra.mxu1 %v3195_v26  ;;  %v3293_v25 = vld [vmem:[%s4638_s1 + $0x20c] ss:$48 sps:$4 sm:$0xff]   ;;  %v3288_v26 = vld [vmem:[%s4638_s1 + $0x200] ss:$48 sps:$4 sm:$0xff]  }
  0x58   :  { %1357 = vmatprep.subr.bf16.mxu0 %v3200_v27  ;;  %1398 = vmatprep.subr.bf16.mxu1 %v3203_v28  ;;  %v3291_v27 = vld [vmem:[%s4638_s1 + $0x208] ss:$48 sps:$4 sm:$0xff]   ;;  %v3296_v28 = vld [vmem:[%s4638_s1 + $0x264] ss:$48 sps:$4 sm:$0xff]  }
  0x5b   :  { %1358 = vmatpush1.bf16.msra.mxu0 %v3198_v29  ;;  %1399 = vmatpush1.bf16.msra.mxu1 %v3201_v30  ;;  %v3299_v29 = vld [vmem:[%s4638_s1 + $0x26c] ss:$48 sps:$4 sm:$0xff]   ;;  %v3294_v30 = vld [vmem:[%s4638_s1 + $0x260] ss:$48 sps:$4 sm:$0xff]  }
  0x5c   :  { %1359 = vmatprep.subr.bf16.mxu0 %v3206_v31  ;;  %1400 = vmatprep.subr.bf16.mxu1 %v3209_v32  ;;  %v3297_v31 = vld [vmem:[%s4638_s1 + $0x268] ss:$48 sps:$4 sm:$0xff]   ;;  %v3302_v32 = vld [vmem:[%s4638_s1 + $0x2c4] ss:$48 sps:$4 sm:$0xff]  }
  0x5f   :  { %1360 = vmatpush1.bf16.msra.mxu0 %v3204_v33  ;;  %1401 = vmatpush1.bf16.msra.mxu1 %v3207_v34  ;;  %v3305_v33 = vld [vmem:[%s4638_s1 + $0x2cc] ss:$48 sps:$4 sm:$0xff]   ;;  %v3300_v34 = vld [vmem:[%s4638_s1 + $0x2c0] ss:$48 sps:$4 sm:$0xff]  }
  0x60   :  { %1361 = vmatprep.subr.bf16.mxu0 %v3212_v35  ;;  %1402 = vmatprep.subr.bf16.mxu1 %v3215_v36  ;;  %v3303_v35 = vld [vmem:[%s4638_s1 + $0x2c8] ss:$48 sps:$4 sm:$0xff]   ;;  %v3308_v36 = vld [vmem:[%s4638_s1 + $0x324] ss:$48 sps:$4 sm:$0xff]  }
  0x63   :  { %1362 = vmatpush1.bf16.msra.mxu0 %v3210_v37  ;;  %1403 = vmatpush1.bf16.msra.mxu1 %v3213_v38  ;;  %v3311_v37 = vld [vmem:[%s4638_s1 + $0x32c] ss:$48 sps:$4 sm:$0xff]   ;;  %v3306_v38 = vld [vmem:[%s4638_s1 + $0x320] ss:$48 sps:$4 sm:$0xff]  }
  0x64   :  { %1363 = vmatprep.subr.bf16.mxu0 %v3218_v39  ;;  %1404 = vmatprep.subr.bf16.mxu1 %v3221_v40  ;;  %v3309_v39 = vld [vmem:[%s4638_s1 + $0x328] ss:$48 sps:$4 sm:$0xff]   ;;  %v3314_v40 = vld [vmem:[%s4638_s1 + $0x384] ss:$48 sps:$4 sm:$0xff]  }
  0x67   :  { %1364 = vmatpush1.bf16.msra.mxu0 %v3216_v41  ;;  %1405 = vmatpush1.bf16.msra.mxu1 %v3219_v42  ;;  %v3317_v41 = vld [vmem:[%s4638_s1 + $0x38c] ss:$48 sps:$4 sm:$0xff]   ;;  %v3312_v42 = vld [vmem:[%s4638_s1 + $0x380] ss:$48 sps:$4 sm:$0xff]  }
  0x68   :  { %1365 = vmatprep.subr.bf16.mxu0 %v3224_v43  ;;  %1406 = vmatprep.subr.bf16.mxu1 %v3227_v44  ;;  %v3315_v43 = vld [vmem:[%s4638_s1 + $0x388] ss:$48 sps:$4 sm:$0xff]   ;;  %v3320_v44 = vld [vmem:[%s4638_s1 + $0x3e4] ss:$48 sps:$4 sm:$0xff]  }
  0x6b   :  { %1366 = vmatpush1.bf16.msra.mxu0 %v3222_v45  ;;  %1407 = vmatpush1.bf16.msra.mxu1 %v3225_v46  ;;  %v3323_v45 = vld [vmem:[%s4638_s1 + $0x3ec] ss:$48 sps:$4 sm:$0xff]   ;;  %v3318_v46 = vld [vmem:[%s4638_s1 + $0x3e0] ss:$48 sps:$4 sm:$0xff]  }
  0x6c   :  { %1367 = vmatprep.subr.bf16.mxu0 %v3230_v47  ;;  %1408 = vmatprep.subr.bf16.mxu1 %v3233_v49  ;;  %v3321_v47 = vld [vmem:[%s4638_s1 + $0x3e8] ss:$48 sps:$4 sm:$0xff]   ;;  %v3326_v49 = vld [vmem:[%s4638_s1 + $0x444] ss:$48 sps:$4 sm:$0xff]  }
  0x6f   :  { %1368 = vmatpush1.bf16.msra.mxu0 %v3228_v50  ;;  %1409 = vmatpush1.bf16.msra.mxu1 %v3231_v51  ;;  %v3329_v50 = vld [vmem:[%s4638_s1 + $0x44c] ss:$48 sps:$4 sm:$0xff]   ;;  %v3324_v51 = vld [vmem:[%s4638_s1 + $0x440] ss:$48 sps:$4 sm:$0xff]  }
  0x70   :  { %1369 = vmatprep.subr.bf16.mxu0 %v3236_v52  ;;  %1410 = vmatprep.subr.bf16.mxu1 %v3239_v53  ;;  %v3327_v52 = vld [vmem:[%s4638_s1 + $0x448] ss:$48 sps:$4 sm:$0xff]   ;;  %v3332_v53 = vld [vmem:[%s4638_s1 + $0x4a4] ss:$48 sps:$4 sm:$0xff]  }
  0x73   :  { %1370 = vmatpush1.bf16.msra.mxu0 %v3234_v54  ;;  %1411 = vmatpush1.bf16.msra.mxu1 %v3237_v55  ;;  %v3335_v54 = vld [vmem:[%s4638_s1 + $0x4ac] ss:$48 sps:$4 sm:$0xff]   ;;  %v3330_v55 = vld [vmem:[%s4638_s1 + $0x4a0] ss:$48 sps:$4 sm:$0xff]  }
  0x74   :  { %1371 = vmatprep.subr.bf16.mxu0 %v3242_v56  ;;  %1412 = vmatprep.subr.bf16.mxu1 %v3245_v57  ;;  %v3333_v56 = vld [vmem:[%s4638_s1 + $0x4a8] ss:$48 sps:$4 sm:$0xff]   ;;  %v3338_v57 = vld [vmem:[%s4638_s1 + $0x504] ss:$48 sps:$4 sm:$0xff]  }
  0x77   :  { %1372 = vmatpush1.bf16.msra.mxu0 %v3240_v58  ;;  %1413 = vmatpush1.bf16.msra.mxu1 %v3243_v59  ;;  %v3341_v58 = vld [vmem:[%s4638_s1 + $0x50c] ss:$48 sps:$4 sm:$0xff]   ;;  %v3336_v59 = vld [vmem:[%s4638_s1 + $0x500] ss:$48 sps:$4 sm:$0xff]  }
  0x78   :  { %1373 = vmatprep.subr.bf16.mxu0 %v3248_v60  ;;  %1414 = vmatprep.subr.bf16.mxu1 %v3251_v61  ;;  %v3339_v60 = vld [vmem:[%s4638_s1 + $0x508] ss:$48 sps:$4 sm:$0xff]   ;;  %v3344_v61 = vld [vmem:[%s4638_s1 + $0x564] ss:$48 sps:$4 sm:$0xff]  }
  0x7b   :  { %1374 = vmatpush1.bf16.msra.mxu0 %v3246_v62  ;;  %1415 = vmatpush1.bf16.msra.mxu1 %v3249_v63  ;;  %v3347_v62 = vld [vmem:[%s4638_s1 + $0x56c] ss:$48 sps:$4 sm:$0xff]   ;;  %v3342_v63 = vld [vmem:[%s4638_s1 + $0x560] ss:$48 sps:$4 sm:$0xff]  }
  0x7c   :  { %1375 = vmatprep.subr.bf16.mxu0 %v3254_v0  ;;  %1416 = vmatprep.subr.bf16.mxu1 %v3257_v1  ;;  %v3345_v0 = vld [vmem:[%s4638_s1 + $0x568] ss:$48 sps:$4 sm:$0xff]   ;;  %v3350_v1 = vld [vmem:[%s4638_s1 + $0x5c4] ss:$48 sps:$4 sm:$0xff]  }
  0x7f   :  { %1376 = vmatpush1.bf16.msra.mxu0 %v3252_v2  ;;  %1417 = vmatpush1.bf16.msra.mxu1 %v3255_v3  ;;  %v3353_v2 = vld [vmem:[%s4638_s1 + $0x5cc] ss:$48 sps:$4 sm:$0xff]   ;;  %v3348_v3 = vld [vmem:[%s4638_s1 + $0x5c0] ss:$48 sps:$4 sm:$0xff]  }
  0x80   :  { %1427 = vmatprep.subr.bf16.mxu0 %v3260_v5  ;;  %1468 = vmatprep.subr.bf16.mxu1 %v3263_v6  ;;  %v3351_v5 = vld [vmem:[%s4638_s1 + $0x5c8] ss:$48 sps:$4 sm:$0xff]   ;;  %v3354_v6 = vld [vmem:[%s4640_s3] ss:$16 sps:$4 sm:$0xff]  }
  0x82   :  { %1378 = vmatmul.mubr.bf16.vlgmr.msra.gmra.mrb[4].mxu0 %v3790_v4  ;;  %1419 = vmatmul.mubr.bf16.vlgmr.msra.gmra.mrb[4].mxu1 %v3790_v4 }
  0x83   :  { %1428 = vmatpush1.bf16.msra.mxu0 %v3258_v7  ;;  %1469 = vmatpush1.bf16.msra.mxu1 %v3261_v8  ;;  %v3356_v7 = vld [vmem:[%s4640_s3 + $0x4] ss:$16 sps:$4 sm:$0xff]   ;;  %v3357_v8 = vld [vmem:[%s4640_s3 + $0x8] ss:$16 sps:$4 sm:$0xff]  }
  0x84   :  { %1429 = vmatprep.subr.bf16.mxu0 %v3266_v9  ;;  %1470 = vmatprep.subr.bf16.mxu1 %v3269_v10  ;;  %v3359_v9 = vld [vmem:[%s4640_s3 + $0xc] ss:$16 sps:$4 sm:$0xff]   ;;  %v3362_v10 = vld [vmem:[%s4640_s3 + $0x24] ss:$16 sps:$4 sm:$0xff]  }
  0x85   :  { %1459 = vmatprep.mubr.bf16.mxu0 %v3729_v48  ;;  %1500 = vmatprep.mubr.bf16.mxu1 %v3729_v48  ;;  %v3281_v48 = vld [vmem:[%s4638_s1 + $0x14c] ss:$48 sps:$4 sm:$0xff]  }
  0x87   :  { %1430 = vmatpush1.bf16.msra.mxu0 %v3264_v11  ;;  %1471 = vmatpush1.bf16.msra.mxu1 %v3267_v12  ;;  %v3363_v11 = vld [vmem:[%s4640_s3 + $0x28] ss:$16 sps:$4 sm:$0xff]   ;;  %v3365_v12 = vld [vmem:[%s4640_s3 + $0x2c] ss:$16 sps:$4 sm:$0xff]  }
  0x88   :  { %1431 = vmatprep.subr.bf16.mxu0 %v3272_v13  ;;  %1472 = vmatprep.subr.bf16.mxu1 %v3275_v14  ;;  %v3368_v13 = vld [vmem:[%s4640_s3 + $0x44] ss:$16 sps:$4 sm:$0xff]   ;;  %v3366_v14 = vld [vmem:[%s4640_s3 + $0x40] ss:$16 sps:$4 sm:$0xff]  }
  0x8b   :  { %1432 = vmatpush1.bf16.msra.mxu0 %v3270_v15  ;;  %1473 = vmatpush1.bf16.msra.mxu1 %v3273_v16  ;;  %v3371_v15 = vld [vmem:[%s4640_s3 + $0x4c] ss:$16 sps:$4 sm:$0xff]   ;;  %v3369_v16 = vld [vmem:[%s4640_s3 + $0x48] ss:$16 sps:$4 sm:$0xff]  }
  0x8c   :  { %1433 = vmatprep.subr.bf16.mxu0 %v3278_v17  ;;  %1474 = vmatprep.subr.bf16.mxu1 %v3281_v48  ;;  %v3374_v17 = vld [vmem:[%s4640_s3 + $0x64] ss:$16 sps:$4 sm:$0xff]   ;;  %v3377_v48 = vld [vmem:[%s4640_s3 + $0x6c] ss:$16 sps:$4 sm:$0xff]  }
  0x8f   :  { %1434 = vmatpush1.bf16.msra.mxu0 %v3276_v18  ;;  %1475 = vmatpush1.bf16.msra.mxu1 %v3279_v19  ;;  %v3372_v18 = vld [vmem:[%s4640_s3 + $0x60] ss:$16 sps:$4 sm:$0xff]   ;;  %v3375_v19 = vld [vmem:[%s4640_s3 + $0x68] ss:$16 sps:$4 sm:$0xff]  }
  0x90   :  { %1435 = vmatprep.subr.bf16.mxu0 %v3284_v20  ;;  %1476 = vmatprep.subr.bf16.mxu1 %v3287_v21  ;;  %v3380_v20 = vld [vmem:[%s4640_s3 + $0x84] ss:$16 sps:$4 sm:$0xff]   ;;  %v3383_v21 = vld [vmem:[%s4640_s3 + $0x8c] ss:$16 sps:$4 sm:$0xff]  }
  0x93   :  { %1436 = vmatpush1.bf16.msra.mxu0 %v3282_v22  ;;  %1477 = vmatpush1.bf16.msra.mxu1 %v3285_v23  ;;  %v3378_v22 = vld [vmem:[%s4640_s3 + $0x80] ss:$16 sps:$4 sm:$0xff]   ;;  %v3381_v23 = vld [vmem:[%s4640_s3 + $0x88] ss:$16 sps:$4 sm:$0xff]  }
  0x94   :  { %1437 = vmatprep.subr.bf16.mxu0 %v3290_v24  ;;  %1478 = vmatprep.subr.bf16.mxu1 %v3293_v25  ;;  %v3386_v24 = vld [vmem:[%s4640_s3 + $0xa4] ss:$16 sps:$4 sm:$0xff]   ;;  %v3389_v25 = vld [vmem:[%s4640_s3 + $0xac] ss:$16 sps:$4 sm:$0xff]  }
  0x97   :  { %1438 = vmatpush1.bf16.msra.mxu0 %v3288_v26  ;;  %1479 = vmatpush1.bf16.msra.mxu1 %v3291_v27  ;;  %v3384_v26 = vld [vmem:[%s4640_s3 + $0xa0] ss:$16 sps:$4 sm:$0xff]   ;;  %v3387_v27 = vld [vmem:[%s4640_s3 + $0xa8] ss:$16 sps:$4 sm:$0xff]  }
  0x98   :  { %1439 = vmatprep.subr.bf16.mxu0 %v3296_v28  ;;  %1480 = vmatprep.subr.bf16.mxu1 %v3299_v29  ;;  %v3392_v28 = vld [vmem:[%s4640_s3 + $0xc4] ss:$16 sps:$4 sm:$0xff]   ;;  %v3395_v29 = vld [vmem:[%s4640_s3 + $0xcc] ss:$16 sps:$4 sm:$0xff]  }
  0x9b   :  { %1440 = vmatpush1.bf16.msra.mxu0 %v3294_v30  ;;  %1481 = vmatpush1.bf16.msra.mxu1 %v3297_v31  ;;  %v3390_v30 = vld [vmem:[%s4640_s3 + $0xc0] ss:$16 sps:$4 sm:$0xff]   ;;  %v3393_v31 = vld [vmem:[%s4640_s3 + $0xc8] ss:$16 sps:$4 sm:$0xff]  }
  0x9c   :  { %1441 = vmatprep.subr.bf16.mxu0 %v3302_v32  ;;  %1482 = vmatprep.subr.bf16.mxu1 %v3305_v33  ;;  %v3398_v32 = vld [vmem:[%s4640_s3 + $0xe4] ss:$16 sps:$4 sm:$0xff]   ;;  %v3401_v33 = vld [vmem:[%s4640_s3 + $0xec] ss:$16 sps:$4 sm:$0xff]  }
  0x9f   :  { %1442 = vmatpush1.bf16.msra.mxu0 %v3300_v34  ;;  %1483 = vmatpush1.bf16.msra.mxu1 %v3303_v35  ;;  %v3396_v34 = vld [vmem:[%s4640_s3 + $0xe0] ss:$16 sps:$4 sm:$0xff]   ;;  %v3399_v35 = vld [vmem:[%s4640_s3 + $0xe8] ss:$16 sps:$4 sm:$0xff]  }
  0xa0   :  { %1443 = vmatprep.subr.bf16.mxu0 %v3308_v36  ;;  %1484 = vmatprep.subr.bf16.mxu1 %v3311_v37  ;;  %v3404_v36 = vld [vmem:[%s4640_s3 + $0x104] ss:$16 sps:$4 sm:$0xff]   ;;  %v3407_v37 = vld [vmem:[%s4640_s3 + $0x10c] ss:$16 sps:$4 sm:$0xff]  }
  0xa3   :  { %1444 = vmatpush1.bf16.msra.mxu0 %v3306_v38  ;;  %1485 = vmatpush1.bf16.msra.mxu1 %v3309_v39  ;;  %v3402_v38 = vld [vmem:[%s4640_s3 + $0x100] ss:$16 sps:$4 sm:$0xff]   ;;  %v3405_v39 = vld [vmem:[%s4640_s3 + $0x108] ss:$16 sps:$4 sm:$0xff]  }
  0xa4   :  { %1445 = vmatprep.subr.bf16.mxu0 %v3314_v40  ;;  %1486 = vmatprep.subr.bf16.mxu1 %v3317_v41  ;;  %v3410_v40 = vld [vmem:[%s4640_s3 + $0x124] ss:$16 sps:$4 sm:$0xff]   ;;  %v3413_v41 = vld [vmem:[%s4640_s3 + $0x12c] ss:$16 sps:$4 sm:$0xff]  }
  0xa7   :  { %1446 = vmatpush1.bf16.msra.mxu0 %v3312_v42  ;;  %1487 = vmatpush1.bf16.msra.mxu1 %v3315_v43  ;;  %v3408_v42 = vld [vmem:[%s4640_s3 + $0x120] ss:$16 sps:$4 sm:$0xff]   ;;  %v3411_v43 = vld [vmem:[%s4640_s3 + $0x128] ss:$16 sps:$4 sm:$0xff]  }
  0xa8   :  { %1447 = vmatprep.subr.bf16.mxu0 %v3320_v44  ;;  %1488 = vmatprep.subr.bf16.mxu1 %v3323_v45  ;;  %v3416_v44 = vld [vmem:[%s4640_s3 + $0x144] ss:$16 sps:$4 sm:$0xff]   ;;  %v3419_v45 = vld [vmem:[%s4640_s3 + $0x14c] ss:$16 sps:$4 sm:$0xff]  }
  0xab   :  { %1448 = vmatpush1.bf16.msra.mxu0 %v3318_v46  ;;  %1489 = vmatpush1.bf16.msra.mxu1 %v3321_v47  ;;  %v3414_v46 = vld [vmem:[%s4640_s3 + $0x140] ss:$16 sps:$4 sm:$0xff]   ;;  %v3417_v47 = vld [vmem:[%s4640_s3 + $0x148] ss:$16 sps:$4 sm:$0xff]  }
  0xac   :  { %1449 = vmatprep.subr.bf16.mxu0 %v3326_v49  ;;  %1490 = vmatprep.subr.bf16.mxu1 %v3329_v50  ;;  %v3422_v49 = vld [vmem:[%s4640_s3 + $0x164] ss:$16 sps:$4 sm:$0xff]   ;;  %v3425_v50 = vld [vmem:[%s4640_s3 + $0x16c] ss:$16 sps:$4 sm:$0xff]  }
  0xaf   :  { %1450 = vmatpush1.bf16.msra.mxu0 %v3324_v51  ;;  %1491 = vmatpush1.bf16.msra.mxu1 %v3327_v52  ;;  %v236_v51 = vlaneseq  ;;  %v3420_v52 = vld [vmem:[%s4640_s3 + $0x160] ss:$16 sps:$4 sm:$0xff]  }
  0xb0   :  { %1451 = vmatprep.subr.bf16.mxu0 %v3332_v53  ;;  %1492 = vmatprep.subr.bf16.mxu1 %v3335_v54  ;;  %v3423_v53 = vld [vmem:[%s4640_s3 + $0x168] ss:$16 sps:$4 sm:$0xff]   ;;  %v3428_v54 = vld [vmem:[%s4640_s3 + $0x184] ss:$16 sps:$4 sm:$0xff]  }
  0xb3   :  { %1452 = vmatpush1.bf16.msra.mxu0 %v3330_v55  ;;  %1493 = vmatpush1.bf16.msra.mxu1 %v3333_v56  ;;  %v3431_v55 = vld [vmem:[%s4640_s3 + $0x18c] ss:$16 sps:$4 sm:$0xff]   ;;  %v4330_v56 = vshrl.u32 %v236_v51, 7 }
  0xb4   :  { %1453 = vmatprep.subr.bf16.mxu0 %v3338_v57  ;;  %1494 = vmatprep.subr.bf16.mxu1 %v3341_v58  ;;  %v3426_v57 = vld [vmem:[%s4640_s3 + $0x180] ss:$16 sps:$4 sm:$0xff]   ;;  %v3429_v58 = vld [vmem:[%s4640_s3 + $0x188] ss:$16 sps:$4 sm:$0xff]  }
  0xb7   :  { %1454 = vmatpush1.bf16.msra.mxu0 %v3336_v59  ;;  %1495 = vmatpush1.bf16.msra.mxu1 %v3339_v60  ;;  %v3434_v59 = vld [vmem:[%s4640_s3 + $0x1a4] ss:$16 sps:$4 sm:$0xff]   ;;  %v4342_v60 = vsub.s32 0, %v4330_v56 }
  0xb8   :  { %1455 = vmatprep.subr.bf16.mxu0 %v3344_v61  ;;  %1496 = vmatprep.subr.bf16.mxu1 %v3347_v62  ;;  %v3437_v61 = vld [vmem:[%s4640_s3 + $0x1ac] ss:$16 sps:$4 sm:$0xff]   ;;  %v4350_v62 = vld [vmem:[%s4641_s2] sm:$0xff] }
  0xbb   :  { %1456 = vmatpush1.bf16.msra.mxu0 %v3342_v63  ;;  %1497 = vmatpush1.bf16.msra.mxu1 %v3345_v0  ;;  %v4353_v63 = vsub.s32 3, %v4330_v56  ;;  %v3432_v0 = vld [vmem:[%s4640_s3 + $0x1a0] ss:$16 sps:$4 sm:$0xff]  }
  0xbc   :  { %1457 = vmatprep.subr.bf16.mxu0 %v3350_v1  ;;  %1498 = vmatprep.subr.bf16.mxu1 %v3353_v2  ;;  %v3435_v1 = vld [vmem:[%s4640_s3 + $0x1a8] ss:$16 sps:$4 sm:$0xff]   ;;  %v239_v2 = vrot.slane %v4350_v62, %v4342_v60 }
  0xbf   :  { %1458 = vmatpush1.bf16.msra.mxu0 %v3348_v3  ;;  %1499 = vmatpush1.bf16.msra.mxu1 %v3351_v5  ;;  %v251_v3 = vrot.slane %v4350_v62, %v4353_v63 }
  0xc0   :  { %2131 = vmatprep.subr.bf16.mxu0 %v3356_v7  ;;  %2213 = vmatprep.subr.bf16.mxu1 %v3359_v9 }
  0xc2   :  { %1460 = vmatmul.mubr.bf16.vlgmr.msra.gmra.mrb[8].mxu0 %v3790_v4  ;;  %1501 = vmatmul.mubr.bf16.vlgmr.msra.gmra.mrb[8].mxu1 %v3790_v4  ;;  %v3360_v4 = vld [vmem:[%s4640_s3 + $0x20] ss:$16 sps:$4 sm:$0xff]  }
  0xc3   :  { %2132 = vmatpush1.bf16.msra.mxu0 %v3354_v6  ;;  %2214 = vmatpush1.bf16.msra.mxu1 %v3357_v8 }
  0xc4   :  { %2133 = vmatprep.subr.bf16.mxu0 %v3362_v10  ;;  %2215 = vmatprep.subr.bf16.mxu1 %v3365_v12  ;;  %v3443_v10 = vld [vmem:[%s4640_s3 + $0x1cc] ss:$16 sps:$4 sm:$0xff]  }
  0xc7   :  { %2134 = vmatpush1.bf16.msra.mxu0 %v3360_v4  ;;  %2216 = vmatpush1.bf16.msra.mxu1 %v3363_v11  ;;  %v3440_v4 = vld [vmem:[%s4640_s3 + $0x1c4] ss:$16 sps:$4 sm:$0xff]  }
  0xc8   :  { %2135 = vmatprep.subr.bf16.mxu0 %v3368_v13  ;;  %2217 = vmatprep.subr.bf16.mxu1 %v3371_v15  ;;  %v3441_v15 = vld [vmem:[%s4640_s3 + $0x1c8] ss:$16 sps:$4 sm:$0xff]  }
  0xcb   :  { %2136 = vmatpush1.bf16.msra.mxu0 %v3366_v14  ;;  %2218 = vmatpush1.bf16.msra.mxu1 %v3369_v16  ;;  %v3438_v14 = vld [vmem:[%s4640_s3 + $0x1c0] ss:$16 sps:$4 sm:$0xff]  }
  0xcc   :  { %2137 = vmatprep.subr.bf16.mxu0 %v3374_v17  ;;  %2219 = vmatprep.subr.bf16.mxu1 %v3377_v48 }
  0xcf   :  { %2138 = vmatpush1.bf16.msra.mxu0 %v3372_v18  ;;  %2220 = vmatpush1.bf16.msra.mxu1 %v3375_v19  ;;  %v3446_v19 = vld [vmem:[%s4640_s3 + $0x1e4] ss:$16 sps:$4 sm:$0xff]  }
  0xd0   :  { %2139 = vmatprep.subr.bf16.mxu0 %v3380_v20  ;;  %2221 = vmatprep.subr.bf16.mxu1 %v3383_v21  ;;  %v3449_v20 = vld [vmem:[%s4640_s3 + $0x1ec] ss:$16 sps:$4 sm:$0xff]  }
  0xd3   :  { %2140 = vmatpush1.bf16.msra.mxu0 %v3378_v22  ;;  %2222 = vmatpush1.bf16.msra.mxu1 %v3381_v23  ;;  %v3444_v22 = vld [vmem:[%s4640_s3 + $0x1e0] ss:$16 sps:$4 sm:$0xff]   ;;  %v3447_v23 = vld [vmem:[%s4640_s3 + $0x1e8] ss:$16 sps:$4 sm:$0xff]  }
  0xd4   :  { %2141 = vmatprep.subr.bf16.mxu0 %v3386_v24  ;;  %2223 = vmatprep.subr.bf16.mxu1 %v3389_v25  ;;  %v3452_v24 = vld [vmem:[%s4640_s3 + $0x204] ss:$16 sps:$4 sm:$0xff]   ;;  %v3455_v25 = vld [vmem:[%s4640_s3 + $0x20c] ss:$16 sps:$4 sm:$0xff]  }
  0xd7   :  { %2142 = vmatpush1.bf16.msra.mxu0 %v3384_v26  ;;  %2224 = vmatpush1.bf16.msra.mxu1 %v3387_v27  ;;  %v4398_v26 = vsub.s32 1, %v4330_v56  ;;  %v4401_v27 = vsub.s32 2, %v4330_v56 }
  0xd8   :  { %2143 = vmatprep.subr.bf16.mxu0 %v3392_v28  ;;  %2225 = vmatprep.subr.bf16.mxu1 %v3395_v29  ;;  %v254_v28 = vsub.s32 4, %v4330_v56  ;;  %v258_v29 = vsub.s32 5, %v4330_v56 }
  0xdb   :  { %2144 = vmatpush1.bf16.msra.mxu0 %v3390_v30  ;;  %2226 = vmatpush1.bf16.msra.mxu1 %v3393_v31  ;;  %v243_v30 = vrot.slane %v4350_v62, %v4398_v26  ;;  %v247_v31 = vrot.slane %v4350_v62, %v4401_v27 }
  0xdc   :  { %2145 = vmatprep.subr.bf16.mxu0 %v3398_v32  ;;  %2227 = vmatprep.subr.bf16.mxu1 %v3401_v33  ;;  %v255_v32 = vrot.slane %v4350_v62, %v254_v28  ;;  %v259_v33 = vrot.slane %v4350_v62, %v258_v29  ;;  %v3450_v29 = vld [vmem:[%s4640_s3 + $0x200] ss:$16 sps:$4 sm:$0xff]  }
  0xdf   :  { %2146 = vmatpush1.bf16.msra.mxu0 %v3396_v34  ;;  %2228 = vmatpush1.bf16.msra.mxu1 %v3399_v35 }
  0xe0   :  { %2147 = vmatprep.subr.bf16.mxu0 %v3404_v36  ;;  %2229 = vmatprep.subr.bf16.mxu1 %v3407_v37 }
  0xe3   :  { %2148 = vmatpush1.bf16.msra.mxu0 %v3402_v38  ;;  %2230 = vmatpush1.bf16.msra.mxu1 %v3405_v39 }
  0xe4   :  { %2149 = vmatprep.subr.bf16.mxu0 %v3410_v40  ;;  %2231 = vmatprep.subr.bf16.mxu1 %v3413_v41 }
  0xe7   :  { %2150 = vmatpush1.bf16.msra.mxu0 %v3408_v42  ;;  %2232 = vmatpush1.bf16.msra.mxu1 %v3411_v43 }
  0xe8   :  { %2151 = vmatprep.subr.bf16.mxu0 %v3416_v44  ;;  %2233 = vmatprep.subr.bf16.mxu1 %v3419_v45 }
  0xeb   :  { %2152 = vmatpush1.bf16.msra.mxu0 %v3414_v46  ;;  %2234 = vmatpush1.bf16.msra.mxu1 %v3417_v47 }
  0xec   :  { %2153 = vmatprep.subr.bf16.mxu0 %v3422_v49  ;;  %2235 = vmatprep.subr.bf16.mxu1 %v3425_v50 }
  0xef   :  { %2154 = vmatpush1.bf16.msra.mxu0 %v3420_v52  ;;  %2236 = vmatpush1.bf16.msra.mxu1 %v3423_v53  ;;  %v266_v53 = vsub.s32 7, %v4330_v56 }
  0xf0   :  { %2155 = vmatprep.subr.bf16.mxu0 %v3428_v54  ;;  %2237 = vmatprep.subr.bf16.mxu1 %v3431_v55  ;;  %v262_v54 = vsub.s32 6, %v4330_v56  ;;  %v233_v55 = vld [vmem:[%s4641_s2 + $0x8] sm:$0xf] }
  0xf3   :  { %2156 = vmatpush1.bf16.msra.mxu0 %v3426_v57  ;;  %2238 = vmatpush1.bf16.msra.mxu1 %v3429_v58  ;;  %v267_v57 = vrot.slane %v4350_v62, %v266_v53  ;;  %v263_v58 = vrot.slane %v4350_v62, %v262_v54  ;;  %v3488_v53 = vld [vmem:[%s4640_s3 + $0x2c4] ss:$16 sps:$4 sm:$0xff]   ;;  %v3491_v54 = vld [vmem:[%s4640_s3 + $0x2cc] ss:$16 sps:$4 sm:$0xff]  }
  0xf4   :  { %2157 = vmatprep.subr.bf16.mxu0 %v3434_v59  ;;  %2239 = vmatprep.subr.bf16.mxu1 %v3437_v61  ;;  %v271_v59 = vrot.slane %v233_v55, %v4342_v60  ;;  %v279_v61 = vrot.slane %v233_v55, %v4401_v27 }
  0xf7   :  { %2158 = vmatpush1.bf16.msra.mxu0 %v3432_v0  ;;  %2240 = vmatpush1.bf16.msra.mxu1 %v3435_v1  ;;  %v275_v0 = vrot.slane %v233_v55, %v4398_v26  ;;  %v283_v1 = vrot.slane %v233_v55, %v4353_v63  ;;  %v3486_v55 = vld [vmem:[%s4640_s3 + $0x2c0] ss:$16 sps:$4 sm:$0xff]  }
  0xf8   :  { %2159 = vmatprep.subr.bf16.mxu0 %v3440_v4  ;;  %2241 = vmatprep.subr.bf16.mxu1 %v3443_v10 }
  0xfb   :  { %2160 = vmatpush1.bf16.msra.mxu0 %v3438_v14  ;;  %2242 = vmatpush1.bf16.msra.mxu1 %v3441_v15 }
  0xfc   :  { %2161 = vmatprep.subr.bf16.mxu0 %v3446_v19  ;;  %2243 = vmatprep.subr.bf16.mxu1 %v3449_v20 }
  0xff   :  { %2162 = vmatpush1.bf16.msra.mxu0 %v3444_v22  ;;  %2244 = vmatpush1.bf16.msra.mxu1 %v3447_v23 }
 0x100   :  { %2172 = vmatprep.subr.bf16.mxu0 %v3452_v24  ;;  %2254 = vmatprep.subr.bf16.mxu1 %v3455_v25 }
 0x115   :  { %v1297_v5 = vpop.f32.mrb[0].mxu0  ;;  %v1338_v6 = vpop.f32.mrb[0].mxu1 }
 0x116   :  { %v1298_v7 = vadd.f32 %v1297_v5, %v239_v2  ;;  %v1299_v8 = vpop.f32.mrb[1].mxu0  ;;  %v1340_v9 = vpop.f32.mrb[1].mxu1  ;;  %v1339_v35 = vadd.f32 %v1338_v6, %v247_v31 }
 0x117   :  { %v1341_v11 = vadd.f32 %v1340_v9, %v251_v3  ;;  %v1301_v12 = vpop.f32.mrb[2].mxu0  ;;  %v1342_v13 = vpop.f32.mrb[2].mxu1  ;;  %v1300_v34 = vadd.f32 %v1299_v8, %v243_v30  ;;  %v3453_v30 = vld [vmem:[%s4640_s3 + $0x208] ss:$16 sps:$4 sm:$0xff]  }
 0x118   :  { %v1509_v16 = vmax.f32 %v1298_v7, 0.0  ;;  %v1302_v17 = vpop.f32.mrb[3].mxu0  ;;  %v1343_v48 = vpop.f32.mrb[3].mxu1  ;;  %v1511_v49 = vmax.f32 %v1339_v35, 0.0  ;;  %v3464_v35 = vld [vmem:[%s4640_s3 + $0x244] ss:$16 sps:$4 sm:$0xff]  }
 0x119   :  { %v1512_v18 = vmax.f32 %v1341_v11, 0.0  ;;  %v1510_v44 = vmax.f32 %v1300_v34, 0.0  ;;  %v3459_v34 = vld [vmem:[%s4640_s3 + $0x228] ss:$16 sps:$4 sm:$0xff]  }
 0x11b   :  { %v4383_v21 = vmax.f32 %v1509_v16, %v1512_v18 }
 0x155   :  { %v1379_v36 = vpop.f32.mrb[4].mxu0  ;;  %v1420_v37 = vpop.f32.mrb[4].mxu1 }
 0x156   :  { %v1380_v38 = vadd.f32 %v1379_v36, %v255_v32  ;;  %v1381_v39 = vpop.f32.mrb[5].mxu0  ;;  %v1422_v40 = vpop.f32.mrb[5].mxu1  ;;  %v1421_v3 = vadd.f32 %v1420_v37, %v263_v58  ;;  %v3458_v32 = vld [vmem:[%s4640_s3 + $0x224] ss:$16 sps:$4 sm:$0xff]   ;;  %v3467_v36 = vld [vmem:[%s4640_s3 + $0x24c] ss:$16 sps:$4 sm:$0xff]  }
 0x157   :  { %v1382_v41 = vadd.f32 %v1381_v39, %v259_v33  ;;  %v1383_v42 = vpop.f32.mrb[6].mxu0  ;;  %v1424_v43 = vpop.f32.mrb[6].mxu1  ;;  %v1423_v2 = vadd.f32 %v1422_v40, %v267_v57  ;;  %v3456_v33 = vld [vmem:[%s4640_s3 + $0x220] ss:$16 sps:$4 sm:$0xff]   ;;  %v3522_v37 = vmov 0  }
 0x158   :  { %v1513_v45 = vmax.f32 %v1380_v38, 0.0  ;;  %v1384_v46 = vpop.f32.mrb[7].mxu0  ;;  %v1425_v47 = vpop.f32.mrb[7].mxu1  ;;  %v1515_v17 = vmax.f32 %v1421_v3, 0.0  ;;  %v3462_v38 = vld [vmem:[%s4640_s3 + $0x240] ss:$16 sps:$4 sm:$0xff]  }
 0x159   :  { %v1514_v50 = vmax.f32 %v1382_v41, 0.0  ;;  %v1516_v12 = vmax.f32 %v1423_v2, 0.0  ;;  %v3465_v39 = vld [vmem:[%s4640_s3 + $0x248] ss:$16 sps:$4 sm:$0xff]   ;;  %v3470_v40 = vld [vmem:[%s4640_s3 + $0x264] ss:$16 sps:$4 sm:$0xff]  }
 0x15a   :  { %v1522_v51 = vmax.f32 %v1510_v44, %v1513_v45  ;;  %v3473_v41 = vld [vmem:[%s4640_s3 + $0x26c] ss:$16 sps:$4 sm:$0xff]   ;;  %v3468_v42 = vld [vmem:[%s4640_s3 + $0x260] ss:$16 sps:$4 sm:$0xff]   ;;  %v3471_v43 = vld [vmem:[%s4640_s3 + $0x268] ss:$16 sps:$4 sm:$0xff]  }
 0x15b   :  { %v1523_v52 = vmax.f32 %v1511_v49, %v1514_v50  ;;  %v3476_v44 = vld [vmem:[%s4640_s3 + $0x284] ss:$16 sps:$4 sm:$0xff]   ;;  %v3479_v45 = vld [vmem:[%s4640_s3 + $0x28c] ss:$16 sps:$4 sm:$0xff]   ;;  %v3474_v46 = vld [vmem:[%s4640_s3 + $0x280] ss:$16 sps:$4 sm:$0xff]  }
 0x15c   :  { %v3477_v47 = vld [vmem:[%s4640_s3 + $0x288] ss:$16 sps:$4 sm:$0xff]   ;;  %v3482_v49 = vld [vmem:[%s4640_s3 + $0x2a4] ss:$16 sps:$4 sm:$0xff]   ;;  %v3485_v50 = vld [vmem:[%s4640_s3 + $0x2ac] ss:$16 sps:$4 sm:$0xff]  }
 0x15d   :  { %v3489_v57 = vld [vmem:[%s4640_s3 + $0x2c8] ss:$16 sps:$4 sm:$0xff]   ;;  %v3494_v58 = vld [vmem:[%s4640_s3 + $0x2e4] ss:$16 sps:$4 sm:$0xff]   ;;  %v3523_v3 = vmov 0.0  }
 0x195   :  { %v1461_v5 = vpop.f32.mrb[8].mxu0  ;;  %v1502_v56 = vpop.f32.mrb[8].mxu1 }
 0x196   :  { %v1462_v6 = vadd.f32 %v1461_v5, %v271_v59  ;;  %v1503_v7 = vadd.f32 %v1502_v56, %v279_v61  ;;  %v1463_v8 = vpop.f32.mrb[9].mxu0  ;;  %v1504_v9 = vpop.f32.mrb[9].mxu1  ;;  %v3497_v59 = vld [vmem:[%s4640_s3 + $0x2ec] ss:$16 sps:$4 sm:$0xff]   ;;  %v3492_v61 = vld [vmem:[%s4640_s3 + $0x2e0] ss:$16 sps:$4 sm:$0xff]  }
 0x197   :  { %v1464_v4 = vadd.f32 %v1463_v8, %v275_v0  ;;  %v1505_v10 = vadd.f32 %v1504_v9, %v283_v1  ;;  %v1465_v11 = vpop.f32.mrb[10].mxu0  ;;  %v1506_v62 = vpop.f32.mrb[10].mxu1  ;;  %v3495_v0 = vld [vmem:[%s4640_s3 + $0x2e8] ss:$16 sps:$4 sm:$0xff]   ;;  %v3498_v1 = vld [vmem:[%s4642_s5] sm:$0xff]   ;;  %v3500_v56 = vld [vmem:[%s4642_s5 + $0x10] sm:$0xff]  }
 0x198   :  { %v1517_v13 = vmax.f32 %v1462_v6, 0.0  ;;  %v1519_v14 = vmax.f32 %v1503_v7, 0.0  ;;  %v1466_v15 = vpop.f32.mrb[11].mxu0  ;;  %v1507_v16 = vpop.f32.mrb[11].mxu1  ;;  %v3499_v5 = vld [vmem:[%s4642_s5 + $0x8] sm:$0xff]   ;;  %v3501_v6 = vld [vmem:[%s4642_s5 + $0x18] sm:$0xff]  }
 0x199   :  { %v1518_v48 = vmax.f32 %v1464_v4, 0.0  ;;  %v1520_v18 = vmax.f32 %v1505_v10, 0.0  ;;  %v3502_v7 = vld [vmem:[%s4642_s5 + $0x20] sm:$0xff]   ;;  %v3503_v8 = vld [vmem:[%s4642_s5 + $0x28] sm:$0xff]   ;;  %v3504_v9 = vld [vmem:[%s4642_s5 + $0x30] sm:$0xff]  }
 0x19a   :  { %v1525_v19 = vmax.f32 %v1516_v12, %v1519_v14  ;;  %v3505_v4 = vld [vmem:[%s4642_s5 + $0x38] sm:$0xff]   ;;  %v3506_v10 = vld [vmem:[%s4643_s7] sm:$0xff]   ;;  %v3507_v11 = vld [vmem:[%s4643_s7 + $0x8] sm:$0xff]  }
 0x19b   :  { %v1524_v20 = vmax.f32 %v1515_v17, %v1518_v48  ;;  %v1526_v22 = vmax.f32 %v1517_v13, %v1520_v18  ;;  %v3508_v62 = vld [vmem:[%s4643_s7 + $0x10] sm:$0xff]   ;;  %v3509_v12 = vld [vmem:[%s4643_s7 + $0x18] sm:$0xff]   ;;  %v3510_v13 = vld [vmem:[%s4643_s7 + $0x20] sm:$0xff]  }
 0x19c   :  { %v1528_v23 = vmax.f32 %v1522_v51, %v1525_v19  ;;  %v3480_v51 = vld [vmem:[%s4640_s3 + $0x2a0] ss:$16 sps:$4 sm:$0xff]   ;;  %v3511_v14 = vld [vmem:[%s4643_s7 + $0x28] sm:$0xff]  }
 0x19d   :  { %v1527_v24 = vmax.f32 %v4383_v21, %v1524_v20  ;;  %v4423_v25 = vmax.f32 %v1523_v52, %v1526_v22  ;;  %v3461_v21 = vld [vmem:[%s4640_s3 + $0x22c] ss:$16 sps:$4 sm:$0xff]   ;;  %v3483_v52 = vld [vmem:[%s4640_s3 + $0x2a8] ss:$16 sps:$4 sm:$0xff]   ;;  %v1629_v15 = vld [vmem:[%s4644_s4] sm:$0xf] }
 0x19e   :  { %v1531_v28 = vpack.c.bf16 %v1528_v23, %v1528_v23  ;;  %v1634_v16 = vrot.slane %v1629_v15, %v4342_v60  ;;  %v1642_v17 = vrot.slane %v1629_v15, %v4401_v27  ;;  %v1638_v48 = vrot.slane %v1629_v15, %v4398_v26 }
 0x19f   :  { %v1530_v31 = vpack.c.bf16 %v1527_v24, %v1527_v24  ;;  %v1532_v2 = vpack.c.bf16 %v4423_v25, %v4423_v25  ;;  %v1646_v18 = vrot.slane %v1629_v15, %v4353_v63 }
 0x1a0   :  { %2163 = vmatprep.mubr.bf16.mxu0 %v1531_v28  ;;  %2245 = vmatprep.mubr.bf16.mxu1 %v1531_v28 }
 0x1a1   :  { %2164 = vmatmul.mubr.bf16.vlgmr.msra.gmra.mrb[12].mxu0 %v1530_v31  ;;  %2246 = vmatmul.mubr.bf16.vlgmr.msra.gmra.mrb[12].mxu1 %v1530_v31 }
 0x1a2   :  { %2173 = vmatpush1.bf16.msra.mxu0 %v3450_v29  ;;  %2255 = vmatpush1.bf16.msra.mxu1 %v3453_v30 }
 0x1a3   :  { %2174 = vmatprep.subr.bf16.mxu0 %v3458_v32  ;;  %2256 = vmatprep.subr.bf16.mxu1 %v3461_v21 }
 0x1a4   :  { %2204 = vmatprep.mubr.bf16.mxu0 %v3522_v37  ;;  %2286 = vmatprep.mubr.bf16.mxu1 %v3522_v37  ;;  %v3512_v37 = vld [vmem:[%s4643_s7 + $0x30] sm:$0xff]  }
 0x1a6   :  { %2175 = vmatpush1.bf16.msra.mxu0 %v3456_v33  ;;  %2257 = vmatpush1.bf16.msra.mxu1 %v3459_v34 }
 0x1a7   :  { %2176 = vmatprep.subr.bf16.mxu0 %v3464_v35  ;;  %2258 = vmatprep.subr.bf16.mxu1 %v3467_v36 }
 0x1aa   :  { %2177 = vmatpush1.bf16.msra.mxu0 %v3462_v38  ;;  %2259 = vmatpush1.bf16.msra.mxu1 %v3465_v39  ;;  %v3513_v38 = vld [vmem:[%s4643_s7 + $0x38] sm:$0xff]   ;;  %v3514_v39 = vld [vmem:[%s4645_s9] sm:$0xff]  }
 0x1ab   :  { %2178 = vmatprep.subr.bf16.mxu0 %v3470_v40  ;;  %2260 = vmatprep.subr.bf16.mxu1 %v3473_v41  ;;  %v3515_v40 = vld [vmem:[%s4645_s9 + $0x8] sm:$0xff]   ;;  %v3516_v41 = vld [vmem:[%s4645_s9 + $0x10] sm:$0xff]  }
 0x1ae   :  { %2179 = vmatpush1.bf16.msra.mxu0 %v3468_v42  ;;  %2261 = vmatpush1.bf16.msra.mxu1 %v3471_v43  ;;  %v3517_v42 = vld [vmem:[%s4645_s9 + $0x18] sm:$0xff]   ;;  %v3518_v43 = vld [vmem:[%s4645_s9 + $0x20] sm:$0xff]  }
 0x1af   :  { %2180 = vmatprep.subr.bf16.mxu0 %v3476_v44  ;;  %2262 = vmatprep.subr.bf16.mxu1 %v3479_v45  ;;  %v3519_v44 = vld [vmem:[%s4645_s9 + $0x28] sm:$0xff]   ;;  %v2935_v45 = vld [vmem:[%s4646_s6] ss:$0 sm:$0xff] }
 0x1b2   :  { %2181 = vmatpush1.bf16.msra.mxu0 %v3474_v46  ;;  %2263 = vmatpush1.bf16.msra.mxu1 %v3477_v47 }
 0x1b3   :  { %2182 = vmatprep.subr.bf16.mxu0 %v3482_v49  ;;  %2264 = vmatprep.subr.bf16.mxu1 %v3485_v50 }
 0x1b6   :  { %2183 = vmatpush1.bf16.msra.mxu0 %v3480_v51  ;;  %2265 = vmatpush1.bf16.msra.mxu1 %v3483_v52 }
 0x1b7   :  { %2184 = vmatprep.subr.bf16.mxu0 %v3488_v53  ;;  %2266 = vmatprep.subr.bf16.mxu1 %v3491_v54  ;;  %v3520_v54 = vld [vmem:[%s4645_s9 + $0x30] sm:$0xff]  }
 0x1ba   :  { %2185 = vmatpush1.bf16.msra.mxu0 %v3486_v55  ;;  %2267 = vmatpush1.bf16.msra.mxu1 %v3489_v57  ;;  %v3521_v55 = vld [vmem:[%s4645_s9 + $0x38] sm:$0xff]   ;;  %v2944_v57 = vld [vmem:[%s4647_s8] ss:$0 sm:$0xff] }
 0x1bb   :  { %2186 = vmatprep.subr.bf16.mxu0 %v3494_v58  ;;  %2268 = vmatprep.subr.bf16.mxu1 %v3497_v59 }
 0x1be   :  { %2187 = vmatpush1.bf16.msra.mxu0 %v3492_v61  ;;  %2269 = vmatpush1.bf16.msra.mxu1 %v3495_v0 }
 0x1bf   :  { %2989 = vmatprep.subr.bf16.mxu0 %v3523_v3  ;;  %3009 = vmatprep.subr.bf16.mxu1 %v3523_v3 }
 0x1c1   :  { %2205 = vmatmul.mubr.bf16.vlgmr.msra.gmra.mrb[12].mxu0 %v1532_v2  ;;  %2287 = vmatmul.mubr.bf16.vlgmr.msra.gmra.mrb[12].mxu1 %v1532_v2 }
 0x1c2   :  { %2990 = vmatpush3.bf16.msra.mxu0 %v3498_v1  ;;  %3005 = vmatprep.mubr.msk.bf16.mxu0 %vm3524_vm0, %v3523_v3 }
 0x1c3   :  { %2991 = vmatprep.subr.bf16.mxu0 %v3523_v3  ;;  %3025 = vmatprep.mubr.msk.bf16.mxu1 %vm3524_vm0, %v3523_v3 }
 0x1c4   :  { %3010 = vmatpush3.bf16.msra.mxu1 %v3506_v10 }
 0x1c5   :  { %3011 = vmatprep.subr.bf16.mxu1 %v3523_v3 }
 0x1c6   :  { %2992 = vmatpush3.bf16.msra.mxu0 %v3499_v5 }
 0x1c7   :  { %2993 = vmatprep.subr.bf16.mxu0 %v3523_v3 }
 0x1c8   :  { %3012 = vmatpush3.bf16.msra.mxu1 %v3507_v11 }
 0x1c9   :  { %3013 = vmatprep.subr.bf16.mxu1 %v3523_v3 }
 0x1ca   :  { %2994 = vmatpush3.bf16.msra.mxu0 %v3500_v56 }
 0x1cb   :  { %2995 = vmatprep.subr.bf16.mxu0 %v3523_v3 }
 0x1cc   :  { %3014 = vmatpush3.bf16.msra.mxu1 %v3508_v62 }
 0x1cd   :  { %3015 = vmatprep.subr.bf16.mxu1 %v3523_v3 }
 0x1ce   :  { %2996 = vmatpush3.bf16.msra.mxu0 %v3501_v6 }
 0x1cf   :  { %2997 = vmatprep.subr.bf16.mxu0 %v3523_v3 }
 0x1d0   :  { %3016 = vmatpush3.bf16.msra.mxu1 %v3509_v12 }
 0x1d1   :  { %3017 = vmatprep.subr.bf16.mxu1 %v3523_v3 }
 0x1d2   :  { %2998 = vmatpush3.bf16.msra.mxu0 %v3502_v7 }
 0x1d3   :  { %2999 = vmatprep.subr.bf16.mxu0 %v3523_v3 }
 0x1d4   :  { %3018 = vmatpush3.bf16.msra.mxu1 %v3510_v13 }
 0x1d5   :  { %3019 = vmatprep.subr.bf16.mxu1 %v3523_v3 }
 0x1d6   :  { %3000 = vmatpush3.bf16.msra.mxu0 %v3503_v8 }
 0x1d7   :  { %3001 = vmatprep.subr.bf16.mxu0 %v3523_v3 }
 0x1d8   :  { %3020 = vmatpush3.bf16.msra.mxu1 %v3511_v14 }
 0x1d9   :  { %3021 = vmatprep.subr.bf16.mxu1 %v3523_v3 }
 0x1da   :  { %3002 = vmatpush3.bf16.msra.mxu0 %v3504_v9 }
 0x1db   :  { %3003 = vmatprep.subr.bf16.mxu0 %v3523_v3 }
 0x1dc   :  { %3022 = vmatpush3.bf16.msra.mxu1 %v3512_v37 }
 0x1dd   :  { %3023 = vmatprep.subr.bf16.mxu1 %v3523_v3 }
 0x1de   :  { %3004 = vmatpush3.bf16.msra.mxu0 %v3505_v4 }
 0x1df   :  { %3029 = vmatprep.subr.bf16.mxu0 %v3523_v3 }
 0x1e0   :  { %3024 = vmatpush3.bf16.msra.mxu1 %v3513_v38 }
 0x294   :  { %v2206_v19 = vpop.f32.mrb[12].mxu0  ;;  %v2288_v20 = vpop.f32.mrb[12].mxu1 }
 0x295   :  { %v3049_v22 = vadd.f32 %v2206_v19, %v1634_v16  ;;  %v3051_v23 = vadd.f32 %v2288_v20, %v1642_v17  ;;  %v2208_v24 = vpop.f32.mrb[13].mxu0  ;;  %v2290_v25 = vpop.f32.mrb[13].mxu1 }
 0x296   :  { %v3050_v28 = vadd.f32 %v2208_v24, %v1638_v48  ;;  %v3052_v29 = vadd.f32 %v2290_v25, %v1646_v18  ;;  %v2210_v30 = vpop.f32.mrb[14].mxu0  ;;  %v2292_v31 = vpop.f32.mrb[14].mxu1 }
 0x297   :  { %v2295_v32 = vmax.f32 %v3049_v22, 0.0  ;;  %v2297_v21 = vmax.f32 %v3051_v23, 0.0  ;;  %v2211_v33 = vpop.f32.mrb[15].mxu0  ;;  %v2293_v60 = vpop.f32.mrb[15].mxu1 }
 0x298   :  { %v2296_v34 = vmax.f32 %v3050_v28, 0.0  ;;  %v2298_v27 = vmax.f32 %v3052_v29, 0.0 }
 0x29a   :  { %v2299_v35 = vmax.f32 %v2295_v32, %v2296_v34  ;;  %v2300_v26 = vmax.f32 %v2297_v21, %v2298_v27 }
 0x29c   :  { %v2301_v36 = vmax.f32 %v2299_v35, %v2300_v26 }
 0x29e   :  { %v2302_v63 = vpack.c.bf16 %v2301_v36, %v2301_v36 }
 0x2a0   :  { %3006 = vmatmul.mubr.bf16.vlgmr.msra.gmra.mrb[16].mxu0 %v2302_v63 }
 0x2a1   :  { %3045 = vmatprep.mubr.msk.bf16.mxu0 %vm3524_vm0, %v3523_v3  ;;  %3030 = vmatpush3.bf16.msra.mxu0 %v3514_v39 }
 0x2a2   :  { %3031 = vmatprep.subr.bf16.mxu0 %v3523_v3 }
 0x2a5   :  { %3032 = vmatpush3.bf16.msra.mxu0 %v3515_v40 }
 0x2a6   :  { %3033 = vmatprep.subr.bf16.mxu0 %v3523_v3 }
 0x2a9   :  { %3034 = vmatpush3.bf16.msra.mxu0 %v3516_v41 }
 0x2aa   :  { %3035 = vmatprep.subr.bf16.mxu0 %v3523_v3 }
 0x2ad   :  { %3036 = vmatpush3.bf16.msra.mxu0 %v3517_v42 }
 0x2ae   :  { %3037 = vmatprep.subr.bf16.mxu0 %v3523_v3 }
 0x2b1   :  { %3038 = vmatpush3.bf16.msra.mxu0 %v3518_v43 }
 0x2b2   :  { %3039 = vmatprep.subr.bf16.mxu0 %v3523_v3 }
 0x2b5   :  { %3040 = vmatpush3.bf16.msra.mxu0 %v3519_v44 }
 0x2b6   :  { %3041 = vmatprep.subr.bf16.mxu0 %v3523_v3 }
 0x2b9   :  { %3042 = vmatpush3.bf16.msra.mxu0 %v3520_v54 }
 0x2ba   :  { %3043 = vmatprep.subr.bf16.mxu0 %v3523_v3  ;;  %v2953_v3 = vld [vmem:[%s4648_s10] ss:$0 sm:$0xff] }
 0x2bd   :  { %3044 = vmatpush3.bf16.msra.mxu0 %v3521_v55 }
 0x373   :  { %v2408_v46 = vpop.f32.mrb[16].mxu0 }
 0x374   :  { %v2409_v47 = vadd.f32 %v2935_v45, %v2408_v46  ;;  %v3007_v49 = vpop.f32.mrb[17].mxu0 }
 0x375   :  { %v2411_v50 = vpop.f32.mrb[18].mxu0 }
 0x376   :  { %v2414_v51 = vmax.f32 %v2409_v47, 0.0  ;;  %v3008_v52 = vpop.f32.mrb[19].mxu0 }
 0x378   :  { %v2415_v53 = vpack.c.bf16 %v2414_v51, %v2414_v51 }
 0x37a   :  { %3026 = vmatmul.mubr.bf16.vlgmr.msra.gmra.mrb[16].mxu1 %v2415_v53 }
 0x44d   :  { %v2521_v58 = vpop.f32.mrb[16].mxu1 }
 0x44e   :  { %v2522_v59 = vadd.f32 %v2944_v57, %v2521_v58  ;;  %v3027_v61 = vpop.f32.mrb[17].mxu1 }
 0x44f   :  { %v2524_v0 = vpop.f32.mrb[18].mxu1 }
 0x450   :  { %v2527_v1 = vmax.f32 %v2522_v59, 0.0  ;;  %v3028_v2 = vpop.f32.mrb[19].mxu1 }
 0x452   :  { %v2528_v5 = vpack.c.bf16 %v2527_v1, %v2527_v1 }
 0x454   :  { %3046 = vmatmul.mubr.bf16.vlgmr.msra.gmra.mrb[20].mxu0 %v2528_v5 }
 0x527   :  { %v2634_v56 = vpop.f32.mrb[20].mxu0 }
 0x528   :  { %v2635_v6 = vadd.f32 %v2953_v3, %v2634_v56  ;;  %v3047_v7 = vpop.f32.mrb[21].mxu0 }
 0x529   :  { %v2637_v8 = vpop.f32.mrb[22].mxu0 }
 0x52a   :  { %2640 = vst [vmem:[%s4649_s11] sm:$0xff] %v2635_v6  ;;  %v3048_v9 = vpop.f32.mrb[23].mxu0 }

</bundles_post_ra>
